<compile_context>
chip_gen: v6e
topology: v6e:2x2x1
jax: 0.10.0
libtpu: 0.0.40
codegen_flags: <defaults>
</compile_context>

<pallas_src>
import numpy as np
import jax
import jax.numpy as jnp
from jax import lax
from jax.experimental import pallas as pl
from jax.experimental.pallas import tpu as pltpu


# ----------------------------------------------------------------------------
# Fused decoder kernel (one batch element per grid step)
# ----------------------------------------------------------------------------
def _decoder_kernel(xp_ref,                       # (1, 8, 100)  padded input (Wp=10)
                    w1_ref, w2_ref,               # (9, 8, 8)    res-conv taps (Cout, Cin)
                    wu_ref, bu_ref,               # (25, 4, 8), (4, 1)
                    g_ref, be_ref,                # (4, 1), (4, 1)   LN gamma/beta
                    wc1_ref, bc1_ref,             # (9, 4, 4), (4, 1)
                    wc2_ref, bc2_ref,             # (9, 4, 4), (4, 1)
                    w3_ref, b3_ref,               # (3, 4), (3, 1)
                    dup_ref,                      # (8, 16)  nearest-2x column duplicator
                    m10_ref, m18_ref, m16_ref,    # (1,78), (1,248), (1,222) validity masks
                    o_ref,                        # (1, 3, 256)  NCHW-flat output
                    h1pad, uppad, c1pad, c2pad, c3pad):   # VMEM scratch
    f32 = jnp.float32
    eps = 1e-5

    def conv_taps(a, w_ref, KH, KW, Wp, Lq):
        # a: (Cin, Hp*Wp) padded activation (flat).  Output q = h*Wp + w; the
        # columns with (q % Wp) >= Wo are garbage and are masked downstream.
        acc = None
        for t in range(KH * KW):
            off = (t // KW) * Wp + (t % KW)
            part = jnp.dot(w_ref[t], a[:, off:off + Lq],
                           preferred_element_type=f32)
            acc = part if acc is None else acc + part
        return acc

    def inorm(y, mask, count):
        # per-channel InstanceNorm, one-pass stats over the valid columns only
        ym = y * mask
        s1 = jnp.sum(ym, axis=1, keepdims=True)
        s2 = jnp.sum(ym * y, axis=1, keepdims=True)
        mean = s1 * (1.0 / count)
        var = s2 * (1.0 / count) - mean * mean
        return (y - mean) * jax.lax.rsqrt(var + eps)

    # ---------------- ResBlock (3x3 'in' relu -> 3x3 'in') + residual -------
    xp = xp_ref[0]                                   # (8, 100), Wp=10
    m10 = m10_ref[...]                               # valid iff (q % 10) < 8

    y1 = conv_taps(xp, w1_ref, 3, 3, 10, 78)         # bias skipped: cancelled by IN
    y1 = jnp.maximum(inorm(y1, m10, 64.0), 0.0)

    h1pad[...] = jnp.zeros_like(h1pad)               # re-pad for the 2nd 3x3 conv
    h1pad[:, 11:11 + 78] = y1 * m10                  # same stride (10) -> one shifted store

    y2 = conv_taps(h1pad[...], w2_ref, 3, 3, 10, 78)
    y2 = inorm(y2, m10, 64.0)

    # -------- residual add + nearest-neighbour 2x upsample, into padded buf --
    uppad[...] = jnp.zeros_like(uppad)               # (8, 18*18), Wp=18
    dup = dup_ref[...]                               # (8, 16): col j <- col j//2
    for h in range(8):
        row = y2[:, h * 10:h * 10 + 8] + xp[:, (h + 1) * 10 + 1:(h + 1) * 10 + 9]
        up_row = jnp.dot(row, dup, preferred_element_type=f32)      # (8, 16)
        base = (2 * h + 1) * 18 + 1                  # interior rows 2h+1, 2h+2
        uppad[:, base:base + 16] = up_row
        uppad[:, base + 18:base + 18 + 16] = up_row

    # ---------------- 5x5 conv (pad=1) + LayerNorm + ReLU --------------------
    m18 = m18_ref[...]                               # valid iff (q % 18) < 14
    yu = conv_taps(uppad[...], wu_ref, 5, 5, 18, 248) + bu_ref[...]
    n = 4 * 196.0                                    # C * Ho * Wo valid elements
    yum = yu * m18
    s1 = jnp.sum(yum)
    s2 = jnp.sum(yum * yu)                           # one-pass sum / sum-of-squares
    mean = s1 / n
    var = (s2 - n * mean * mean) / (n - 1.0)         # unbiased, as torch .std()
    inv = 1.0 / (jnp.sqrt(var) + eps)
    yu = (yu - mean) * inv
    yu = jnp.maximum(yu * g_ref[...] + be_ref[...], 0.0)

    c1pad[...] = jnp.zeros_like(c1pad)               # restride Wp 18 -> 16
    for h in range(14):
        c1pad[:, (h + 1) * 16 + 1:(h + 1) * 16 + 15] = yu[:, h * 18:h * 18 + 14]

    # ---------------- two 3x3 convs, norm='none', ReLU -----------------------
    m16 = m16_ref[...]                               # valid iff (q % 16) < 14
    y = conv_taps(c1pad[...], wc1_ref, 3, 3, 16, 222) + bc1_ref[...]
    y = jnp.maximum(y, 0.0)
    c2pad[...] = jnp.zeros_like(c2pad)
    c2pad[:, 17:17 + 222] = y * m16                  # same stride -> one shifted store

    y = conv_taps(c2pad[...], wc2_ref, 3, 3, 16, 222) + bc2_ref[...]
    y = jnp.maximum(y, 0.0)
    c3pad[...] = jnp.zeros_like(c3pad)
    c3pad[:, 17:17 + 222] = y * m16

    # ---------------- final 1x1 conv on the zero-padded 16x16 map ------------
    o = jnp.dot(w3_ref[...], c3pad[...], preferred_element_type=f32) + b3_ref[...]
    o_ref[0] = o.astype(o_ref.dtype)                 # (3, 256) lane-dense NCHW store


# ----------------------------------------------------------------------------
# Wrapper
# ----------------------------------------------------------------------------
def _flat_mask(Wp, Wo, Lq):
    q = np.arange(Lq)
    return jnp.asarray(((q % Wp) < Wo).astype(np.float32)[None, :])


def decoder_forward(x_nchw, p):
    """Decoder.forward: n_res=1 ('in'), upsample x2, 5x5 'ln', 3x3 x2, 1x1."""
    B, C, H, W = x_nchw.shape
    assert (C, H, W) == (8, 8, 8)
    f32 = jnp.float32

    # Padded input in channel-major flat layout (NCHW is already channel-major).
    xpad = jnp.pad(x_nchw.astype(f32), ((0, 0), (0, 0), (1, 1), (1, 1)))
    xpad = xpad.reshape(B, 8, 100)

    def taps(w):  # (KH,KW,Cin,Cout) -> (KH*KW, Cout, Cin)
        KH, KW, Cin, Cout = w.shape
        return jnp.transpose(w, (0, 1, 3, 2)).reshape(KH * KW, Cout, Cin)

    w1, w2 = taps(p["res_w1"]), taps(p["res_w2"])            # res conv biases unused:
    wu = taps(p["up_w"])                                     # cancelled by InstanceNorm
    wc1, wc2 = taps(p["c1_w"]), taps(p["c2_w"])
    w3 = jnp.transpose(p["c3_w"][0, 0])                      # (3, 4)

    bu = p["up_b"].reshape(4, 1)
    g, be = p["up_gamma"].reshape(4, 1), p["up_beta"].reshape(4, 1)
    bc1, bc2 = p["c1_b"].reshape(4, 1), p["c2_b"].reshape(4, 1)
    b3 = p["c3_b"].reshape(3, 1)

    dup = jnp.asarray(np.kron(np.eye(8), np.ones((1, 2))), f32)   # (8, 16)
    m10 = _flat_mask(10, 8, 78)
    m18 = _flat_mask(18, 14, 248)
    m16 = _flat_mask(16, 14, 222)

    def full(shape):
        return pl.BlockSpec(shape, lambda b, _s=shape: (0,) * len(_s))

    out = pl.pallas_call(
        _decoder_kernel,
        out_shape=jax.ShapeDtypeStruct((B, 3, 256), f32),
        grid=(B,),
        in_specs=[
            pl.BlockSpec((1, 8, 100), lambda b: (b, 0, 0)),
            full((9, 8, 8)), full((9, 8, 8)),
            full((25, 4, 8)), full((4, 1)),
            full((4, 1)), full((4, 1)),
            full((9, 4, 4)), full((4, 1)),
            full((9, 4, 4)), full((4, 1)),
            full((3, 4)), full((3, 1)),
            full((8, 16)),
            full((1, 78)), full((1, 248)), full((1, 222)),
        ],
        out_specs=pl.BlockSpec((1, 3, 256), lambda b: (b, 0, 0)),
        scratch_shapes=[
            pltpu.VMEM((8, 100), f32),   # res conv1 output (re-padded)
            pltpu.VMEM((8, 324), f32),   # upsampled + padded (Wp=18)
            pltpu.VMEM((4, 256), f32),   # input to c1 (Wp=16)
            pltpu.VMEM((4, 256), f32),   # input to c2
            pltpu.VMEM((4, 256), f32),   # input to c3 (also the 16x16 output grid)
        ],
        compiler_params=pltpu.CompilerParams(
            dimension_semantics=("parallel",)),      # v7x: one sample per TensorCore
    )(xpad, w1, w2, wu, bu, g, be, wc1, bc1, wc2, bc2, w3, b3,
      dup, m10, m18, m16)

    return out.reshape(B, 3, 16, 16)


# ----------------------------------------------------------------------------
# Pure-JAX reference (for correctness), params
# ----------------------------------------------------------------------------
def _conv_ref(x, w, b):
    y = lax.conv_general_dilated(
        x, w, window_strides=(1, 1), padding=[(1, 1), (1, 1)],
        dimension_numbers=("NCHW", "HWIO", "NCHW"),
        precision=lax.Precision.HIGHEST)
    return y + b.reshape(1, -1, 1, 1)


def _in_ref(y, eps=1e-5):
    m = jnp.mean(y, axis=(2, 3), keepdims=True)
    v = jnp.mean((y - m) ** 2, axis=(2, 3), keepdims=True)
    return (y - m) * jax.lax.rsqrt(v + eps)


def _ln_ref(y, gamma, beta, eps=1e-5):
    B = y.shape[0]
    flat = y.reshape(B, -1)
    m = flat.mean(axis=1).reshape(B, 1, 1, 1)
    s = jnp.std(flat, axis=1, ddof=1).reshape(B, 1, 1, 1)
    y = (y - m) / (s + eps)
    return y * gamma.reshape(1, -1, 1, 1) + beta.reshape(1, -1, 1, 1)


def decoder_reference(x, p):
    h = jax.nn.relu(_in_ref(_conv_ref(x, p["res_w1"], p["res_b1"])))
    h = _in_ref(_conv_ref(h, p["res_w2"], p["res_b2"]))
    h = h + x                                             # ResBlock residual
    h = jnp.repeat(jnp.repeat(h, 2, axis=2), 2, axis=3)   # nearest 2x
    h = jax.nn.relu(_ln_ref(_conv_ref(h, p["up_w"], p["up_b"]),
                            p["up_gamma"], p["up_beta"]))
    h = jax.nn.relu(_conv_ref(h, p["c1_w"], p["c1_b"]))
    h = jax.nn.relu(_conv_ref(h, p["c2_w"], p["c2_b"]))
    return _conv_ref(h, p["c3_w"], p["c3_b"])


def init_params(key, dim=8, output_dim=3):
    ks = jax.random.split(key, 8)

    def w(k, kh, kw, cin, cout):
        fan_in = kh * kw * cin
        return jax.random.normal(k, (kh, kw, cin, cout), jnp.float32) / jnp.sqrt(fan_in)

    d2 = dim // 2
    return dict(
        # res_b1 / res_b2 are used by the reference only; the kernel skips them
        # because a per-channel bias is exactly cancelled by InstanceNorm.
        res_w1=w(ks[0], 3, 3, dim, dim), res_b1=jnp.full((dim,), 0.01, jnp.float32),
        res_w2=w(ks[1], 3, 3, dim, dim), res_b2=jnp.full((dim,), -0.01, jnp.float32),
        up_w=w(ks[2], 5, 5, dim, d2), up_b=jnp.full((d2,), 0.02, jnp.float32),
        up_gamma=jax.random.uniform(ks[3], (d2,), jnp.float32),   # torch .uniform_()
        up_beta=jnp.zeros((d2,), jnp.float32),
        c1_w=w(ks[4], 3, 3, d2, d2), c1_b=jnp.full((d2,), 0.01, jnp.float32),
        c2_w=w(ks[5], 3, 3, d2, d2), c2_b=jnp.full((d2,), -0.02, jnp.float32),
        c3_w=w(ks[6], 1, 1, d2, output_dim),
        c3_b=jnp.full((output_dim,), 0.03, jnp.float32),
    )


if __name__ == "__main__":
    key = jax.random.PRNGKey(0)
    pkey, xkey = jax.random.split(key)
    params = init_params(pkey, dim=8, output_dim=3)

    # NCHW input matching PyTorch: batch=2, channels=dim=8, spatial 8x8
    x = jax.random.normal(xkey, (2, 8, 8, 8), jnp.float32)

    fwd = jax.jit(lambda a: decoder_forward(a, params))
    out = fwd(x)
    jax.block_until_ready(out)

    # 8x8 -> (res) 8x8 -> (x2) 16x16 -> (5x5,p=1) 14x14 -> (3x3,p=1)x2 14x14
    #      -> (1x1,p=1) 16x16 ; channels 8 -> 4 -> 3
    assert out.shape == (2, 3, 16, 16), out.shape
    assert bool(jnp.all(jnp.isfinite(out)))

    ref = decoder_reference(x, params)
    err = float(jnp.max(jnp.abs(out - ref)))
    assert err < 5e-2, f"max |pallas - reference| = {err}"

    print("KERNEL_OK")
</pallas_src>

<mosaic_0001>
module attributes {stable_mosaic.version = 11 : i64} {
  func.func @_decoder_kernel(%arg0: i32, %arg1: memref<1x8x100xf32, #tpu.memory_space<vmem>>, %arg2: memref<9x8x8xf32, #tpu.memory_space<vmem>>, %arg3: memref<9x8x8xf32, #tpu.memory_space<vmem>>, %arg4: memref<25x4x8xf32, #tpu.memory_space<vmem>>, %arg5: memref<4x1xf32, #tpu.memory_space<vmem>>, %arg6: memref<4x1xf32, #tpu.memory_space<vmem>>, %arg7: memref<4x1xf32, #tpu.memory_space<vmem>>, %arg8: memref<9x4x4xf32, #tpu.memory_space<vmem>>, %arg9: memref<4x1xf32, #tpu.memory_space<vmem>>, %arg10: memref<9x4x4xf32, #tpu.memory_space<vmem>>, %arg11: memref<4x1xf32, #tpu.memory_space<vmem>>, %arg12: memref<3x4xf32, #tpu.memory_space<vmem>>, %arg13: memref<3x1xf32, #tpu.memory_space<vmem>>, %arg14: memref<8x16xf32, #tpu.memory_space<vmem>>, %arg15: memref<1x78xf32, #tpu.memory_space<vmem>>, %arg16: memref<1x248xf32, #tpu.memory_space<vmem>>, %arg17: memref<1x222xf32, #tpu.memory_space<vmem>>, %arg18: memref<1x3x256xf32, #tpu.memory_space<vmem>>, %arg19: memref<8x100xf32, #tpu.memory_space<vmem>>, %arg20: memref<8x324xf32, #tpu.memory_space<vmem>>, %arg21: memref<4x256xf32, #tpu.memory_space<vmem>>, %arg22: memref<4x256xf32, #tpu.memory_space<vmem>>, %arg23: memref<4x256xf32, #tpu.memory_space<vmem>>) attributes {dimension_semantics = [#tpu.dimension_semantics<parallel>], iteration_bounds = array<i64: 2>, scalar_prefetch = 0 : i64, scratch_operands = 5 : i64, tpu.core_type = #tpu.core_type<tc>, window_params = [{transform_indices = @transform_0, window_bounds = array<i64: 1, 8, 100>}, {pipeline_mode = #tpu.pipeline_mode<synchronous>, transform_indices = @transform_1, window_bounds = array<i64: 9, 8, 8>}, {pipeline_mode = #tpu.pipeline_mode<synchronous>, transform_indices = @transform_2, window_bounds = array<i64: 9, 8, 8>}, {pipeline_mode = #tpu.pipeline_mode<synchronous>, transform_indices = @transform_3, window_bounds = array<i64: 25, 4, 8>}, {pipeline_mode = #tpu.pipeline_mode<synchronous>, transform_indices = @transform_4, window_bounds = array<i64: 4, 1>}, {pipeline_mode = #tpu.pipeline_mode<synchronous>, transform_indices = @transform_5, window_bounds = array<i64: 4, 1>}, {pipeline_mode = #tpu.pipeline_mode<synchronous>, transform_indices = @transform_6, window_bounds = array<i64: 4, 1>}, {pipeline_mode = #tpu.pipeline_mode<synchronous>, transform_indices = @transform_7, window_bounds = array<i64: 9, 4, 4>}, {pipeline_mode = #tpu.pipeline_mode<synchronous>, transform_indices = @transform_8, window_bounds = array<i64: 4, 1>}, {pipeline_mode = #tpu.pipeline_mode<synchronous>, transform_indices = @transform_9, window_bounds = array<i64: 9, 4, 4>}, {pipeline_mode = #tpu.pipeline_mode<synchronous>, transform_indices = @transform_10, window_bounds = array<i64: 4, 1>}, {pipeline_mode = #tpu.pipeline_mode<synchronous>, transform_indices = @transform_11, window_bounds = array<i64: 3, 4>}, {pipeline_mode = #tpu.pipeline_mode<synchronous>, transform_indices = @transform_12, window_bounds = array<i64: 3, 1>}, {pipeline_mode = #tpu.pipeline_mode<synchronous>, transform_indices = @transform_13, window_bounds = array<i64: 8, 16>}, {pipeline_mode = #tpu.pipeline_mode<synchronous>, transform_indices = @transform_14, window_bounds = array<i64: 1, 78>}, {pipeline_mode = #tpu.pipeline_mode<synchronous>, transform_indices = @transform_15, window_bounds = array<i64: 1, 248>}, {pipeline_mode = #tpu.pipeline_mode<synchronous>, transform_indices = @transform_16, window_bounds = array<i64: 1, 222>}, {transform_indices = @transform_17, window_bounds = array<i64: 1, 3, 256>}]} {
    %c0 = arith.constant 0 : index
    %c0_0 = arith.constant 0 : index
    %c0_1 = arith.constant 0 : index
    %0 = vector.load %arg1[%c0, %c0_0, %c0_1] : memref<1x8x100xf32, #tpu.memory_space<vmem>>, vector<1x8x100xf32>
    %1 = vector.shape_cast %0 : vector<1x8x100xf32> to vector<8x100xf32>
    %c0_2 = arith.constant 0 : index
    %c0_3 = arith.constant 0 : index
    %2 = vector.load %arg15[%c0_2, %c0_3] : memref<1x78xf32, #tpu.memory_space<vmem>>, vector<1x78xf32>
    %c0_4 = arith.constant 0 : index
    %c0_5 = arith.constant 0 : index
    %c0_6 = arith.constant 0 : index
    %3 = vector.load %arg2[%c0_4, %c0_5, %c0_6] : memref<9x8x8xf32, #tpu.memory_space<vmem>>, vector<1x8x8xf32>
    %4 = vector.shape_cast %3 : vector<1x8x8xf32> to vector<8x8xf32>
    %5 = vector.extract_strided_slice %1 {offsets = [0, 0], sizes = [8, 78], strides = [1, 1]} : vector<8x100xf32> to vector<8x78xf32>
    %cst = arith.constant dense<0.000000e+00> : vector<8x78xf32>
    %6 = tpu.matmul %4, %5, %cst {dimension_numbers = #tpu.dot_dimension_numbers<[1], [0], [0], [1], [0, 0, 1, 1], [], []>} : vector<8x8xf32>, vector<8x78xf32>, vector<8x78xf32> -> vector<8x78xf32>
    %c1 = arith.constant 1 : index
    %c0_7 = arith.constant 0 : index
    %c0_8 = arith.constant 0 : index
    %7 = vector.load %arg2[%c1, %c0_7, %c0_8] : memref<9x8x8xf32, #tpu.memory_space<vmem>>, vector<1x8x8xf32>
    %8 = vector.shape_cast %7 : vector<1x8x8xf32> to vector<8x8xf32>
    %9 = vector.extract_strided_slice %1 {offsets = [0, 1], sizes = [8, 78], strides = [1, 1]} : vector<8x100xf32> to vector<8x78xf32>
    %cst_9 = arith.constant dense<0.000000e+00> : vector<8x78xf32>
    %10 = tpu.matmul %8, %9, %cst_9 {dimension_numbers = #tpu.dot_dimension_numbers<[1], [0], [0], [1], [0, 0, 1, 1], [], []>} : vector<8x8xf32>, vector<8x78xf32>, vector<8x78xf32> -> vector<8x78xf32>
    %11 = arith.addf %6, %10 : vector<8x78xf32>
    %c2 = arith.constant 2 : index
    %c0_10 = arith.constant 0 : index
    %c0_11 = arith.constant 0 : index
    %12 = vector.load %arg2[%c2, %c0_10, %c0_11] : memref<9x8x8xf32, #tpu.memory_space<vmem>>, vector<1x8x8xf32>
    %13 = vector.shape_cast %12 : vector<1x8x8xf32> to vector<8x8xf32>
    %14 = vector.extract_strided_slice %1 {offsets = [0, 2], sizes = [8, 78], strides = [1, 1]} : vector<8x100xf32> to vector<8x78xf32>
    %cst_12 = arith.constant dense<0.000000e+00> : vector<8x78xf32>
    %15 = tpu.matmul %13, %14, %cst_12 {dimension_numbers = #tpu.dot_dimension_numbers<[1], [0], [0], [1], [0, 0, 1, 1], [], []>} : vector<8x8xf32>, vector<8x78xf32>, vector<8x78xf32> -> vector<8x78xf32>
    %16 = arith.addf %11, %15 : vector<8x78xf32>
    %c3 = arith.constant 3 : index
    %c0_13 = arith.constant 0 : index
    %c0_14 = arith.constant 0 : index
    %17 = vector.load %arg2[%c3, %c0_13, %c0_14] : memref<9x8x8xf32, #tpu.memory_space<vmem>>, vector<1x8x8xf32>
    %18 = vector.shape_cast %17 : vector<1x8x8xf32> to vector<8x8xf32>
    %19 = vector.extract_strided_slice %1 {offsets = [0, 10], sizes = [8, 78], strides = [1, 1]} : vector<8x100xf32> to vector<8x78xf32>
    %cst_15 = arith.constant dense<0.000000e+00> : vector<8x78xf32>
    %20 = tpu.matmul %18, %19, %cst_15 {dimension_numbers = #tpu.dot_dimension_numbers<[1], [0], [0], [1], [0, 0, 1, 1], [], []>} : vector<8x8xf32>, vector<8x78xf32>, vector<8x78xf32> -> vector<8x78xf32>
    %21 = arith.addf %16, %20 : vector<8x78xf32>
    %c4 = arith.constant 4 : index
    %c0_16 = arith.constant 0 : index
    %c0_17 = arith.constant 0 : index
    %22 = vector.load %arg2[%c4, %c0_16, %c0_17] : memref<9x8x8xf32, #tpu.memory_space<vmem>>, vector<1x8x8xf32>
    %23 = vector.shape_cast %22 : vector<1x8x8xf32> to vector<8x8xf32>
    %24 = vector.extract_strided_slice %1 {offsets = [0, 11], sizes = [8, 78], strides = [1, 1]} : vector<8x100xf32> to vector<8x78xf32>
    %cst_18 = arith.constant dense<0.000000e+00> : vector<8x78xf32>
    %25 = tpu.matmul %23, %24, %cst_18 {dimension_numbers = #tpu.dot_dimension_numbers<[1], [0], [0], [1], [0, 0, 1, 1], [], []>} : vector<8x8xf32>, vector<8x78xf32>, vector<8x78xf32> -> vector<8x78xf32>
    %26 = arith.addf %21, %25 : vector<8x78xf32>
    %c5 = arith.constant 5 : index
    %c0_19 = arith.constant 0 : index
    %c0_20 = arith.constant 0 : index
    %27 = vector.load %arg2[%c5, %c0_19, %c0_20] : memref<9x8x8xf32, #tpu.memory_space<vmem>>, vector<1x8x8xf32>
    %28 = vector.shape_cast %27 : vector<1x8x8xf32> to vector<8x8xf32>
    %29 = vector.extract_strided_slice %1 {offsets = [0, 12], sizes = [8, 78], strides = [1, 1]} : vector<8x100xf32> to vector<8x78xf32>
    %cst_21 = arith.constant dense<0.000000e+00> : vector<8x78xf32>
    %30 = tpu.matmul %28, %29, %cst_21 {dimension_numbers = #tpu.dot_dimension_numbers<[1], [0], [0], [1], [0, 0, 1, 1], [], []>} : vector<8x8xf32>, vector<8x78xf32>, vector<8x78xf32> -> vector<8x78xf32>
    %31 = arith.addf %26, %30 : vector<8x78xf32>
    %c6 = arith.constant 6 : index
    %c0_22 = arith.constant 0 : index
    %c0_23 = arith.constant 0 : index
    %32 = vector.load %arg2[%c6, %c0_22, %c0_23] : memref<9x8x8xf32, #tpu.memory_space<vmem>>, vector<1x8x8xf32>
    %33 = vector.shape_cast %32 : vector<1x8x8xf32> to vector<8x8xf32>
    %34 = vector.extract_strided_slice %1 {offsets = [0, 20], sizes = [8, 78], strides = [1, 1]} : vector<8x100xf32> to vector<8x78xf32>
    %cst_24 = arith.constant dense<0.000000e+00> : vector<8x78xf32>
    %35 = tpu.matmul %33, %34, %cst_24 {dimension_numbers = #tpu.dot_dimension_numbers<[1], [0], [0], [1], [0, 0, 1, 1], [], []>} : vector<8x8xf32>, vector<8x78xf32>, vector<8x78xf32> -> vector<8x78xf32>
    %36 = arith.addf %31, %35 : vector<8x78xf32>
    %c7 = arith.constant 7 : index
    %c0_25 = arith.constant 0 : index
    %c0_26 = arith.constant 0 : index
    %37 = vector.load %arg2[%c7, %c0_25, %c0_26] : memref<9x8x8xf32, #tpu.memory_space<vmem>>, vector<1x8x8xf32>
    %38 = vector.shape_cast %37 : vector<1x8x8xf32> to vector<8x8xf32>
    %39 = vector.extract_strided_slice %1 {offsets = [0, 21], sizes = [8, 78], strides = [1, 1]} : vector<8x100xf32> to vector<8x78xf32>
    %cst_27 = arith.constant dense<0.000000e+00> : vector<8x78xf32>
    %40 = tpu.matmul %38, %39, %cst_27 {dimension_numbers = #tpu.dot_dimension_numbers<[1], [0], [0], [1], [0, 0, 1, 1], [], []>} : vector<8x8xf32>, vector<8x78xf32>, vector<8x78xf32> -> vector<8x78xf32>
    %41 = arith.addf %36, %40 : vector<8x78xf32>
    %c8 = arith.constant 8 : index
    %c0_28 = arith.constant 0 : index
    %c0_29 = arith.constant 0 : index
    %42 = vector.load %arg2[%c8, %c0_28, %c0_29] : memref<9x8x8xf32, #tpu.memory_space<vmem>>, vector<1x8x8xf32>
    %43 = vector.shape_cast %42 : vector<1x8x8xf32> to vector<8x8xf32>
    %44 = vector.extract_strided_slice %1 {offsets = [0, 22], sizes = [8, 78], strides = [1, 1]} : vector<8x100xf32> to vector<8x78xf32>
    %cst_30 = arith.constant dense<0.000000e+00> : vector<8x78xf32>
    %45 = tpu.matmul %43, %44, %cst_30 {dimension_numbers = #tpu.dot_dimension_numbers<[1], [0], [0], [1], [0, 0, 1, 1], [], []>} : vector<8x8xf32>, vector<8x78xf32>, vector<8x78xf32> -> vector<8x78xf32>
    %46 = arith.addf %41, %45 : vector<8x78xf32>
    %47 = vector.broadcast %2 : vector<1x78xf32> to vector<8x78xf32>
    %48 = arith.mulf %46, %47 : vector<8x78xf32>
    %cst_31 = arith.constant dense<0.000000e+00> : vector<8xf32>
    %49 = vector.multi_reduction <add>, %48, %cst_31 [1] : vector<8x78xf32> to vector<8xf32>
    %50 = vector.shape_cast %49 : vector<8xf32> to vector<8x1xf32>
    %51 = arith.mulf %48, %46 : vector<8x78xf32>
    %cst_32 = arith.constant dense<0.000000e+00> : vector<8xf32>
    %52 = vector.multi_reduction <add>, %51, %cst_32 [1] : vector<8x78xf32> to vector<8xf32>
    %53 = vector.shape_cast %52 : vector<8xf32> to vector<8x1xf32>
    %cst_33 = arith.constant 1.562500e-02 : f32
    %54 = vector.broadcast %cst_33 : f32 to vector<8x1xf32>
    %55 = arith.mulf %50, %54 : vector<8x1xf32>
    %cst_34 = arith.constant 1.562500e-02 : f32
    %56 = vector.broadcast %cst_34 : f32 to vector<8x1xf32>
    %57 = arith.mulf %53, %56 : vector<8x1xf32>
    %58 = arith.mulf %55, %55 : vector<8x1xf32>
    %59 = arith.subf %57, %58 : vector<8x1xf32>
    %60 = vector.broadcast %55 : vector<8x1xf32> to vector<8x78xf32>
    %61 = arith.subf %46, %60 : vector<8x78xf32>
    %cst_35 = arith.constant 9.99999974E-6 : f32
    %62 = vector.broadcast %cst_35 : f32 to vector<8x1xf32>
    %63 = arith.addf %59, %62 : vector<8x1xf32>
    %64 = math.rsqrt %63 : vector<8x1xf32>
    %65 = vector.broadcast %64 : vector<8x1xf32> to vector<8x78xf32>
    %66 = arith.mulf %61, %65 : vector<8x78xf32>
    %cst_36 = arith.constant 0.000000e+00 : f32
    %67 = vector.broadcast %cst_36 : f32 to vector<8x78xf32>
    %68 = arith.maximumf %66, %67 : vector<8x78xf32>
    %cst_37 = arith.constant 0.000000e+00 : f32
    %69 = vector.broadcast %cst_37 : f32 to vector<8x100xf32>
    %c0_38 = arith.constant 0 : index
    %c0_39 = arith.constant 0 : index
    %70 = vector.load %arg19[%c0_38, %c0_39] : memref<8x100xf32, #tpu.memory_space<vmem>>, vector<8x100xf32>
    tpu.vector_store %arg19[%c0_38, %c0_39], %69 {strides = array<i32>} : memref<8x100xf32, #tpu.memory_space<vmem>>, vector<8x100xf32>,
    %71 = vector.broadcast %2 : vector<1x78xf32> to vector<8x78xf32>
    %72 = arith.mulf %68, %71 : vector<8x78xf32>
    %c0_40 = arith.constant 0 : index
    %c11 = arith.constant 11 : index
    %73 = vector.load %arg19[%c0_40, %c11] : memref<8x100xf32, #tpu.memory_space<vmem>>, vector<8x78xf32>
    tpu.vector_store %arg19[%c0_40, %c11], %72 {strides = array<i32>} : memref<8x100xf32, #tpu.memory_space<vmem>>, vector<8x78xf32>,
    %c0_41 = arith.constant 0 : index
    %c0_42 = arith.constant 0 : index
    %74 = vector.load %arg19[%c0_41, %c0_42] : memref<8x100xf32, #tpu.memory_space<vmem>>, vector<8x100xf32>
    %c0_43 = arith.constant 0 : index
    %c0_44 = arith.constant 0 : index
    %c0_45 = arith.constant 0 : index
    %75 = vector.load %arg3[%c0_43, %c0_44, %c0_45] : memref<9x8x8xf32, #tpu.memory_space<vmem>>, vector<1x8x8xf32>
    %76 = vector.shape_cast %75 : vector<1x8x8xf32> to vector<8x8xf32>
    %77 = vector.extract_strided_slice %74 {offsets = [0, 0], sizes = [8, 78], strides = [1, 1]} : vector<8x100xf32> to vector<8x78xf32>
    %cst_46 = arith.constant dense<0.000000e+00> : vector<8x78xf32>
    %78 = tpu.matmul %76, %77, %cst_46 {dimension_numbers = #tpu.dot_dimension_numbers<[1], [0], [0], [1], [0, 0, 1, 1], [], []>} : vector<8x8xf32>, vector<8x78xf32>, vector<8x78xf32> -> vector<8x78xf32>
    %c1_47 = arith.constant 1 : index
    %c0_48 = arith.constant 0 : index
    %c0_49 = arith.constant 0 : index
    %79 = vector.load %arg3[%c1_47, %c0_48, %c0_49] : memref<9x8x8xf32, #tpu.memory_space<vmem>>, vector<1x8x8xf32>
    %80 = vector.shape_cast %79 : vector<1x8x8xf32> to vector<8x8xf32>
    %81 = vector.extract_strided_slice %74 {offsets = [0, 1], sizes = [8, 78], strides = [1, 1]} : vector<8x100xf32> to vector<8x78xf32>
    %cst_50 = arith.constant dense<0.000000e+00> : vector<8x78xf32>
    %82 = tpu.matmul %80, %81, %cst_50 {dimension_numbers = #tpu.dot_dimension_numbers<[1], [0], [0], [1], [0, 0, 1, 1], [], []>} : vector<8x8xf32>, vector<8x78xf32>, vector<8x78xf32> -> vector<8x78xf32>
    %83 = arith.addf %78, %82 : vector<8x78xf32>
    %c2_51 = arith.constant 2 : index
    %c0_52 = arith.constant 0 : index
    %c0_53 = arith.constant 0 : index
    %84 = vector.load %arg3[%c2_51, %c0_52, %c0_53] : memref<9x8x8xf32, #tpu.memory_space<vmem>>, vector<1x8x8xf32>
    %85 = vector.shape_cast %84 : vector<1x8x8xf32> to vector<8x8xf32>
    %86 = vector.extract_strided_slice %74 {offsets = [0, 2], sizes = [8, 78], strides = [1, 1]} : vector<8x100xf32> to vector<8x78xf32>
    %cst_54 = arith.constant dense<0.000000e+00> : vector<8x78xf32>
    %87 = tpu.matmul %85, %86, %cst_54 {dimension_numbers = #tpu.dot_dimension_numbers<[1], [0], [0], [1], [0, 0, 1, 1], [], []>} : vector<8x8xf32>, vector<8x78xf32>, vector<8x78xf32> -> vector<8x78xf32>
    %88 = arith.addf %83, %87 : vector<8x78xf32>
    %c3_55 = arith.constant 3 : index
    %c0_56 = arith.constant 0 : index
    %c0_57 = arith.constant 0 : index
    %89 = vector.load %arg3[%c3_55, %c0_56, %c0_57] : memref<9x8x8xf32, #tpu.memory_space<vmem>>, vector<1x8x8xf32>
    %90 = vector.shape_cast %89 : vector<1x8x8xf32> to vector<8x8xf32>
    %91 = vector.extract_strided_slice %74 {offsets = [0, 10], sizes = [8, 78], strides = [1, 1]} : vector<8x100xf32> to vector<8x78xf32>
    %cst_58 = arith.constant dense<0.000000e+00> : vector<8x78xf32>
    %92 = tpu.matmul %90, %91, %cst_58 {dimension_numbers = #tpu.dot_dimension_numbers<[1], [0], [0], [1], [0, 0, 1, 1], [], []>} : vector<8x8xf32>, vector<8x78xf32>, vector<8x78xf32> -> vector<8x78xf32>
    %93 = arith.addf %88, %92 : vector<8x78xf32>
    %c4_59 = arith.constant 4 : index
    %c0_60 = arith.constant 0 : index
    %c0_61 = arith.constant 0 : index
    %94 = vector.load %arg3[%c4_59, %c0_60, %c0_61] : memref<9x8x8xf32, #tpu.memory_space<vmem>>, vector<1x8x8xf32>
    %95 = vector.shape_cast %94 : vector<1x8x8xf32> to vector<8x8xf32>
    %96 = vector.extract_strided_slice %74 {offsets = [0, 11], sizes = [8, 78], strides = [1, 1]} : vector<8x100xf32> to vector<8x78xf32>
    %cst_62 = arith.constant dense<0.000000e+00> : vector<8x78xf32>
    %97 = tpu.matmul %95, %96, %cst_62 {dimension_numbers = #tpu.dot_dimension_numbers<[1], [0], [0], [1], [0, 0, 1, 1], [], []>} : vector<8x8xf32>, vector<8x78xf32>, vector<8x78xf32> -> vector<8x78xf32>
    %98 = arith.addf %93, %97 : vector<8x78xf32>
    %c5_63 = arith.constant 5 : index
    %c0_64 = arith.constant 0 : index
    %c0_65 = arith.constant 0 : index
    %99 = vector.load %arg3[%c5_63, %c0_64, %c0_65] : memref<9x8x8xf32, #tpu.memory_space<vmem>>, vector<1x8x8xf32>
    %100 = vector.shape_cast %99 : vector<1x8x8xf32> to vector<8x8xf32>
    %101 = vector.extract_strided_slice %74 {offsets = [0, 12], sizes = [8, 78], strides = [1, 1]} : vector<8x100xf32> to vector<8x78xf32>
    %cst_66 = arith.constant dense<0.000000e+00> : vector<8x78xf32>
    %102 = tpu.matmul %100, %101, %cst_66 {dimension_numbers = #tpu.dot_dimension_numbers<[1], [0], [0], [1], [0, 0, 1, 1], [], []>} : vector<8x8xf32>, vector<8x78xf32>, vector<8x78xf32> -> vector<8x78xf32>
    %103 = arith.addf %98, %102 : vector<8x78xf32>
    %c6_67 = arith.constant 6 : index
    %c0_68 = arith.constant 0 : index
    %c0_69 = arith.constant 0 : index
    %104 = vector.load %arg3[%c6_67, %c0_68, %c0_69] : memref<9x8x8xf32, #tpu.memory_space<vmem>>, vector<1x8x8xf32>
    %105 = vector.shape_cast %104 : vector<1x8x8xf32> to vector<8x8xf32>
    %106 = vector.extract_strided_slice %74 {offsets = [0, 20], sizes = [8, 78], strides = [1, 1]} : vector<8x100xf32> to vector<8x78xf32>
    %cst_70 = arith.constant dense<0.000000e+00> : vector<8x78xf32>
    %107 = tpu.matmul %105, %106, %cst_70 {dimension_numbers = #tpu.dot_dimension_numbers<[1], [0], [0], [1], [0, 0, 1, 1], [], []>} : vector<8x8xf32>, vector<8x78xf32>, vector<8x78xf32> -> vector<8x78xf32>
    %108 = arith.addf %103, %107 : vector<8x78xf32>
    %c7_71 = arith.constant 7 : index
    %c0_72 = arith.constant 0 : index
    %c0_73 = arith.constant 0 : index
    %109 = vector.load %arg3[%c7_71, %c0_72, %c0_73] : memref<9x8x8xf32, #tpu.memory_space<vmem>>, vector<1x8x8xf32>
    %110 = vector.shape_cast %109 : vector<1x8x8xf32> to vector<8x8xf32>
    %111 = vector.extract_strided_slice %74 {offsets = [0, 21], sizes = [8, 78], strides = [1, 1]} : vector<8x100xf32> to vector<8x78xf32>
    %cst_74 = arith.constant dense<0.000000e+00> : vector<8x78xf32>
    %112 = tpu.matmul %110, %111, %cst_74 {dimension_numbers = #tpu.dot_dimension_numbers<[1], [0], [0], [1], [0, 0, 1, 1], [], []>} : vector<8x8xf32>, vector<8x78xf32>, vector<8x78xf32> -> vector<8x78xf32>
    %113 = arith.addf %108, %112 : vector<8x78xf32>
    %c8_75 = arith.constant 8 : index
    %c0_76 = arith.constant 0 : index
    %c0_77 = arith.constant 0 : index
    %114 = vector.load %arg3[%c8_75, %c0_76, %c0_77] : memref<9x8x8xf32, #tpu.memory_space<vmem>>, vector<1x8x8xf32>
    %115 = vector.shape_cast %114 : vector<1x8x8xf32> to vector<8x8xf32>
    %116 = vector.extract_strided_slice %74 {offsets = [0, 22], sizes = [8, 78], strides = [1, 1]} : vector<8x100xf32> to vector<8x78xf32>
    %cst_78 = arith.constant dense<0.000000e+00> : vector<8x78xf32>
    %117 = tpu.matmul %115, %116, %cst_78 {dimension_numbers = #tpu.dot_dimension_numbers<[1], [0], [0], [1], [0, 0, 1, 1], [], []>} : vector<8x8xf32>, vector<8x78xf32>, vector<8x78xf32> -> vector<8x78xf32>
    %118 = arith.addf %113, %117 : vector<8x78xf32>
    %119 = vector.broadcast %2 : vector<1x78xf32> to vector<8x78xf32>
    %120 = arith.mulf %118, %119 : vector<8x78xf32>
    %cst_79 = arith.constant dense<0.000000e+00> : vector<8xf32>
    %121 = vector.multi_reduction <add>, %120, %cst_79 [1] : vector<8x78xf32> to vector<8xf32>
    %122 = vector.shape_cast %121 : vector<8xf32> to vector<8x1xf32>
    %123 = arith.mulf %120, %118 : vector<8x78xf32>
    %cst_80 = arith.constant dense<0.000000e+00> : vector<8xf32>
    %124 = vector.multi_reduction <add>, %123, %cst_80 [1] : vector<8x78xf32> to vector<8xf32>
    %125 = vector.shape_cast %124 : vector<8xf32> to vector<8x1xf32>
    %cst_81 = arith.constant 1.562500e-02 : f32
    %126 = vector.broadcast %cst_81 : f32 to vector<8x1xf32>
    %127 = arith.mulf %122, %126 : vector<8x1xf32>
    %cst_82 = arith.constant 1.562500e-02 : f32
    %128 = vector.broadcast %cst_82 : f32 to vector<8x1xf32>
    %129 = arith.mulf %125, %128 : vector<8x1xf32>
    %130 = arith.mulf %127, %127 : vector<8x1xf32>
    %131 = arith.subf %129, %130 : vector<8x1xf32>
    %132 = vector.broadcast %127 : vector<8x1xf32> to vector<8x78xf32>
    %133 = arith.subf %118, %132 : vector<8x78xf32>
    %cst_83 = arith.constant 9.99999974E-6 : f32
    %134 = vector.broadcast %cst_83 : f32 to vector<8x1xf32>
    %135 = arith.addf %131, %134 : vector<8x1xf32>
    %136 = math.rsqrt %135 : vector<8x1xf32>
    %137 = vector.broadcast %136 : vector<8x1xf32> to vector<8x78xf32>
    %138 = arith.mulf %133, %137 : vector<8x78xf32>
    %cst_84 = arith.constant 0.000000e+00 : f32
    %139 = vector.broadcast %cst_84 : f32 to vector<8x324xf32>
    %c0_85 = arith.constant 0 : index
    %c0_86 = arith.constant 0 : index
    %140 = vector.load %arg20[%c0_85, %c0_86] : memref<8x324xf32, #tpu.memory_space<vmem>>, vector<8x324xf32>
    tpu.vector_store %arg20[%c0_85, %c0_86], %139 {strides = array<i32>} : memref<8x324xf32, #tpu.memory_space<vmem>>, vector<8x324xf32>,
    %c0_87 = arith.constant 0 : index
    %c0_88 = arith.constant 0 : index
    %141 = vector.load %arg14[%c0_87, %c0_88] : memref<8x16xf32, #tpu.memory_space<vmem>>, vector<8x16xf32>
    %142 = vector.extract_strided_slice %138 {offsets = [0, 0], sizes = [8, 8], strides = [1, 1]} : vector<8x78xf32> to vector<8x8xf32>
    %143 = vector.extract_strided_slice %1 {offsets = [0, 11], sizes = [8, 8], strides = [1, 1]} : vector<8x100xf32> to vector<8x8xf32>
    %144 = arith.addf %142, %143 : vector<8x8xf32>
    %cst_89 = arith.constant dense<0.000000e+00> : vector<8x16xf32>
    %145 = tpu.matmul %144, %141, %cst_89 {dimension_numbers = #tpu.dot_dimension_numbers<[1], [0], [0], [1], [0, 0, 1, 1], [], []>} : vector<8x8xf32>, vector<8x16xf32>, vector<8x16xf32> -> vector<8x16xf32>
    %c0_90 = arith.constant 0 : index
    %c19 = arith.constant 19 : index
    %146 = vector.load %arg20[%c0_90, %c19] : memref<8x324xf32, #tpu.memory_space<vmem>>, vector<8x16xf32>
    tpu.vector_store %arg20[%c0_90, %c19], %145 {strides = array<i32>} : memref<8x324xf32, #tpu.memory_space<vmem>>, vector<8x16xf32>,
    %c0_91 = arith.constant 0 : index
    %c37 = arith.constant 37 : index
    %147 = vector.load %arg20[%c0_91, %c37] : memref<8x324xf32, #tpu.memory_space<vmem>>, vector<8x16xf32>
    tpu.vector_store %arg20[%c0_91, %c37], %145 {strides = array<i32>} : memref<8x324xf32, #tpu.memory_space<vmem>>, vector<8x16xf32>,
    %148 = vector.extract_strided_slice %138 {offsets = [0, 10], sizes = [8, 8], strides = [1, 1]} : vector<8x78xf32> to vector<8x8xf32>
    %149 = vector.extract_strided_slice %1 {offsets = [0, 21], sizes = [8, 8], strides = [1, 1]} : vector<8x100xf32> to vector<8x8xf32>
    %150 = arith.addf %148, %149 : vector<8x8xf32>
    %cst_92 = arith.constant dense<0.000000e+00> : vector<8x16xf32>
    %151 = tpu.matmul %150, %141, %cst_92 {dimension_numbers = #tpu.dot_dimension_numbers<[1], [0], [0], [1], [0, 0, 1, 1], [], []>} : vector<8x8xf32>, vector<8x16xf32>, vector<8x16xf32> -> vector<8x16xf32>
    %c0_93 = arith.constant 0 : index
    %c55 = arith.constant 55 : index
    %152 = vector.load %arg20[%c0_93, %c55] : memref<8x324xf32, #tpu.memory_space<vmem>>, vector<8x16xf32>
    tpu.vector_store %arg20[%c0_93, %c55], %151 {strides = array<i32>} : memref<8x324xf32, #tpu.memory_space<vmem>>, vector<8x16xf32>,
    %c0_94 = arith.constant 0 : index
    %c73 = arith.constant 73 : index
    %153 = vector.load %arg20[%c0_94, %c73] : memref<8x324xf32, #tpu.memory_space<vmem>>, vector<8x16xf32>
    tpu.vector_store %arg20[%c0_94, %c73], %151 {strides = array<i32>} : memref<8x324xf32, #tpu.memory_space<vmem>>, vector<8x16xf32>,
    %154 = vector.extract_strided_slice %138 {offsets = [0, 20], sizes = [8, 8], strides = [1, 1]} : vector<8x78xf32> to vector<8x8xf32>
    %155 = vector.extract_strided_slice %1 {offsets = [0, 31], sizes = [8, 8], strides = [1, 1]} : vector<8x100xf32> to vector<8x8xf32>
    %156 = arith.addf %154, %155 : vector<8x8xf32>
    %cst_95 = arith.constant dense<0.000000e+00> : vector<8x16xf32>
    %157 = tpu.matmul %156, %141, %cst_95 {dimension_numbers = #tpu.dot_dimension_numbers<[1], [0], [0], [1], [0, 0, 1, 1], [], []>} : vector<8x8xf32>, vector<8x16xf32>, vector<8x16xf32> -> vector<8x16xf32>
    %c0_96 = arith.constant 0 : index
    %c91 = arith.constant 91 : index
    %158 = vector.load %arg20[%c0_96, %c91] : memref<8x324xf32, #tpu.memory_space<vmem>>, vector<8x16xf32>
    tpu.vector_store %arg20[%c0_96, %c91], %157 {strides = array<i32>} : memref<8x324xf32, #tpu.memory_space<vmem>>, vector<8x16xf32>,
    %c0_97 = arith.constant 0 : index
    %c109 = arith.constant 109 : index
    %159 = vector.load %arg20[%c0_97, %c109] : memref<8x324xf32, #tpu.memory_space<vmem>>, vector<8x16xf32>
    tpu.vector_store %arg20[%c0_97, %c109], %157 {strides = array<i32>} : memref<8x324xf32, #tpu.memory_space<vmem>>, vector<8x16xf32>,
    %160 = vector.extract_strided_slice %138 {offsets = [0, 30], sizes = [8, 8], strides = [1, 1]} : vector<8x78xf32> to vector<8x8xf32>
    %161 = vector.extract_strided_slice %1 {offsets = [0, 41], sizes = [8, 8], strides = [1, 1]} : vector<8x100xf32> to vector<8x8xf32>
    %162 = arith.addf %160, %161 : vector<8x8xf32>
    %cst_98 = arith.constant dense<0.000000e+00> : vector<8x16xf32>
    %163 = tpu.matmul %162, %141, %cst_98 {dimension_numbers = #tpu.dot_dimension_numbers<[1], [0], [0], [1], [0, 0, 1, 1], [], []>} : vector<8x8xf32>, vector<8x16xf32>, vector<8x16xf32> -> vector<8x16xf32>
    %c0_99 = arith.constant 0 : index
    %c127 = arith.constant 127 : index
    %164 = vector.load %arg20[%c0_99, %c127] : memref<8x324xf32, #tpu.memory_space<vmem>>, vector<8x16xf32>
    tpu.vector_store %arg20[%c0_99, %c127], %163 {strides = array<i32>} : memref<8x324xf32, #tpu.memory_space<vmem>>, vector<8x16xf32>,
    %c0_100 = arith.constant 0 : index
    %c145 = arith.constant 145 : index
    %165 = vector.load %arg20[%c0_100, %c145] : memref<8x324xf32, #tpu.memory_space<vmem>>, vector<8x16xf32>
    tpu.vector_store %arg20[%c0_100, %c145], %163 {strides = array<i32>} : memref<8x324xf32, #tpu.memory_space<vmem>>, vector<8x16xf32>,
    %166 = vector.extract_strided_slice %138 {offsets = [0, 40], sizes = [8, 8], strides = [1, 1]} : vector<8x78xf32> to vector<8x8xf32>
    %167 = vector.extract_strided_slice %1 {offsets = [0, 51], sizes = [8, 8], strides = [1, 1]} : vector<8x100xf32> to vector<8x8xf32>
    %168 = arith.addf %166, %167 : vector<8x8xf32>
    %cst_101 = arith.constant dense<0.000000e+00> : vector<8x16xf32>
    %169 = tpu.matmul %168, %141, %cst_101 {dimension_numbers = #tpu.dot_dimension_numbers<[1], [0], [0], [1], [0, 0, 1, 1], [], []>} : vector<8x8xf32>, vector<8x16xf32>, vector<8x16xf32> -> vector<8x16xf32>
    %c0_102 = arith.constant 0 : index
    %c163 = arith.constant 163 : index
    %170 = vector.load %arg20[%c0_102, %c163] : memref<8x324xf32, #tpu.memory_space<vmem>>, vector<8x16xf32>
    tpu.vector_store %arg20[%c0_102, %c163], %169 {strides = array<i32>} : memref<8x324xf32, #tpu.memory_space<vmem>>, vector<8x16xf32>,
    %c0_103 = arith.constant 0 : index
    %c181 = arith.constant 181 : index
    %171 = vector.load %arg20[%c0_103, %c181] : memref<8x324xf32, #tpu.memory_space<vmem>>, vector<8x16xf32>
    tpu.vector_store %arg20[%c0_103, %c181], %169 {strides = array<i32>} : memref<8x324xf32, #tpu.memory_space<vmem>>, vector<8x16xf32>,
    %172 = vector.extract_strided_slice %138 {offsets = [0, 50], sizes = [8, 8], strides = [1, 1]} : vector<8x78xf32> to vector<8x8xf32>
    %173 = vector.extract_strided_slice %1 {offsets = [0, 61], sizes = [8, 8], strides = [1, 1]} : vector<8x100xf32> to vector<8x8xf32>
    %174 = arith.addf %172, %173 : vector<8x8xf32>
    %cst_104 = arith.constant dense<0.000000e+00> : vector<8x16xf32>
    %175 = tpu.matmul %174, %141, %cst_104 {dimension_numbers = #tpu.dot_dimension_numbers<[1], [0], [0], [1], [0, 0, 1, 1], [], []>} : vector<8x8xf32>, vector<8x16xf32>, vector<8x16xf32> -> vector<8x16xf32>
    %c0_105 = arith.constant 0 : index
    %c199 = arith.constant 199 : index
    %176 = vector.load %arg20[%c0_105, %c199] : memref<8x324xf32, #tpu.memory_space<vmem>>, vector<8x16xf32>
    tpu.vector_store %arg20[%c0_105, %c199], %175 {strides = array<i32>} : memref<8x324xf32, #tpu.memory_space<vmem>>, vector<8x16xf32>,
    %c0_106 = arith.constant 0 : index
    %c217 = arith.constant 217 : index
    %177 = vector.load %arg20[%c0_106, %c217] : memref<8x324xf32, #tpu.memory_space<vmem>>, vector<8x16xf32>
    tpu.vector_store %arg20[%c0_106, %c217], %175 {strides = array<i32>} : memref<8x324xf32, #tpu.memory_space<vmem>>, vector<8x16xf32>,
    %178 = vector.extract_strided_slice %138 {offsets = [0, 60], sizes = [8, 8], strides = [1, 1]} : vector<8x78xf32> to vector<8x8xf32>
    %179 = vector.extract_strided_slice %1 {offsets = [0, 71], sizes = [8, 8], strides = [1, 1]} : vector<8x100xf32> to vector<8x8xf32>
    %180 = arith.addf %178, %179 : vector<8x8xf32>
    %cst_107 = arith.constant dense<0.000000e+00> : vector<8x16xf32>
    %181 = tpu.matmul %180, %141, %cst_107 {dimension_numbers = #tpu.dot_dimension_numbers<[1], [0], [0], [1], [0, 0, 1, 1], [], []>} : vector<8x8xf32>, vector<8x16xf32>, vector<8x16xf32> -> vector<8x16xf32>
    %c0_108 = arith.constant 0 : index
    %c235 = arith.constant 235 : index
    %182 = vector.load %arg20[%c0_108, %c235] : memref<8x324xf32, #tpu.memory_space<vmem>>, vector<8x16xf32>
    tpu.vector_store %arg20[%c0_108, %c235], %181 {strides = array<i32>} : memref<8x324xf32, #tpu.memory_space<vmem>>, vector<8x16xf32>,
    %c0_109 = arith.constant 0 : index
    %c253 = arith.constant 253 : index
    %183 = vector.load %arg20[%c0_109, %c253] : memref<8x324xf32, #tpu.memory_space<vmem>>, vector<8x16xf32>
    tpu.vector_store %arg20[%c0_109, %c253], %181 {strides = array<i32>} : memref<8x324xf32, #tpu.memory_space<vmem>>, vector<8x16xf32>,
    %184 = vector.extract_strided_slice %138 {offsets = [0, 70], sizes = [8, 8], strides = [1, 1]} : vector<8x78xf32> to vector<8x8xf32>
    %185 = vector.extract_strided_slice %1 {offsets = [0, 81], sizes = [8, 8], strides = [1, 1]} : vector<8x100xf32> to vector<8x8xf32>
    %186 = arith.addf %184, %185 : vector<8x8xf32>
    %cst_110 = arith.constant dense<0.000000e+00> : vector<8x16xf32>
    %187 = tpu.matmul %186, %141, %cst_110 {dimension_numbers = #tpu.dot_dimension_numbers<[1], [0], [0], [1], [0, 0, 1, 1], [], []>} : vector<8x8xf32>, vector<8x16xf32>, vector<8x16xf32> -> vector<8x16xf32>
    %c0_111 = arith.constant 0 : index
    %c271 = arith.constant 271 : index
    %188 = vector.load %arg20[%c0_111, %c271] : memref<8x324xf32, #tpu.memory_space<vmem>>, vector<8x16xf32>
    tpu.vector_store %arg20[%c0_111, %c271], %187 {strides = array<i32>} : memref<8x324xf32, #tpu.memory_space<vmem>>, vector<8x16xf32>,
    %c0_112 = arith.constant 0 : index
    %c289 = arith.constant 289 : index
    %189 = vector.load %arg20[%c0_112, %c289] : memref<8x324xf32, #tpu.memory_space<vmem>>, vector<8x16xf32>
    tpu.vector_store %arg20[%c0_112, %c289], %187 {strides = array<i32>} : memref<8x324xf32, #tpu.memory_space<vmem>>, vector<8x16xf32>,
    %c0_113 = arith.constant 0 : index
    %c0_114 = arith.constant 0 : index
    %190 = vector.load %arg16[%c0_113, %c0_114] : memref<1x248xf32, #tpu.memory_space<vmem>>, vector<1x248xf32>
    %c0_115 = arith.constant 0 : index
    %c0_116 = arith.constant 0 : index
    %191 = vector.load %arg20[%c0_115, %c0_116] : memref<8x324xf32, #tpu.memory_space<vmem>>, vector<8x324xf32>
    %c0_117 = arith.constant 0 : index
    %c0_118 = arith.constant 0 : index
    %c0_119 = arith.constant 0 : index
    %192 = vector.load %arg4[%c0_117, %c0_118, %c0_119] : memref<25x4x8xf32, #tpu.memory_space<vmem>>, vector<1x4x8xf32>
    %193 = vector.shape_cast %192 : vector<1x4x8xf32> to vector<4x8xf32>
    %194 = vector.extract_strided_slice %191 {offsets = [0, 0], sizes = [8, 248], strides = [1, 1]} : vector<8x324xf32> to vector<8x248xf32>
    %cst_120 = arith.constant dense<0.000000e+00> : vector<4x248xf32>
    %195 = tpu.matmul %193, %194, %cst_120 {dimension_numbers = #tpu.dot_dimension_numbers<[1], [0], [0], [1], [0, 0, 1, 1], [], []>} : vector<4x8xf32>, vector<8x248xf32>, vector<4x248xf32> -> vector<4x248xf32>
    %c1_121 = arith.constant 1 : index
    %c0_122 = arith.constant 0 : index
    %c0_123 = arith.constant 0 : index
    %196 = vector.load %arg4[%c1_121, %c0_122, %c0_123] : memref<25x4x8xf32, #tpu.memory_space<vmem>>, vector<1x4x8xf32>
    %197 = vector.shape_cast %196 : vector<1x4x8xf32> to vector<4x8xf32>
    %198 = vector.extract_strided_slice %191 {offsets = [0, 1], sizes = [8, 248], strides = [1, 1]} : vector<8x324xf32> to vector<8x248xf32>
    %cst_124 = arith.constant dense<0.000000e+00> : vector<4x248xf32>
    %199 = tpu.matmul %197, %198, %cst_124 {dimension_numbers = #tpu.dot_dimension_numbers<[1], [0], [0], [1], [0, 0, 1, 1], [], []>} : vector<4x8xf32>, vector<8x248xf32>, vector<4x248xf32> -> vector<4x248xf32>
    %200 = arith.addf %195, %199 : vector<4x248xf32>
    %c2_125 = arith.constant 2 : index
    %c0_126 = arith.constant 0 : index
    %c0_127 = arith.constant 0 : index
    %201 = vector.load %arg4[%c2_125, %c0_126, %c0_127] : memref<25x4x8xf32, #tpu.memory_space<vmem>>, vector<1x4x8xf32>
    %202 = vector.shape_cast %201 : vector<1x4x8xf32> to vector<4x8xf32>
    %203 = vector.extract_strided_slice %191 {offsets = [0, 2], sizes = [8, 248], strides = [1, 1]} : vector<8x324xf32> to vector<8x248xf32>
    %cst_128 = arith.constant dense<0.000000e+00> : vector<4x248xf32>
    %204 = tpu.matmul %202, %203, %cst_128 {dimension_numbers = #tpu.dot_dimension_numbers<[1], [0], [0], [1], [0, 0, 1, 1], [], []>} : vector<4x8xf32>, vector<8x248xf32>, vector<4x248xf32> -> vector<4x248xf32>
    %205 = arith.addf %200, %204 : vector<4x248xf32>
    %c3_129 = arith.constant 3 : index
    %c0_130 = arith.constant 0 : index
    %c0_131 = arith.constant 0 : index
    %206 = vector.load %arg4[%c3_129, %c0_130, %c0_131] : memref<25x4x8xf32, #tpu.memory_space<vmem>>, vector<1x4x8xf32>
    %207 = vector.shape_cast %206 : vector<1x4x8xf32> to vector<4x8xf32>
    %208 = vector.extract_strided_slice %191 {offsets = [0, 3], sizes = [8, 248], strides = [1, 1]} : vector<8x324xf32> to vector<8x248xf32>
    %cst_132 = arith.constant dense<0.000000e+00> : vector<4x248xf32>
    %209 = tpu.matmul %207, %208, %cst_132 {dimension_numbers = #tpu.dot_dimension_numbers<[1], [0], [0], [1], [0, 0, 1, 1], [], []>} : vector<4x8xf32>, vector<8x248xf32>, vector<4x248xf32> -> vector<4x248xf32>
    %210 = arith.addf %205, %209 : vector<4x248xf32>
    %c4_133 = arith.constant 4 : index
    %c0_134 = arith.constant 0 : index
    %c0_135 = arith.constant 0 : index
    %211 = vector.load %arg4[%c4_133, %c0_134, %c0_135] : memref<25x4x8xf32, #tpu.memory_space<vmem>>, vector<1x4x8xf32>
    %212 = vector.shape_cast %211 : vector<1x4x8xf32> to vector<4x8xf32>
    %213 = vector.extract_strided_slice %191 {offsets = [0, 4], sizes = [8, 248], strides = [1, 1]} : vector<8x324xf32> to vector<8x248xf32>
    %cst_136 = arith.constant dense<0.000000e+00> : vector<4x248xf32>
    %214 = tpu.matmul %212, %213, %cst_136 {dimension_numbers = #tpu.dot_dimension_numbers<[1], [0], [0], [1], [0, 0, 1, 1], [], []>} : vector<4x8xf32>, vector<8x248xf32>, vector<4x248xf32> -> vector<4x248xf32>
    %215 = arith.addf %210, %214 : vector<4x248xf32>
    %c5_137 = arith.constant 5 : index
    %c0_138 = arith.constant 0 : index
    %c0_139 = arith.constant 0 : index
    %216 = vector.load %arg4[%c5_137, %c0_138, %c0_139] : memref<25x4x8xf32, #tpu.memory_space<vmem>>, vector<1x4x8xf32>
    %217 = vector.shape_cast %216 : vector<1x4x8xf32> to vector<4x8xf32>
    %218 = vector.extract_strided_slice %191 {offsets = [0, 18], sizes = [8, 248], strides = [1, 1]} : vector<8x324xf32> to vector<8x248xf32>
    %cst_140 = arith.constant dense<0.000000e+00> : vector<4x248xf32>
    %219 = tpu.matmul %217, %218, %cst_140 {dimension_numbers = #tpu.dot_dimension_numbers<[1], [0], [0], [1], [0, 0, 1, 1], [], []>} : vector<4x8xf32>, vector<8x248xf32>, vector<4x248xf32> -> vector<4x248xf32>
    %220 = arith.addf %215, %219 : vector<4x248xf32>
    %c6_141 = arith.constant 6 : index
    %c0_142 = arith.constant 0 : index
    %c0_143 = arith.constant 0 : index
    %221 = vector.load %arg4[%c6_141, %c0_142, %c0_143] : memref<25x4x8xf32, #tpu.memory_space<vmem>>, vector<1x4x8xf32>
    %222 = vector.shape_cast %221 : vector<1x4x8xf32> to vector<4x8xf32>
    %223 = vector.extract_strided_slice %191 {offsets = [0, 19], sizes = [8, 248], strides = [1, 1]} : vector<8x324xf32> to vector<8x248xf32>
    %cst_144 = arith.constant dense<0.000000e+00> : vector<4x248xf32>
    %224 = tpu.matmul %222, %223, %cst_144 {dimension_numbers = #tpu.dot_dimension_numbers<[1], [0], [0], [1], [0, 0, 1, 1], [], []>} : vector<4x8xf32>, vector<8x248xf32>, vector<4x248xf32> -> vector<4x248xf32>
    %225 = arith.addf %220, %224 : vector<4x248xf32>
    %c7_145 = arith.constant 7 : index
    %c0_146 = arith.constant 0 : index
    %c0_147 = arith.constant 0 : index
    %226 = vector.load %arg4[%c7_145, %c0_146, %c0_147] : memref<25x4x8xf32, #tpu.memory_space<vmem>>, vector<1x4x8xf32>
    %227 = vector.shape_cast %226 : vector<1x4x8xf32> to vector<4x8xf32>
    %228 = vector.extract_strided_slice %191 {offsets = [0, 20], sizes = [8, 248], strides = [1, 1]} : vector<8x324xf32> to vector<8x248xf32>
    %cst_148 = arith.constant dense<0.000000e+00> : vector<4x248xf32>
    %229 = tpu.matmul %227, %228, %cst_148 {dimension_numbers = #tpu.dot_dimension_numbers<[1], [0], [0], [1], [0, 0, 1, 1], [], []>} : vector<4x8xf32>, vector<8x248xf32>, vector<4x248xf32> -> vector<4x248xf32>
    %230 = arith.addf %225, %229 : vector<4x248xf32>
    %c8_149 = arith.constant 8 : index
    %c0_150 = arith.constant 0 : index
    %c0_151 = arith.constant 0 : index
    %231 = vector.load %arg4[%c8_149, %c0_150, %c0_151] : memref<25x4x8xf32, #tpu.memory_space<vmem>>, vector<1x4x8xf32>
    %232 = vector.shape_cast %231 : vector<1x4x8xf32> to vector<4x8xf32>
    %233 = vector.extract_strided_slice %191 {offsets = [0, 21], sizes = [8, 248], strides = [1, 1]} : vector<8x324xf32> to vector<8x248xf32>
    %cst_152 = arith.constant dense<0.000000e+00> : vector<4x248xf32>
    %234 = tpu.matmul %232, %233, %cst_152 {dimension_numbers = #tpu.dot_dimension_numbers<[1], [0], [0], [1], [0, 0, 1, 1], [], []>} : vector<4x8xf32>, vector<8x248xf32>, vector<4x248xf32> -> vector<4x248xf32>
    %235 = arith.addf %230, %234 : vector<4x248xf32>
    %c9 = arith.constant 9 : index
    %c0_153 = arith.constant 0 : index
    %c0_154 = arith.constant 0 : index
    %236 = vector.load %arg4[%c9, %c0_153, %c0_154] : memref<25x4x8xf32, #tpu.memory_space<vmem>>, vector<1x4x8xf32>
    %237 = vector.shape_cast %236 : vector<1x4x8xf32> to vector<4x8xf32>
    %238 = vector.extract_strided_slice %191 {offsets = [0, 22], sizes = [8, 248], strides = [1, 1]} : vector<8x324xf32> to vector<8x248xf32>
    %cst_155 = arith.constant dense<0.000000e+00> : vector<4x248xf32>
    %239 = tpu.matmul %237, %238, %cst_155 {dimension_numbers = #tpu.dot_dimension_numbers<[1], [0], [0], [1], [0, 0, 1, 1], [], []>} : vector<4x8xf32>, vector<8x248xf32>, vector<4x248xf32> -> vector<4x248xf32>
    %240 = arith.addf %235, %239 : vector<4x248xf32>
    %c10 = arith.constant 10 : index
    %c0_156 = arith.constant 0 : index
    %c0_157 = arith.constant 0 : index
    %241 = vector.load %arg4[%c10, %c0_156, %c0_157] : memref<25x4x8xf32, #tpu.memory_space<vmem>>, vector<1x4x8xf32>
    %242 = vector.shape_cast %241 : vector<1x4x8xf32> to vector<4x8xf32>
    %243 = vector.extract_strided_slice %191 {offsets = [0, 36], sizes = [8, 248], strides = [1, 1]} : vector<8x324xf32> to vector<8x248xf32>
    %cst_158 = arith.constant dense<0.000000e+00> : vector<4x248xf32>
    %244 = tpu.matmul %242, %243, %cst_158 {dimension_numbers = #tpu.dot_dimension_numbers<[1], [0], [0], [1], [0, 0, 1, 1], [], []>} : vector<4x8xf32>, vector<8x248xf32>, vector<4x248xf32> -> vector<4x248xf32>
    %245 = arith.addf %240, %244 : vector<4x248xf32>
    %c11_159 = arith.constant 11 : index
    %c0_160 = arith.constant 0 : index
    %c0_161 = arith.constant 0 : index
    %246 = vector.load %arg4[%c11_159, %c0_160, %c0_161] : memref<25x4x8xf32, #tpu.memory_space<vmem>>, vector<1x4x8xf32>
    %247 = vector.shape_cast %246 : vector<1x4x8xf32> to vector<4x8xf32>
    %248 = vector.extract_strided_slice %191 {offsets = [0, 37], sizes = [8, 248], strides = [1, 1]} : vector<8x324xf32> to vector<8x248xf32>
    %cst_162 = arith.constant dense<0.000000e+00> : vector<4x248xf32>
    %249 = tpu.matmul %247, %248, %cst_162 {dimension_numbers = #tpu.dot_dimension_numbers<[1], [0], [0], [1], [0, 0, 1, 1], [], []>} : vector<4x8xf32>, vector<8x248xf32>, vector<4x248xf32> -> vector<4x248xf32>
    %250 = arith.addf %245, %249 : vector<4x248xf32>
    %c12 = arith.constant 12 : index
    %c0_163 = arith.constant 0 : index
    %c0_164 = arith.constant 0 : index
    %251 = vector.load %arg4[%c12, %c0_163, %c0_164] : memref<25x4x8xf32, #tpu.memory_space<vmem>>, vector<1x4x8xf32>
    %252 = vector.shape_cast %251 : vector<1x4x8xf32> to vector<4x8xf32>
    %253 = vector.extract_strided_slice %191 {offsets = [0, 38], sizes = [8, 248], strides = [1, 1]} : vector<8x324xf32> to vector<8x248xf32>
    %cst_165 = arith.constant dense<0.000000e+00> : vector<4x248xf32>
    %254 = tpu.matmul %252, %253, %cst_165 {dimension_numbers = #tpu.dot_dimension_numbers<[1], [0], [0], [1], [0, 0, 1, 1], [], []>} : vector<4x8xf32>, vector<8x248xf32>, vector<4x248xf32> -> vector<4x248xf32>
    %255 = arith.addf %250, %254 : vector<4x248xf32>
    %c13 = arith.constant 13 : index
    %c0_166 = arith.constant 0 : index
    %c0_167 = arith.constant 0 : index
    %256 = vector.load %arg4[%c13, %c0_166, %c0_167] : memref<25x4x8xf32, #tpu.memory_space<vmem>>, vector<1x4x8xf32>
    %257 = vector.shape_cast %256 : vector<1x4x8xf32> to vector<4x8xf32>
    %258 = vector.extract_strided_slice %191 {offsets = [0, 39], sizes = [8, 248], strides = [1, 1]} : vector<8x324xf32> to vector<8x248xf32>
    %cst_168 = arith.constant dense<0.000000e+00> : vector<4x248xf32>
    %259 = tpu.matmul %257, %258, %cst_168 {dimension_numbers = #tpu.dot_dimension_numbers<[1], [0], [0], [1], [0, 0, 1, 1], [], []>} : vector<4x8xf32>, vector<8x248xf32>, vector<4x248xf32> -> vector<4x248xf32>
    %260 = arith.addf %255, %259 : vector<4x248xf32>
    %c14 = arith.constant 14 : index
    %c0_169 = arith.constant 0 : index
    %c0_170 = arith.constant 0 : index
    %261 = vector.load %arg4[%c14, %c0_169, %c0_170] : memref<25x4x8xf32, #tpu.memory_space<vmem>>, vector<1x4x8xf32>
    %262 = vector.shape_cast %261 : vector<1x4x8xf32> to vector<4x8xf32>
    %263 = vector.extract_strided_slice %191 {offsets = [0, 40], sizes = [8, 248], strides = [1, 1]} : vector<8x324xf32> to vector<8x248xf32>
    %cst_171 = arith.constant dense<0.000000e+00> : vector<4x248xf32>
    %264 = tpu.matmul %262, %263, %cst_171 {dimension_numbers = #tpu.dot_dimension_numbers<[1], [0], [0], [1], [0, 0, 1, 1], [], []>} : vector<4x8xf32>, vector<8x248xf32>, vector<4x248xf32> -> vector<4x248xf32>
    %265 = arith.addf %260, %264 : vector<4x248xf32>
    %c15 = arith.constant 15 : index
    %c0_172 = arith.constant 0 : index
    %c0_173 = arith.constant 0 : index
    %266 = vector.load %arg4[%c15, %c0_172, %c0_173] : memref<25x4x8xf32, #tpu.memory_space<vmem>>, vector<1x4x8xf32>
    %267 = vector.shape_cast %266 : vector<1x4x8xf32> to vector<4x8xf32>
    %268 = vector.extract_strided_slice %191 {offsets = [0, 54], sizes = [8, 248], strides = [1, 1]} : vector<8x324xf32> to vector<8x248xf32>
    %cst_174 = arith.constant dense<0.000000e+00> : vector<4x248xf32>
    %269 = tpu.matmul %267, %268, %cst_174 {dimension_numbers = #tpu.dot_dimension_numbers<[1], [0], [0], [1], [0, 0, 1, 1], [], []>} : vector<4x8xf32>, vector<8x248xf32>, vector<4x248xf32> -> vector<4x248xf32>
    %270 = arith.addf %265, %269 : vector<4x248xf32>
    %c16 = arith.constant 16 : index
    %c0_175 = arith.constant 0 : index
    %c0_176 = arith.constant 0 : index
    %271 = vector.load %arg4[%c16, %c0_175, %c0_176] : memref<25x4x8xf32, #tpu.memory_space<vmem>>, vector<1x4x8xf32>
    %272 = vector.shape_cast %271 : vector<1x4x8xf32> to vector<4x8xf32>
    %273 = vector.extract_strided_slice %191 {offsets = [0, 55], sizes = [8, 248], strides = [1, 1]} : vector<8x324xf32> to vector<8x248xf32>
    %cst_177 = arith.constant dense<0.000000e+00> : vector<4x248xf32>
    %274 = tpu.matmul %272, %273, %cst_177 {dimension_numbers = #tpu.dot_dimension_numbers<[1], [0], [0], [1], [0, 0, 1, 1], [], []>} : vector<4x8xf32>, vector<8x248xf32>, vector<4x248xf32> -> vector<4x248xf32>
    %275 = arith.addf %270, %274 : vector<4x248xf32>
    %c17 = arith.constant 17 : index
    %c0_178 = arith.constant 0 : index
    %c0_179 = arith.constant 0 : index
    %276 = vector.load %arg4[%c17, %c0_178, %c0_179] : memref<25x4x8xf32, #tpu.memory_space<vmem>>, vector<1x4x8xf32>
    %277 = vector.shape_cast %276 : vector<1x4x8xf32> to vector<4x8xf32>
    %278 = vector.extract_strided_slice %191 {offsets = [0, 56], sizes = [8, 248], strides = [1, 1]} : vector<8x324xf32> to vector<8x248xf32>
    %cst_180 = arith.constant dense<0.000000e+00> : vector<4x248xf32>
    %279 = tpu.matmul %277, %278, %cst_180 {dimension_numbers = #tpu.dot_dimension_numbers<[1], [0], [0], [1], [0, 0, 1, 1], [], []>} : vector<4x8xf32>, vector<8x248xf32>, vector<4x248xf32> -> vector<4x248xf32>
    %280 = arith.addf %275, %279 : vector<4x248xf32>
    %c18 = arith.constant 18 : index
    %c0_181 = arith.constant 0 : index
    %c0_182 = arith.constant 0 : index
    %281 = vector.load %arg4[%c18, %c0_181, %c0_182] : memref<25x4x8xf32, #tpu.memory_space<vmem>>, vector<1x4x8xf32>
    %282 = vector.shape_cast %281 : vector<1x4x8xf32> to vector<4x8xf32>
    %283 = vector.extract_strided_slice %191 {offsets = [0, 57], sizes = [8, 248], strides = [1, 1]} : vector<8x324xf32> to vector<8x248xf32>
    %cst_183 = arith.constant dense<0.000000e+00> : vector<4x248xf32>
    %284 = tpu.matmul %282, %283, %cst_183 {dimension_numbers = #tpu.dot_dimension_numbers<[1], [0], [0], [1], [0, 0, 1, 1], [], []>} : vector<4x8xf32>, vector<8x248xf32>, vector<4x248xf32> -> vector<4x248xf32>
    %285 = arith.addf %280, %284 : vector<4x248xf32>
    %c19_184 = arith.constant 19 : index
    %c0_185 = arith.constant 0 : index
    %c0_186 = arith.constant 0 : index
    %286 = vector.load %arg4[%c19_184, %c0_185, %c0_186] : memref<25x4x8xf32, #tpu.memory_space<vmem>>, vector<1x4x8xf32>
    %287 = vector.shape_cast %286 : vector<1x4x8xf32> to vector<4x8xf32>
    %288 = vector.extract_strided_slice %191 {offsets = [0, 58], sizes = [8, 248], strides = [1, 1]} : vector<8x324xf32> to vector<8x248xf32>
    %cst_187 = arith.constant dense<0.000000e+00> : vector<4x248xf32>
    %289 = tpu.matmul %287, %288, %cst_187 {dimension_numbers = #tpu.dot_dimension_numbers<[1], [0], [0], [1], [0, 0, 1, 1], [], []>} : vector<4x8xf32>, vector<8x248xf32>, vector<4x248xf32> -> vector<4x248xf32>
    %290 = arith.addf %285, %289 : vector<4x248xf32>
    %c20 = arith.constant 20 : index
    %c0_188 = arith.constant 0 : index
    %c0_189 = arith.constant 0 : index
    %291 = vector.load %arg4[%c20, %c0_188, %c0_189] : memref<25x4x8xf32, #tpu.memory_space<vmem>>, vector<1x4x8xf32>
    %292 = vector.shape_cast %291 : vector<1x4x8xf32> to vector<4x8xf32>
    %293 = vector.extract_strided_slice %191 {offsets = [0, 72], sizes = [8, 248], strides = [1, 1]} : vector<8x324xf32> to vector<8x248xf32>
    %cst_190 = arith.constant dense<0.000000e+00> : vector<4x248xf32>
    %294 = tpu.matmul %292, %293, %cst_190 {dimension_numbers = #tpu.dot_dimension_numbers<[1], [0], [0], [1], [0, 0, 1, 1], [], []>} : vector<4x8xf32>, vector<8x248xf32>, vector<4x248xf32> -> vector<4x248xf32>
    %295 = arith.addf %290, %294 : vector<4x248xf32>
    %c21 = arith.constant 21 : index
    %c0_191 = arith.constant 0 : index
    %c0_192 = arith.constant 0 : index
    %296 = vector.load %arg4[%c21, %c0_191, %c0_192] : memref<25x4x8xf32, #tpu.memory_space<vmem>>, vector<1x4x8xf32>
    %297 = vector.shape_cast %296 : vector<1x4x8xf32> to vector<4x8xf32>
    %298 = vector.extract_strided_slice %191 {offsets = [0, 73], sizes = [8, 248], strides = [1, 1]} : vector<8x324xf32> to vector<8x248xf32>
    %cst_193 = arith.constant dense<0.000000e+00> : vector<4x248xf32>
    %299 = tpu.matmul %297, %298, %cst_193 {dimension_numbers = #tpu.dot_dimension_numbers<[1], [0], [0], [1], [0, 0, 1, 1], [], []>} : vector<4x8xf32>, vector<8x248xf32>, vector<4x248xf32> -> vector<4x248xf32>
    %300 = arith.addf %295, %299 : vector<4x248xf32>
    %c22 = arith.constant 22 : index
    %c0_194 = arith.constant 0 : index
    %c0_195 = arith.constant 0 : index
    %301 = vector.load %arg4[%c22, %c0_194, %c0_195] : memref<25x4x8xf32, #tpu.memory_space<vmem>>, vector<1x4x8xf32>
    %302 = vector.shape_cast %301 : vector<1x4x8xf32> to vector<4x8xf32>
    %303 = vector.extract_strided_slice %191 {offsets = [0, 74], sizes = [8, 248], strides = [1, 1]} : vector<8x324xf32> to vector<8x248xf32>
    %cst_196 = arith.constant dense<0.000000e+00> : vector<4x248xf32>
    %304 = tpu.matmul %302, %303, %cst_196 {dimension_numbers = #tpu.dot_dimension_numbers<[1], [0], [0], [1], [0, 0, 1, 1], [], []>} : vector<4x8xf32>, vector<8x248xf32>, vector<4x248xf32> -> vector<4x248xf32>
    %305 = arith.addf %300, %304 : vector<4x248xf32>
    %c23 = arith.constant 23 : index
    %c0_197 = arith.constant 0 : index
    %c0_198 = arith.constant 0 : index
    %306 = vector.load %arg4[%c23, %c0_197, %c0_198] : memref<25x4x8xf32, #tpu.memory_space<vmem>>, vector<1x4x8xf32>
    %307 = vector.shape_cast %306 : vector<1x4x8xf32> to vector<4x8xf32>
    %308 = vector.extract_strided_slice %191 {offsets = [0, 75], sizes = [8, 248], strides = [1, 1]} : vector<8x324xf32> to vector<8x248xf32>
    %cst_199 = arith.constant dense<0.000000e+00> : vector<4x248xf32>
    %309 = tpu.matmul %307, %308, %cst_199 {dimension_numbers = #tpu.dot_dimension_numbers<[1], [0], [0], [1], [0, 0, 1, 1], [], []>} : vector<4x8xf32>, vector<8x248xf32>, vector<4x248xf32> -> vector<4x248xf32>
    %310 = arith.addf %305, %309 : vector<4x248xf32>
    %c24 = arith.constant 24 : index
    %c0_200 = arith.constant 0 : index
    %c0_201 = arith.constant 0 : index
    %311 = vector.load %arg4[%c24, %c0_200, %c0_201] : memref<25x4x8xf32, #tpu.memory_space<vmem>>, vector<1x4x8xf32>
    %312 = vector.shape_cast %311 : vector<1x4x8xf32> to vector<4x8xf32>
    %313 = vector.extract_strided_slice %191 {offsets = [0, 76], sizes = [8, 248], strides = [1, 1]} : vector<8x324xf32> to vector<8x248xf32>
    %cst_202 = arith.constant dense<0.000000e+00> : vector<4x248xf32>
    %314 = tpu.matmul %312, %313, %cst_202 {dimension_numbers = #tpu.dot_dimension_numbers<[1], [0], [0], [1], [0, 0, 1, 1], [], []>} : vector<4x8xf32>, vector<8x248xf32>, vector<4x248xf32> -> vector<4x248xf32>
    %315 = arith.addf %310, %314 : vector<4x248xf32>
    %c0_203 = arith.constant 0 : index
    %c0_204 = arith.constant 0 : index
    %316 = vector.load %arg5[%c0_203, %c0_204] : memref<4x1xf32, #tpu.memory_space<vmem>>, vector<4x1xf32>
    %317 = vector.broadcast %316 : vector<4x1xf32> to vector<4x248xf32>
    %318 = arith.addf %315, %317 : vector<4x248xf32>
    %319 = vector.broadcast %190 : vector<1x248xf32> to vector<4x248xf32>
    %320 = arith.mulf %318, %319 : vector<4x248xf32>
    %321 = vector.shape_cast %320 : vector<4x248xf32> to vector<1x4x248xf32>
    %cst_205 = arith.constant dense<0.000000e+00> : vector<1xf32>
    %322 = vector.multi_reduction <add>, %321, %cst_205 [1, 2] : vector<1x4x248xf32> to vector<1xf32>
    %323 = vector.shape_cast %322 : vector<1xf32> to vector<1x1x1xf32>
    %324 = vector.extract %323[0, 0, 0] : f32 from vector<1x1x1xf32>
    %325 = arith.mulf %320, %318 : vector<4x248xf32>
    %326 = vector.shape_cast %325 : vector<4x248xf32> to vector<1x4x248xf32>
    %cst_206 = arith.constant dense<0.000000e+00> : vector<1xf32>
    %327 = vector.multi_reduction <add>, %326, %cst_206 [1, 2] : vector<1x4x248xf32> to vector<1xf32>
    %328 = vector.shape_cast %327 : vector<1xf32> to vector<1x1x1xf32>
    %329 = vector.extract %328[0, 0, 0] : f32 from vector<1x1x1xf32>
    %cst_207 = arith.constant 7.840000e+02 : f32
    %330 = arith.divf %324, %cst_207 : f32
    %cst_208 = arith.constant 7.840000e+02 : f32
    %331 = arith.mulf %cst_208, %330 : f32
    %332 = arith.mulf %331, %330 : f32
    %333 = arith.subf %329, %332 : f32
    %cst_209 = arith.constant 7.830000e+02 : f32
    %334 = arith.divf %333, %cst_209 : f32
    %335 = math.sqrt %334 : f32
    %cst_210 = arith.constant 9.99999974E-6 : f32
    %336 = arith.addf %335, %cst_210 : f32
    %cst_211 = arith.constant 1.000000e+00 : f32
    %337 = arith.divf %cst_211, %336 : f32
    %338 = vector.broadcast %330 : f32 to vector<4x248xf32>
    %339 = arith.subf %318, %338 : vector<4x248xf32>
    %340 = vector.broadcast %337 : f32 to vector<4x248xf32>
    %341 = arith.mulf %339, %340 : vector<4x248xf32>
    %c0_212 = arith.constant 0 : index
    %c0_213 = arith.constant 0 : index
    %342 = vector.load %arg6[%c0_212, %c0_213] : memref<4x1xf32, #tpu.memory_space<vmem>>, vector<4x1xf32>
    %343 = vector.broadcast %342 : vector<4x1xf32> to vector<4x248xf32>
    %344 = arith.mulf %341, %343 : vector<4x248xf32>
    %c0_214 = arith.constant 0 : index
    %c0_215 = arith.constant 0 : index
    %345 = vector.load %arg7[%c0_214, %c0_215] : memref<4x1xf32, #tpu.memory_space<vmem>>, vector<4x1xf32>
    %346 = vector.broadcast %345 : vector<4x1xf32> to vector<4x248xf32>
    %347 = arith.addf %344, %346 : vector<4x248xf32>
    %cst_216 = arith.constant 0.000000e+00 : f32
    %348 = vector.broadcast %cst_216 : f32 to vector<4x248xf32>
    %349 = arith.maximumf %347, %348 : vector<4x248xf32>
    %cst_217 = arith.constant 0.000000e+00 : f32
    %350 = vector.broadcast %cst_217 : f32 to vector<4x256xf32>
    %c0_218 = arith.constant 0 : index
    %c0_219 = arith.constant 0 : index
    %351 = vector.load %arg21[%c0_218, %c0_219] : memref<4x256xf32, #tpu.memory_space<vmem>>, vector<4x256xf32>
    tpu.vector_store %arg21[%c0_218, %c0_219], %350 {strides = array<i32>} : memref<4x256xf32, #tpu.memory_space<vmem>>, vector<4x256xf32>,
    %352 = vector.extract_strided_slice %349 {offsets = [0, 0], sizes = [4, 14], strides = [1, 1]} : vector<4x248xf32> to vector<4x14xf32>
    %c0_220 = arith.constant 0 : index
    %c17_221 = arith.constant 17 : index
    %353 = vector.load %arg21[%c0_220, %c17_221] : memref<4x256xf32, #tpu.memory_space<vmem>>, vector<4x14xf32>
    tpu.vector_store %arg21[%c0_220, %c17_221], %352 {strides = array<i32>} : memref<4x256xf32, #tpu.memory_space<vmem>>, vector<4x14xf32>,
    %354 = vector.extract_strided_slice %349 {offsets = [0, 18], sizes = [4, 14], strides = [1, 1]} : vector<4x248xf32> to vector<4x14xf32>
    %c0_222 = arith.constant 0 : index
    %c33 = arith.constant 33 : index
    %355 = vector.load %arg21[%c0_222, %c33] : memref<4x256xf32, #tpu.memory_space<vmem>>, vector<4x14xf32>
    tpu.vector_store %arg21[%c0_222, %c33], %354 {strides = array<i32>} : memref<4x256xf32, #tpu.memory_space<vmem>>, vector<4x14xf32>,
    %356 = vector.extract_strided_slice %349 {offsets = [0, 36], sizes = [4, 14], strides = [1, 1]} : vector<4x248xf32> to vector<4x14xf32>
    %c0_223 = arith.constant 0 : index
    %c49 = arith.constant 49 : index
    %357 = vector.load %arg21[%c0_223, %c49] : memref<4x256xf32, #tpu.memory_space<vmem>>, vector<4x14xf32>
    tpu.vector_store %arg21[%c0_223, %c49], %356 {strides = array<i32>} : memref<4x256xf32, #tpu.memory_space<vmem>>, vector<4x14xf32>,
    %358 = vector.extract_strided_slice %349 {offsets = [0, 54], sizes = [4, 14], strides = [1, 1]} : vector<4x248xf32> to vector<4x14xf32>
    %c0_224 = arith.constant 0 : index
    %c65 = arith.constant 65 : index
    %359 = vector.load %arg21[%c0_224, %c65] : memref<4x256xf32, #tpu.memory_space<vmem>>, vector<4x14xf32>
    tpu.vector_store %arg21[%c0_224, %c65], %358 {strides = array<i32>} : memref<4x256xf32, #tpu.memory_space<vmem>>, vector<4x14xf32>,
    %360 = vector.extract_strided_slice %349 {offsets = [0, 72], sizes = [4, 14], strides = [1, 1]} : vector<4x248xf32> to vector<4x14xf32>
    %c0_225 = arith.constant 0 : index
    %c81 = arith.constant 81 : index
    %361 = vector.load %arg21[%c0_225, %c81] : memref<4x256xf32, #tpu.memory_space<vmem>>, vector<4x14xf32>
    tpu.vector_store %arg21[%c0_225, %c81], %360 {strides = array<i32>} : memref<4x256xf32, #tpu.memory_space<vmem>>, vector<4x14xf32>,
    %362 = vector.extract_strided_slice %349 {offsets = [0, 90], sizes = [4, 14], strides = [1, 1]} : vector<4x248xf32> to vector<4x14xf32>
    %c0_226 = arith.constant 0 : index
    %c97 = arith.constant 97 : index
    %363 = vector.load %arg21[%c0_226, %c97] : memref<4x256xf32, #tpu.memory_space<vmem>>, vector<4x14xf32>
    tpu.vector_store %arg21[%c0_226, %c97], %362 {strides = array<i32>} : memref<4x256xf32, #tpu.memory_space<vmem>>, vector<4x14xf32>,
    %364 = vector.extract_strided_slice %349 {offsets = [0, 108], sizes = [4, 14], strides = [1, 1]} : vector<4x248xf32> to vector<4x14xf32>
    %c0_227 = arith.constant 0 : index
    %c113 = arith.constant 113 : index
    %365 = vector.load %arg21[%c0_227, %c113] : memref<4x256xf32, #tpu.memory_space<vmem>>, vector<4x14xf32>
    tpu.vector_store %arg21[%c0_227, %c113], %364 {strides = array<i32>} : memref<4x256xf32, #tpu.memory_space<vmem>>, vector<4x14xf32>,
    %366 = vector.extract_strided_slice %349 {offsets = [0, 126], sizes = [4, 14], strides = [1, 1]} : vector<4x248xf32> to vector<4x14xf32>
    %c0_228 = arith.constant 0 : index
    %c129 = arith.constant 129 : index
    %367 = vector.load %arg21[%c0_228, %c129] : memref<4x256xf32, #tpu.memory_space<vmem>>, vector<4x14xf32>
    tpu.vector_store %arg21[%c0_228, %c129], %366 {strides = array<i32>} : memref<4x256xf32, #tpu.memory_space<vmem>>, vector<4x14xf32>,
    %368 = vector.extract_strided_slice %349 {offsets = [0, 144], sizes = [4, 14], strides = [1, 1]} : vector<4x248xf32> to vector<4x14xf32>
    %c0_229 = arith.constant 0 : index
    %c145_230 = arith.constant 145 : index
    %369 = vector.load %arg21[%c0_229, %c145_230] : memref<4x256xf32, #tpu.memory_space<vmem>>, vector<4x14xf32>
    tpu.vector_store %arg21[%c0_229, %c145_230], %368 {strides = array<i32>} : memref<4x256xf32, #tpu.memory_space<vmem>>, vector<4x14xf32>,
    %370 = vector.extract_strided_slice %349 {offsets = [0, 162], sizes = [4, 14], strides = [1, 1]} : vector<4x248xf32> to vector<4x14xf32>
    %c0_231 = arith.constant 0 : index
    %c161 = arith.constant 161 : index
    %371 = vector.load %arg21[%c0_231, %c161] : memref<4x256xf32, #tpu.memory_space<vmem>>, vector<4x14xf32>
    tpu.vector_store %arg21[%c0_231, %c161], %370 {strides = array<i32>} : memref<4x256xf32, #tpu.memory_space<vmem>>, vector<4x14xf32>,
    %372 = vector.extract_strided_slice %349 {offsets = [0, 180], sizes = [4, 14], strides = [1, 1]} : vector<4x248xf32> to vector<4x14xf32>
    %c0_232 = arith.constant 0 : index
    %c177 = arith.constant 177 : index
    %373 = vector.load %arg21[%c0_232, %c177] : memref<4x256xf32, #tpu.memory_space<vmem>>, vector<4x14xf32>
    tpu.vector_store %arg21[%c0_232, %c177], %372 {strides = array<i32>} : memref<4x256xf32, #tpu.memory_space<vmem>>, vector<4x14xf32>,
    %374 = vector.extract_strided_slice %349 {offsets = [0, 198], sizes = [4, 14], strides = [1, 1]} : vector<4x248xf32> to vector<4x14xf32>
    %c0_233 = arith.constant 0 : index
    %c193 = arith.constant 193 : index
    %375 = vector.load %arg21[%c0_233, %c193] : memref<4x256xf32, #tpu.memory_space<vmem>>, vector<4x14xf32>
    tpu.vector_store %arg21[%c0_233, %c193], %374 {strides = array<i32>} : memref<4x256xf32, #tpu.memory_space<vmem>>, vector<4x14xf32>,
    %376 = vector.extract_strided_slice %349 {offsets = [0, 216], sizes = [4, 14], strides = [1, 1]} : vector<4x248xf32> to vector<4x14xf32>
    %c0_234 = arith.constant 0 : index
    %c209 = arith.constant 209 : index
    %377 = vector.load %arg21[%c0_234, %c209] : memref<4x256xf32, #tpu.memory_space<vmem>>, vector<4x14xf32>
    tpu.vector_store %arg21[%c0_234, %c209], %376 {strides = array<i32>} : memref<4x256xf32, #tpu.memory_space<vmem>>, vector<4x14xf32>,
    %378 = vector.extract_strided_slice %349 {offsets = [0, 234], sizes = [4, 14], strides = [1, 1]} : vector<4x248xf32> to vector<4x14xf32>
    %c0_235 = arith.constant 0 : index
    %c225 = arith.constant 225 : index
    %379 = vector.load %arg21[%c0_235, %c225] : memref<4x256xf32, #tpu.memory_space<vmem>>, vector<4x14xf32>
    tpu.vector_store %arg21[%c0_235, %c225], %378 {strides = array<i32>} : memref<4x256xf32, #tpu.memory_space<vmem>>, vector<4x14xf32>,
    %c0_236 = arith.constant 0 : index
    %c0_237 = arith.constant 0 : index
    %380 = vector.load %arg17[%c0_236, %c0_237] : memref<1x222xf32, #tpu.memory_space<vmem>>, vector<1x222xf32>
    %c0_238 = arith.constant 0 : index
    %c0_239 = arith.constant 0 : index
    %381 = vector.load %arg21[%c0_238, %c0_239] : memref<4x256xf32, #tpu.memory_space<vmem>>, vector<4x256xf32>
    %c0_240 = arith.constant 0 : index
    %c0_241 = arith.constant 0 : index
    %c0_242 = arith.constant 0 : index
    %382 = vector.load %arg8[%c0_240, %c0_241, %c0_242] : memref<9x4x4xf32, #tpu.memory_space<vmem>>, vector<1x4x4xf32>
    %383 = vector.shape_cast %382 : vector<1x4x4xf32> to vector<4x4xf32>
    %384 = vector.extract_strided_slice %381 {offsets = [0, 0], sizes = [4, 222], strides = [1, 1]} : vector<4x256xf32> to vector<4x222xf32>
    %cst_243 = arith.constant dense<0.000000e+00> : vector<4x222xf32>
    %385 = tpu.matmul %383, %384, %cst_243 {dimension_numbers = #tpu.dot_dimension_numbers<[1], [0], [0], [1], [0, 0, 1, 1], [], []>} : vector<4x4xf32>, vector<4x222xf32>, vector<4x222xf32> -> vector<4x222xf32>
    %c1_244 = arith.constant 1 : index
    %c0_245 = arith.constant 0 : index
    %c0_246 = arith.constant 0 : index
    %386 = vector.load %arg8[%c1_244, %c0_245, %c0_246] : memref<9x4x4xf32, #tpu.memory_space<vmem>>, vector<1x4x4xf32>
    %387 = vector.shape_cast %386 : vector<1x4x4xf32> to vector<4x4xf32>
    %388 = vector.extract_strided_slice %381 {offsets = [0, 1], sizes = [4, 222], strides = [1, 1]} : vector<4x256xf32> to vector<4x222xf32>
    %cst_247 = arith.constant dense<0.000000e+00> : vector<4x222xf32>
    %389 = tpu.matmul %387, %388, %cst_247 {dimension_numbers = #tpu.dot_dimension_numbers<[1], [0], [0], [1], [0, 0, 1, 1], [], []>} : vector<4x4xf32>, vector<4x222xf32>, vector<4x222xf32> -> vector<4x222xf32>
    %390 = arith.addf %385, %389 : vector<4x222xf32>
    %c2_248 = arith.constant 2 : index
    %c0_249 = arith.constant 0 : index
    %c0_250 = arith.constant 0 : index
    %391 = vector.load %arg8[%c2_248, %c0_249, %c0_250] : memref<9x4x4xf32, #tpu.memory_space<vmem>>, vector<1x4x4xf32>
    %392 = vector.shape_cast %391 : vector<1x4x4xf32> to vector<4x4xf32>
    %393 = vector.extract_strided_slice %381 {offsets = [0, 2], sizes = [4, 222], strides = [1, 1]} : vector<4x256xf32> to vector<4x222xf32>
    %cst_251 = arith.constant dense<0.000000e+00> : vector<4x222xf32>
    %394 = tpu.matmul %392, %393, %cst_251 {dimension_numbers = #tpu.dot_dimension_numbers<[1], [0], [0], [1], [0, 0, 1, 1], [], []>} : vector<4x4xf32>, vector<4x222xf32>, vector<4x222xf32> -> vector<4x222xf32>
    %395 = arith.addf %390, %394 : vector<4x222xf32>
    %c3_252 = arith.constant 3 : index
    %c0_253 = arith.constant 0 : index
    %c0_254 = arith.constant 0 : index
    %396 = vector.load %arg8[%c3_252, %c0_253, %c0_254] : memref<9x4x4xf32, #tpu.memory_space<vmem>>, vector<1x4x4xf32>
    %397 = vector.shape_cast %396 : vector<1x4x4xf32> to vector<4x4xf32>
    %398 = vector.extract_strided_slice %381 {offsets = [0, 16], sizes = [4, 222], strides = [1, 1]} : vector<4x256xf32> to vector<4x222xf32>
    %cst_255 = arith.constant dense<0.000000e+00> : vector<4x222xf32>
    %399 = tpu.matmul %397, %398, %cst_255 {dimension_numbers = #tpu.dot_dimension_numbers<[1], [0], [0], [1], [0, 0, 1, 1], [], []>} : vector<4x4xf32>, vector<4x222xf32>, vector<4x222xf32> -> vector<4x222xf32>
    %400 = arith.addf %395, %399 : vector<4x222xf32>
    %c4_256 = arith.constant 4 : index
    %c0_257 = arith.constant 0 : index
    %c0_258 = arith.constant 0 : index
    %401 = vector.load %arg8[%c4_256, %c0_257, %c0_258] : memref<9x4x4xf32, #tpu.memory_space<vmem>>, vector<1x4x4xf32>
    %402 = vector.shape_cast %401 : vector<1x4x4xf32> to vector<4x4xf32>
    %403 = vector.extract_strided_slice %381 {offsets = [0, 17], sizes = [4, 222], strides = [1, 1]} : vector<4x256xf32> to vector<4x222xf32>
    %cst_259 = arith.constant dense<0.000000e+00> : vector<4x222xf32>
    %404 = tpu.matmul %402, %403, %cst_259 {dimension_numbers = #tpu.dot_dimension_numbers<[1], [0], [0], [1], [0, 0, 1, 1], [], []>} : vector<4x4xf32>, vector<4x222xf32>, vector<4x222xf32> -> vector<4x222xf32>
    %405 = arith.addf %400, %404 : vector<4x222xf32>
    %c5_260 = arith.constant 5 : index
    %c0_261 = arith.constant 0 : index
    %c0_262 = arith.constant 0 : index
    %406 = vector.load %arg8[%c5_260, %c0_261, %c0_262] : memref<9x4x4xf32, #tpu.memory_space<vmem>>, vector<1x4x4xf32>
    %407 = vector.shape_cast %406 : vector<1x4x4xf32> to vector<4x4xf32>
    %408 = vector.extract_strided_slice %381 {offsets = [0, 18], sizes = [4, 222], strides = [1, 1]} : vector<4x256xf32> to vector<4x222xf32>
    %cst_263 = arith.constant dense<0.000000e+00> : vector<4x222xf32>
    %409 = tpu.matmul %407, %408, %cst_263 {dimension_numbers = #tpu.dot_dimension_numbers<[1], [0], [0], [1], [0, 0, 1, 1], [], []>} : vector<4x4xf32>, vector<4x222xf32>, vector<4x222xf32> -> vector<4x222xf32>
    %410 = arith.addf %405, %409 : vector<4x222xf32>
    %c6_264 = arith.constant 6 : index
    %c0_265 = arith.constant 0 : index
    %c0_266 = arith.constant 0 : index
    %411 = vector.load %arg8[%c6_264, %c0_265, %c0_266] : memref<9x4x4xf32, #tpu.memory_space<vmem>>, vector<1x4x4xf32>
    %412 = vector.shape_cast %411 : vector<1x4x4xf32> to vector<4x4xf32>
    %413 = vector.extract_strided_slice %381 {offsets = [0, 32], sizes = [4, 222], strides = [1, 1]} : vector<4x256xf32> to vector<4x222xf32>
    %cst_267 = arith.constant dense<0.000000e+00> : vector<4x222xf32>
    %414 = tpu.matmul %412, %413, %cst_267 {dimension_numbers = #tpu.dot_dimension_numbers<[1], [0], [0], [1], [0, 0, 1, 1], [], []>} : vector<4x4xf32>, vector<4x222xf32>, vector<4x222xf32> -> vector<4x222xf32>
    %415 = arith.addf %410, %414 : vector<4x222xf32>
    %c7_268 = arith.constant 7 : index
    %c0_269 = arith.constant 0 : index
    %c0_270 = arith.constant 0 : index
    %416 = vector.load %arg8[%c7_268, %c0_269, %c0_270] : memref<9x4x4xf32, #tpu.memory_space<vmem>>, vector<1x4x4xf32>
    %417 = vector.shape_cast %416 : vector<1x4x4xf32> to vector<4x4xf32>
    %418 = vector.extract_strided_slice %381 {offsets = [0, 33], sizes = [4, 222], strides = [1, 1]} : vector<4x256xf32> to vector<4x222xf32>
    %cst_271 = arith.constant dense<0.000000e+00> : vector<4x222xf32>
    %419 = tpu.matmul %417, %418, %cst_271 {dimension_numbers = #tpu.dot_dimension_numbers<[1], [0], [0], [1], [0, 0, 1, 1], [], []>} : vector<4x4xf32>, vector<4x222xf32>, vector<4x222xf32> -> vector<4x222xf32>
    %420 = arith.addf %415, %419 : vector<4x222xf32>
    %c8_272 = arith.constant 8 : index
    %c0_273 = arith.constant 0 : index
    %c0_274 = arith.constant 0 : index
    %421 = vector.load %arg8[%c8_272, %c0_273, %c0_274] : memref<9x4x4xf32, #tpu.memory_space<vmem>>, vector<1x4x4xf32>
    %422 = vector.shape_cast %421 : vector<1x4x4xf32> to vector<4x4xf32>
    %423 = vector.extract_strided_slice %381 {offsets = [0, 34], sizes = [4, 222], strides = [1, 1]} : vector<4x256xf32> to vector<4x222xf32>
    %cst_275 = arith.constant dense<0.000000e+00> : vector<4x222xf32>
    %424 = tpu.matmul %422, %423, %cst_275 {dimension_numbers = #tpu.dot_dimension_numbers<[1], [0], [0], [1], [0, 0, 1, 1], [], []>} : vector<4x4xf32>, vector<4x222xf32>, vector<4x222xf32> -> vector<4x222xf32>
    %425 = arith.addf %420, %424 : vector<4x222xf32>
    %c0_276 = arith.constant 0 : index
    %c0_277 = arith.constant 0 : index
    %426 = vector.load %arg9[%c0_276, %c0_277] : memref<4x1xf32, #tpu.memory_space<vmem>>, vector<4x1xf32>
    %427 = vector.broadcast %426 : vector<4x1xf32> to vector<4x222xf32>
    %428 = arith.addf %425, %427 : vector<4x222xf32>
    %cst_278 = arith.constant 0.000000e+00 : f32
    %429 = vector.broadcast %cst_278 : f32 to vector<4x222xf32>
    %430 = arith.maximumf %428, %429 : vector<4x222xf32>
    %cst_279 = arith.constant 0.000000e+00 : f32
    %431 = vector.broadcast %cst_279 : f32 to vector<4x256xf32>
    %c0_280 = arith.constant 0 : index
    %c0_281 = arith.constant 0 : index
    %432 = vector.load %arg22[%c0_280, %c0_281] : memref<4x256xf32, #tpu.memory_space<vmem>>, vector<4x256xf32>
    tpu.vector_store %arg22[%c0_280, %c0_281], %431 {strides = array<i32>} : memref<4x256xf32, #tpu.memory_space<vmem>>, vector<4x256xf32>,
    %433 = vector.broadcast %380 : vector<1x222xf32> to vector<4x222xf32>
    %434 = arith.mulf %430, %433 : vector<4x222xf32>
    %c0_282 = arith.constant 0 : index
    %c17_283 = arith.constant 17 : index
    %435 = vector.load %arg22[%c0_282, %c17_283] : memref<4x256xf32, #tpu.memory_space<vmem>>, vector<4x222xf32>
    tpu.vector_store %arg22[%c0_282, %c17_283], %434 {strides = array<i32>} : memref<4x256xf32, #tpu.memory_space<vmem>>, vector<4x222xf32>,
    %c0_284 = arith.constant 0 : index
    %c0_285 = arith.constant 0 : index
    %436 = vector.load %arg22[%c0_284, %c0_285] : memref<4x256xf32, #tpu.memory_space<vmem>>, vector<4x256xf32>
    %c0_286 = arith.constant 0 : index
    %c0_287 = arith.constant 0 : index
    %c0_288 = arith.constant 0 : index
    %437 = vector.load %arg10[%c0_286, %c0_287, %c0_288] : memref<9x4x4xf32, #tpu.memory_space<vmem>>, vector<1x4x4xf32>
    %438 = vector.shape_cast %437 : vector<1x4x4xf32> to vector<4x4xf32>
    %439 = vector.extract_strided_slice %436 {offsets = [0, 0], sizes = [4, 222], strides = [1, 1]} : vector<4x256xf32> to vector<4x222xf32>
    %cst_289 = arith.constant dense<0.000000e+00> : vector<4x222xf32>
    %440 = tpu.matmul %438, %439, %cst_289 {dimension_numbers = #tpu.dot_dimension_numbers<[1], [0], [0], [1], [0, 0, 1, 1], [], []>} : vector<4x4xf32>, vector<4x222xf32>, vector<4x222xf32> -> vector<4x222xf32>
    %c1_290 = arith.constant 1 : index
    %c0_291 = arith.constant 0 : index
    %c0_292 = arith.constant 0 : index
    %441 = vector.load %arg10[%c1_290, %c0_291, %c0_292] : memref<9x4x4xf32, #tpu.memory_space<vmem>>, vector<1x4x4xf32>
    %442 = vector.shape_cast %441 : vector<1x4x4xf32> to vector<4x4xf32>
    %443 = vector.extract_strided_slice %436 {offsets = [0, 1], sizes = [4, 222], strides = [1, 1]} : vector<4x256xf32> to vector<4x222xf32>
    %cst_293 = arith.constant dense<0.000000e+00> : vector<4x222xf32>
    %444 = tpu.matmul %442, %443, %cst_293 {dimension_numbers = #tpu.dot_dimension_numbers<[1], [0], [0], [1], [0, 0, 1, 1], [], []>} : vector<4x4xf32>, vector<4x222xf32>, vector<4x222xf32> -> vector<4x222xf32>
    %445 = arith.addf %440, %444 : vector<4x222xf32>
    %c2_294 = arith.constant 2 : index
    %c0_295 = arith.constant 0 : index
    %c0_296 = arith.constant 0 : index
    %446 = vector.load %arg10[%c2_294, %c0_295, %c0_296] : memref<9x4x4xf32, #tpu.memory_space<vmem>>, vector<1x4x4xf32>
    %447 = vector.shape_cast %446 : vector<1x4x4xf32> to vector<4x4xf32>
    %448 = vector.extract_strided_slice %436 {offsets = [0, 2], sizes = [4, 222], strides = [1, 1]} : vector<4x256xf32> to vector<4x222xf32>
    %cst_297 = arith.constant dense<0.000000e+00> : vector<4x222xf32>
    %449 = tpu.matmul %447, %448, %cst_297 {dimension_numbers = #tpu.dot_dimension_numbers<[1], [0], [0], [1], [0, 0, 1, 1], [], []>} : vector<4x4xf32>, vector<4x222xf32>, vector<4x222xf32> -> vector<4x222xf32>
    %450 = arith.addf %445, %449 : vector<4x222xf32>
    %c3_298 = arith.constant 3 : index
    %c0_299 = arith.constant 0 : index
    %c0_300 = arith.constant 0 : index
    %451 = vector.load %arg10[%c3_298, %c0_299, %c0_300] : memref<9x4x4xf32, #tpu.memory_space<vmem>>, vector<1x4x4xf32>
    %452 = vector.shape_cast %451 : vector<1x4x4xf32> to vector<4x4xf32>
    %453 = vector.extract_strided_slice %436 {offsets = [0, 16], sizes = [4, 222], strides = [1, 1]} : vector<4x256xf32> to vector<4x222xf32>
    %cst_301 = arith.constant dense<0.000000e+00> : vector<4x222xf32>
    %454 = tpu.matmul %452, %453, %cst_301 {dimension_numbers = #tpu.dot_dimension_numbers<[1], [0], [0], [1], [0, 0, 1, 1], [], []>} : vector<4x4xf32>, vector<4x222xf32>, vector<4x222xf32> -> vector<4x222xf32>
    %455 = arith.addf %450, %454 : vector<4x222xf32>
    %c4_302 = arith.constant 4 : index
    %c0_303 = arith.constant 0 : index
    %c0_304 = arith.constant 0 : index
    %456 = vector.load %arg10[%c4_302, %c0_303, %c0_304] : memref<9x4x4xf32, #tpu.memory_space<vmem>>, vector<1x4x4xf32>
    %457 = vector.shape_cast %456 : vector<1x4x4xf32> to vector<4x4xf32>
    %458 = vector.extract_strided_slice %436 {offsets = [0, 17], sizes = [4, 222], strides = [1, 1]} : vector<4x256xf32> to vector<4x222xf32>
    %cst_305 = arith.constant dense<0.000000e+00> : vector<4x222xf32>
    %459 = tpu.matmul %457, %458, %cst_305 {dimension_numbers = #tpu.dot_dimension_numbers<[1], [0], [0], [1], [0, 0, 1, 1], [], []>} : vector<4x4xf32>, vector<4x222xf32>, vector<4x222xf32> -> vector<4x222xf32>
    %460 = arith.addf %455, %459 : vector<4x222xf32>
    %c5_306 = arith.constant 5 : index
    %c0_307 = arith.constant 0 : index
    %c0_308 = arith.constant 0 : index
    %461 = vector.load %arg10[%c5_306, %c0_307, %c0_308] : memref<9x4x4xf32, #tpu.memory_space<vmem>>, vector<1x4x4xf32>
    %462 = vector.shape_cast %461 : vector<1x4x4xf32> to vector<4x4xf32>
    %463 = vector.extract_strided_slice %436 {offsets = [0, 18], sizes = [4, 222], strides = [1, 1]} : vector<4x256xf32> to vector<4x222xf32>
    %cst_309 = arith.constant dense<0.000000e+00> : vector<4x222xf32>
    %464 = tpu.matmul %462, %463, %cst_309 {dimension_numbers = #tpu.dot_dimension_numbers<[1], [0], [0], [1], [0, 0, 1, 1], [], []>} : vector<4x4xf32>, vector<4x222xf32>, vector<4x222xf32> -> vector<4x222xf32>
    %465 = arith.addf %460, %464 : vector<4x222xf32>
    %c6_310 = arith.constant 6 : index
    %c0_311 = arith.constant 0 : index
    %c0_312 = arith.constant 0 : index
    %466 = vector.load %arg10[%c6_310, %c0_311, %c0_312] : memref<9x4x4xf32, #tpu.memory_space<vmem>>, vector<1x4x4xf32>
    %467 = vector.shape_cast %466 : vector<1x4x4xf32> to vector<4x4xf32>
    %468 = vector.extract_strided_slice %436 {offsets = [0, 32], sizes = [4, 222], strides = [1, 1]} : vector<4x256xf32> to vector<4x222xf32>
    %cst_313 = arith.constant dense<0.000000e+00> : vector<4x222xf32>
    %469 = tpu.matmul %467, %468, %cst_313 {dimension_numbers = #tpu.dot_dimension_numbers<[1], [0], [0], [1], [0, 0, 1, 1], [], []>} : vector<4x4xf32>, vector<4x222xf32>, vector<4x222xf32> -> vector<4x222xf32>
    %470 = arith.addf %465, %469 : vector<4x222xf32>
    %c7_314 = arith.constant 7 : index
    %c0_315 = arith.constant 0 : index
    %c0_316 = arith.constant 0 : index
    %471 = vector.load %arg10[%c7_314, %c0_315, %c0_316] : memref<9x4x4xf32, #tpu.memory_space<vmem>>, vector<1x4x4xf32>
    %472 = vector.shape_cast %471 : vector<1x4x4xf32> to vector<4x4xf32>
    %473 = vector.extract_strided_slice %436 {offsets = [0, 33], sizes = [4, 222], strides = [1, 1]} : vector<4x256xf32> to vector<4x222xf32>
    %cst_317 = arith.constant dense<0.000000e+00> : vector<4x222xf32>
    %474 = tpu.matmul %472, %473, %cst_317 {dimension_numbers = #tpu.dot_dimension_numbers<[1], [0], [0], [1], [0, 0, 1, 1], [], []>} : vector<4x4xf32>, vector<4x222xf32>, vector<4x222xf32> -> vector<4x222xf32>
    %475 = arith.addf %470, %474 : vector<4x222xf32>
    %c8_318 = arith.constant 8 : index
    %c0_319 = arith.constant 0 : index
    %c0_320 = arith.constant 0 : index
    %476 = vector.load %arg10[%c8_318, %c0_319, %c0_320] : memref<9x4x4xf32, #tpu.memory_space<vmem>>, vector<1x4x4xf32>
    %477 = vector.shape_cast %476 : vector<1x4x4xf32> to vector<4x4xf32>
    %478 = vector.extract_strided_slice %436 {offsets = [0, 34], sizes = [4, 222], strides = [1, 1]} : vector<4x256xf32> to vector<4x222xf32>
    %cst_321 = arith.constant dense<0.000000e+00> : vector<4x222xf32>
    %479 = tpu.matmul %477, %478, %cst_321 {dimension_numbers = #tpu.dot_dimension_numbers<[1], [0], [0], [1], [0, 0, 1, 1], [], []>} : vector<4x4xf32>, vector<4x222xf32>, vector<4x222xf32> -> vector<4x222xf32>
    %480 = arith.addf %475, %479 : vector<4x222xf32>
    %c0_322 = arith.constant 0 : index
    %c0_323 = arith.constant 0 : index
    %481 = vector.load %arg11[%c0_322, %c0_323] : memref<4x1xf32, #tpu.memory_space<vmem>>, vector<4x1xf32>
    %482 = vector.broadcast %481 : vector<4x1xf32> to vector<4x222xf32>
    %483 = arith.addf %480, %482 : vector<4x222xf32>
    %cst_324 = arith.constant 0.000000e+00 : f32
    %484 = vector.broadcast %cst_324 : f32 to vector<4x222xf32>
    %485 = arith.maximumf %483, %484 : vector<4x222xf32>
    %cst_325 = arith.constant 0.000000e+00 : f32
    %486 = vector.broadcast %cst_325 : f32 to vector<4x256xf32>
    %c0_326 = arith.constant 0 : index
    %c0_327 = arith.constant 0 : index
    %487 = vector.load %arg23[%c0_326, %c0_327] : memref<4x256xf32, #tpu.memory_space<vmem>>, vector<4x256xf32>
    tpu.vector_store %arg23[%c0_326, %c0_327], %486 {strides = array<i32>} : memref<4x256xf32, #tpu.memory_space<vmem>>, vector<4x256xf32>,
    %488 = vector.broadcast %380 : vector<1x222xf32> to vector<4x222xf32>
    %489 = arith.mulf %485, %488 : vector<4x222xf32>
    %c0_328 = arith.constant 0 : index
    %c17_329 = arith.constant 17 : index
    %490 = vector.load %arg23[%c0_328, %c17_329] : memref<4x256xf32, #tpu.memory_space<vmem>>, vector<4x222xf32>
    tpu.vector_store %arg23[%c0_328, %c17_329], %489 {strides = array<i32>} : memref<4x256xf32, #tpu.memory_space<vmem>>, vector<4x222xf32>,
    %c0_330 = arith.constant 0 : index
    %c0_331 = arith.constant 0 : index
    %491 = vector.load %arg12[%c0_330, %c0_331] : memref<3x4xf32, #tpu.memory_space<vmem>>, vector<3x4xf32>
    %c0_332 = arith.constant 0 : index
    %c0_333 = arith.constant 0 : index
    %492 = vector.load %arg23[%c0_332, %c0_333] : memref<4x256xf32, #tpu.memory_space<vmem>>, vector<4x256xf32>
    %cst_334 = arith.constant dense<0.000000e+00> : vector<3x256xf32>
    %493 = tpu.matmul %491, %492, %cst_334 {dimension_numbers = #tpu.dot_dimension_numbers<[1], [0], [0], [1], [0, 0, 1, 1], [], []>} : vector<3x4xf32>, vector<4x256xf32>, vector<3x256xf32> -> vector<3x256xf32>
    %c0_335 = arith.constant 0 : index
    %c0_336 = arith.constant 0 : index
    %494 = vector.load %arg13[%c0_335, %c0_336] : memref<3x1xf32, #tpu.memory_space<vmem>>, vector<3x1xf32>
    %495 = vector.broadcast %494 : vector<3x1xf32> to vector<3x256xf32>
    %496 = arith.addf %493, %495 : vector<3x256xf32>
    %c0_337 = arith.constant 0 : index
    %c0_338 = arith.constant 0 : index
    %c0_339 = arith.constant 0 : index
    %497 = vector.load %arg18[%c0_337, %c0_338, %c0_339] : memref<1x3x256xf32, #tpu.memory_space<vmem>>, vector<1x3x256xf32>
    %498 = vector.shape_cast %497 : vector<1x3x256xf32> to vector<3x256xf32>
    %499 = vector.shape_cast %496 : vector<3x256xf32> to vector<1x3x256xf32>
    tpu.vector_store %arg18[%c0_337, %c0_338, %c0_339], %499 {strides = array<i32>} : memref<1x3x256xf32, #tpu.memory_space<vmem>>, vector<1x3x256xf32>,
    return
  }
  func.func @transform_0(%arg0: i32) -> (i32, i32, i32) {
    %c0_i32 = arith.constant 0 : i32
    %c0_i32_0 = arith.constant 0 : i32
    %c0_i32_1 = arith.constant 0 : i32
    return %arg0, %c0_i32, %c0_i32_0 : i32, i32, i32
  }
  func.func @transform_1(%arg0: i32) -> (i32, i32, i32) {
    %c0_i32 = arith.constant 0 : i32
    %c0_i32_0 = arith.constant 0 : i32
    %c0_i32_1 = arith.constant 0 : i32
    %c0_i32_2 = arith.constant 0 : i32
    return %c0_i32, %c0_i32_0, %c0_i32_1 : i32, i32, i32
  }
  func.func @transform_2(%arg0: i32) -> (i32, i32, i32) {
    %c0_i32 = arith.constant 0 : i32
    %c0_i32_0 = arith.constant 0 : i32
    %c0_i32_1 = arith.constant 0 : i32
    %c0_i32_2 = arith.constant 0 : i32
    return %c0_i32, %c0_i32_0, %c0_i32_1 : i32, i32, i32
  }
  func.func @transform_3(%arg0: i32) -> (i32, i32, i32) {
    %c0_i32 = arith.constant 0 : i32
    %c0_i32_0 = arith.constant 0 : i32
    %c0_i32_1 = arith.constant 0 : i32
    %c0_i32_2 = arith.constant 0 : i32
    return %c0_i32, %c0_i32_0, %c0_i32_1 : i32, i32, i32
  }
  func.func @transform_4(%arg0: i32) -> (i32, i32) {
    %c0_i32 = arith.constant 0 : i32
    %c0_i32_0 = arith.constant 0 : i32
    %c0_i32_1 = arith.constant 0 : i32
    return %c0_i32, %c0_i32_0 : i32, i32
  }
  func.func @transform_5(%arg0: i32) -> (i32, i32) {
    %c0_i32 = arith.constant 0 : i32
    %c0_i32_0 = arith.constant 0 : i32
    %c0_i32_1 = arith.constant 0 : i32
    return %c0_i32, %c0_i32_0 : i32, i32
  }
  func.func @transform_6(%arg0: i32) -> (i32, i32) {
    %c0_i32 = arith.constant 0 : i32
    %c0_i32_0 = arith.constant 0 : i32
    %c0_i32_1 = arith.constant 0 : i32
    return %c0_i32, %c0_i32_0 : i32, i32
  }
  func.func @transform_7(%arg0: i32) -> (i32, i32, i32) {
    %c0_i32 = arith.constant 0 : i32
    %c0_i32_0 = arith.constant 0 : i32
    %c0_i32_1 = arith.constant 0 : i32
    %c0_i32_2 = arith.constant 0 : i32
    return %c0_i32, %c0_i32_0, %c0_i32_1 : i32, i32, i32
  }
  func.func @transform_8(%arg0: i32) -> (i32, i32) {
    %c0_i32 = arith.constant 0 : i32
    %c0_i32_0 = arith.constant 0 : i32
    %c0_i32_1 = arith.constant 0 : i32
    return %c0_i32, %c0_i32_0 : i32, i32
  }
  func.func @transform_9(%arg0: i32) -> (i32, i32, i32) {
    %c0_i32 = arith.constant 0 : i32
    %c0_i32_0 = arith.constant 0 : i32
    %c0_i32_1 = arith.constant 0 : i32
    %c0_i32_2 = arith.constant 0 : i32
    return %c0_i32, %c0_i32_0, %c0_i32_1 : i32, i32, i32
  }
  func.func @transform_10(%arg0: i32) -> (i32, i32) {
    %c0_i32 = arith.constant 0 : i32
    %c0_i32_0 = arith.constant 0 : i32
    %c0_i32_1 = arith.constant 0 : i32
    return %c0_i32, %c0_i32_0 : i32, i32
  }
  func.func @transform_11(%arg0: i32) -> (i32, i32) {
    %c0_i32 = arith.constant 0 : i32
    %c0_i32_0 = arith.constant 0 : i32
    %c0_i32_1 = arith.constant 0 : i32
    return %c0_i32, %c0_i32_0 : i32, i32
  }
  func.func @transform_12(%arg0: i32) -> (i32, i32) {
    %c0_i32 = arith.constant 0 : i32
    %c0_i32_0 = arith.constant 0 : i32
    %c0_i32_1 = arith.constant 0 : i32
    return %c0_i32, %c0_i32_0 : i32, i32
  }
  func.func @transform_13(%arg0: i32) -> (i32, i32) {
    %c0_i32 = arith.constant 0 : i32
    %c0_i32_0 = arith.constant 0 : i32
    %c0_i32_1 = arith.constant 0 : i32
    return %c0_i32, %c0_i32_0 : i32, i32
  }
  func.func @transform_14(%arg0: i32) -> (i32, i32) {
    %c0_i32 = arith.constant 0 : i32
    %c0_i32_0 = arith.constant 0 : i32
    %c0_i32_1 = arith.constant 0 : i32
    return %c0_i32, %c0_i32_0 : i32, i32
  }
  func.func @transform_15(%arg0: i32) -> (i32, i32) {
    %c0_i32 = arith.constant 0 : i32
    %c0_i32_0 = arith.constant 0 : i32
    %c0_i32_1 = arith.constant 0 : i32
    return %c0_i32, %c0_i32_0 : i32, i32
  }
  func.func @transform_16(%arg0: i32) -> (i32, i32) {
    %c0_i32 = arith.constant 0 : i32
    %c0_i32_0 = arith.constant 0 : i32
    %c0_i32_1 = arith.constant 0 : i32
    return %c0_i32, %c0_i32_0 : i32, i32
  }
  func.func @transform_17(%arg0: i32) -> (i32, i32, i32) {
    %c0_i32 = arith.constant 0 : i32
    %c0_i32_0 = arith.constant 0 : i32
    %c0_i32_1 = arith.constant 0 : i32
    return %arg0, %c0_i32, %c0_i32_0 : i32, i32, i32
  }
}

</mosaic_0001>

<bundles_post_ra>
// kernel: _lambda_.1
= control target key start
LH: loop header
LB: loop body
LE: loop exit
PB: predicated region body
PF: predicated region fallthrough
CT: control target
= control target key end

     0   :  { %s7433_s24 = smov 0   ;;  %s8274_s0 = inlined_call_operand.vmem [shape: f32[2,8,100], index: 0, kind: input, shape index: {}]   ;;  %s8275_s1 = inlined_call_operand.vmem [shape: f32[9,8,8], index: 1, kind: input, shape index: {}]   ;;  %s8276_s2 = inlined_call_operand.vmem [shape: f32[9,8,8], index: 2, kind: input, shape index: {}]   ;;  %s8277_s3 = inlined_call_operand.vmem [shape: f32[25,4,8], index: 3, kind: input, shape index: {}]   ;;  %s8278_s4 = inlined_call_operand.vmem [shape: f32[4,1], index: 4, kind: input, shape index: {}]   ;;  %s8279_s5 = inlined_call_operand.vmem [shape: f32[4,1], index: 5, kind: input, shape index: {}]   ;;  %s8280_s6 = inlined_call_operand.vmem [shape: f32[4,1], index: 6, kind: input, shape index: {}]   ;;  %s8281_s7 = inlined_call_operand.vmem [shape: f32[9,4,4], index: 7, kind: input, shape index: {}]   ;;  %s8282_s8 = inlined_call_operand.vmem [shape: f32[4,1], index: 8, kind: input, shape index: {}]   ;;  %s8283_s9 = inlined_call_operand.vmem [shape: f32[9,4,4], index: 9, kind: input, shape index: {}]   ;;  %s8284_s10 = inlined_call_operand.vmem [shape: f32[4,1], index: 10, kind: input, shape index: {}]   ;;  %s8285_s11 = inlined_call_operand.vmem [shape: f32[3,4], index: 11, kind: input, shape index: {}]   ;;  %s8286_s12 = inlined_call_operand.vmem [shape: f32[3,1], index: 12, kind: input, shape index: {}]   ;;  %s8287_s13 = inlined_call_operand.vmem [shape: f32[8,16], index: 13, kind: input, shape index: {}]   ;;  %s8288_s14 = inlined_call_operand.vmem [shape: f32[1,78], index: 14, kind: input, shape index: {}]   ;;  %s8289_s15 = inlined_call_operand.vmem [shape: f32[1,248], index: 15, kind: input, shape index: {}]   ;;  %s8290_s16 = inlined_call_operand.vmem [shape: f32[1,222], index: 16, kind: input, shape index: {}]   ;;  %s8291_s17 = inlined_call_operand.vmem [shape: f32[2,3,256], index: 17, kind: output, shape index: {}]  }
   0x1   :  { %8347 = sst [smem:[#allocation9_spill]] %s8274_s0 }
   0x2   :  { %8348 = sst [smem:[#allocation10_spill]] %s8275_s1 }
   0x3   :  { %8349 = sst [smem:[#allocation11_spill]] %s8276_s2 }
   0x4   :  { %8350 = sst [smem:[#allocation12_spill]] %s8283_s9 }
   0x5   :  { %8351 = sst [smem:[#allocation13_spill]] %s8284_s10 }
   0x6   :  { %8352 = sst [smem:[#allocation14_spill]] %s8285_s11 }
   0x7   :  { %8353 = sst [smem:[#allocation15_spill]] %s8286_s12 }
   0x8   :  { %8354 = sst [smem:[#allocation16_spill]] %s8287_s13 }
   0x9   :  { %8355 = sst [smem:[#allocation17_spill]] %s8288_s14 }
   0xa   :  { %8356 = sst [smem:[#allocation18_spill]] %s8291_s17 }
   0xb LB: > { %8357 = sst [smem:[#allocation7_spill]] %s7286_s24  ;;  %s6836_s25 = sadd.s32 4294967295, %s7286_s24   ;;  %s7286_s24 = sphi %s7433_s24, %s27_s24  }
   0xc   : > { %p6840_p0 = scmp.ge.s32.totalorder %s7286_s24, 1  ;;  %p486_p1 = scmp.lt.s32.totalorder %s7286_s24, 3 }
   0xe   : > { %p487_p2 = pnand %p6840_p0, %p486_p1 }
  0x10   : > { %490 = sbr.rel (%p487_p2) target bundleno = 3707 (0xe7b), region = 88 }
  0x15   : > { %p537_p3 = scmp.lt.s32.totalorder %s6836_s25, 1  ;;  %v7288_v0 = vmov 0.0   ;;  %vm7289_vm0 = vmmov 0   ;;  %s8359_s29 = sld [smem:[#allocation9_spill]]  ;;  %vm555_vm1 = vcmask 64512   ;;  %vm1262_vm2 = vcmask 637952  }
  0x16   : > { %7064 = vmatprep.subr.mxu0 %v7288_v0  ;;  %2011 = vst [vmem:[#allocation3] sm:$0xff] %v7288_v0  ;;  %2012 = vst [vmem:[#allocation3 + $0x8] sm:$0xff] %v7288_v0  ;;  %7069 = vmatprep.subr.mxu1 %v7288_v0  ;;  %s8360_s19 = sld [smem:[#allocation10_spill]]  ;;  %s8327_s1 = smov 127   ;;  %vm1279_vm3 = vcmask 818176   ;;  %vm1286_vm4 = vcmask 728152  }
  0x17   : > { %4999 = vst [vmem:[#allocation4] sm:$0xff] %v7288_v0  ;;  %5863 = vst [vmem:[#allocation5] sm:$0xff] %v7288_v0  ;;  %s8401_s25 = smov (!%p537_p3, %s6836_s25), 1  ;;  %7066 = vmatprep.mubr.msk.f32.mxu0 %vm7289_vm0, %v7288_v0  ;;  %7071 = vmatprep.mubr.msk.f32.mxu1 %vm7289_vm0, %v7288_v0  ;;  %s7291_s20 = smov 118   ;;  %vm2094_vm5 = vcmask 285848   ;;  %vm2099_vm6 = vcmask 433448  }
  0x18   : > { %6676 = vst [vmem:[#allocation6] sm:$0xff] %v7288_v0  ;;  %8358 = sst [smem:[#allocation8_spill]] %s8401_s25  ;;  %s8293_s26 = sshll.u32 %s8401_s25, 3  ;;  %1280 = vst.msk [vmem:[#allocation2] sm:$0xff] %vm1279_vm3, %v7288_v0  ;;  %vm2013_vm7 = vcmask 556032   ;;  %vm2179_vm8 = vcmask 581048  }
  0x19   : > { %s8325_s21 = smov 126   ;;  %s7293_s22 = smov 117   ;;  %2014 = vst.msk [vmem:[#allocation3 + $0x10] sm:$0xff] %vm2013_vm7, %v7288_v0  ;;  %vm2184_vm9 = vcmask 728648   ;;  %vm2351_vm10 = vcmask 121856   ;;  %vm2264_vm11 = vcmask 876248  }
  0x1a   : > { %s7294_s23 = smov 116   ;;  %s8301_s27 = smov 108   ;;  %vm2356_vm12 = vcmask 269448   ;;  %vm2269_vm13 = vcmask 1023848   ;;  %vm2436_vm14 = vcmask 417048   ;;  %vm2349_vm15 = vcmask 1048568  }
  0x1b   : > { %s540_s0 = scalar_lea.vmem %s8359_s29, %s8293_s26  ;;  %s8294_s28 = smov 107   ;;  %vm2521_vm3 = vcmask 712248   ;;  %vm2693_vm7 = vcmask 253048  }
  0x1c   : > { %v546_v1 = vld [vmem:[%s540_s0] sm:$0xff]  ;;  %s8296_s29 = smov 106   ;;  %v6844_v3 = vld [vmem:[%s8360_s19 + $0x8] sm:$0xff]  ;;  %v6849_v6 = vld [vmem:[%s8360_s19 + $0x18] sm:$0xff]  ;;  %s8361_s14 = sld [smem:[#allocation17_spill]] }
  0x1d   : > { %v548_v2 = vld [vmem:[%s8360_s19] sm:$0xff]  ;;  %552 = vrot.lane.b32.xlu0 %v546_v1, %s8327_s1  ;;  %783 = vrot.lane.b32.xlu1 %v546_v1, %s7291_s20  ;;  %v6847_v7 = vld [vmem:[%s8360_s19 + $0x10] sm:$0xff]  ;;  %s8298_s26 = smov 11   ;;  %s8362_s2 = sld [smem:[#allocation11_spill]] }
  0x1e   : > { %7070 = vmatpush3.msra.mxu1 %v546_v1  ;;  %v6851_v10 = vld [vmem:[%s8360_s19 + $0x20] sm:$0xff]  ;;  %v6853_v11 = vld [vmem:[%s8360_s19 + $0x28] sm:$0xff]  ;;  %v6855_v14 = vld [vmem:[%s8360_s19 + $0x30] sm:$0xff]  ;;  %s8363_s0 = smov 106   ;;  %s8364_s30 = smov 107  }
  0x1f   : > { %7072 = vmatmul.mubr.msk.f32.vlgmr.msra.gmra.mxu1 %vm555_vm1, %v548_v2  ;;  %7079 = vmatprep.subr.mxu1 %v7288_v0  ;;  %v6857_v15 = vld [vmem:[%s8360_s19 + $0x38] sm:$0xff]  ;;  %v6859_v18 = vld [vmem:[%s8360_s19 + $0x40] sm:$0xff]  ;;  %s8365_s13 = sld [smem:[#allocation16_spill]]  ;;  %s7299_s18 = smov 98  }
  0x20   : > { %7081 = vmatprep.mubr.msk.f32.mxu1 %vm7289_vm0, %v7288_v0  ;;  %s8377_s19 = smov 110   ;;  %s8379_s24 = smov 90  }
  0x21   : > { %704 = vrot.lane.b32.xlu0 %v546_v1, %s8325_s21  ;;  %862 = vrot.lane.b32.xlu1 %v546_v1, %s7293_s22  ;;  %s8382_s17 = smov 74   ;;  %s8383_s11 = smov 56  }
  0x22   : > { %v7537_v43 = vld [vmem:[%s8361_s14] ss:$0 sm:$0xff]  ;;  %s8375_s14 = smov 109   ;;  %s8384_s25 = smov 72  }
  0x23   : > { %v6862_v2 = vld [vmem:[%s8362_s2 + $0x8] sm:$0xff]  ;;  %s8385_s12 = smov 54   ;;  %s8386_s10 = smov 70  }
  0x24   : > { %s7327_s9 = smov 52  }
  0x25   : > { %941 = vrot.lane.b32.xlu0 %v546_v1, %s7294_s23  ;;  %1020 = vrot.lane.b32.xlu1 %v546_v1, %s8301_s27 }
  0x29   : > { %1099 = vrot.lane.b32.xlu0 %v546_v1, %s8294_s28  ;;  %1178 = vrot.lane.b32.xlu1 %v546_v1, %s8296_s29  ;;  %v1289_v1 = vld [vmem:[%s8362_s2] sm:$0xff]  ;;  %s8309_s28 = smov 88   ;;  %s7305_s29 = smov 37  }
  0x8f   : > { %v553_v4 = vpop.permute.xlu0 %552  ;;  %v784_v5 = vpop.permute.xlu1 %783 }
  0x90   : > { %7065 = vmatpush3.msra.mxu0 %v553_v4  ;;  %7080 = vmatpush3.msra.mxu1 %v784_v5  ;;  %v6865_v5 = vld [vmem:[%s8362_s2 + $0x10] sm:$0xff] }
  0x91   : > { %7067 = vmatmul.mubr.msk.f32.vlgmr.msra.gmra.mxu0 %vm555_vm1, %v6844_v3  ;;  %7074 = vmatprep.subr.mxu0 %v7288_v0 }
  0x92   : > { %7076 = vmatprep.mubr.msk.f32.mxu0 %vm7289_vm0, %v7288_v0  ;;  %7082 = vmatmul.mubr.msk.f32.vlgmr.msra.gmra.mxu1 %vm555_vm1, %v6849_v6  ;;  %v6867_v6 = vld [vmem:[%s8362_s2 + $0x18] sm:$0xff] }
  0x93   : > { %v705_v8 = vpop.permute.xlu0 %704  ;;  %v7489_v9 = vpop.permute.xlu1 %862  ;;  %7089 = vmatprep.subr.mxu1 %v7288_v0  ;;  %7091 = vmatprep.mubr.msk.f32.mxu1 %vm7289_vm0, %v7288_v0 }
  0x94   : > { %7075 = vmatpush3.msra.mxu0 %v705_v8 }
  0x95   : > { %7077 = vmatmul.mubr.msk.f32.vlgmr.msra.gmra.mxu0 %vm555_vm1, %v6847_v7  ;;  %7084 = vmatprep.subr.mxu0 %v7288_v0 }
  0x96   : > { %7085 = vmatpush3.msra.mxu0 %v7489_v9  ;;  %7086 = vmatprep.mubr.msk.f32.mxu0 %vm7289_vm0, %v7288_v0 }
  0x97   : > { %v942_v12 = vpop.permute.xlu0 %941  ;;  %v1021_v13 = vpop.permute.xlu1 %1020  ;;  %7094 = vmatprep.subr.mxu0 %v7288_v0 }
  0x98   : > { %7090 = vmatpush3.msra.mxu1 %v942_v12 }
  0x99   : > { %7087 = vmatmul.mubr.msk.f32.vlgmr.msra.gmra.mxu0 %vm555_vm1, %v6851_v10  ;;  %7092 = vmatmul.mubr.msk.f32.vlgmr.msra.gmra.mxu1 %vm555_vm1, %v6853_v11  ;;  %v6869_v10 = vld [vmem:[%s8362_s2 + $0x20] sm:$0xff]  ;;  %v6871_v11 = vld [vmem:[%s8362_s2 + $0x28] sm:$0xff] }
  0x9a   : > { %7099 = vmatprep.subr.mxu1 %v7288_v0  ;;  %7095 = vmatpush3.msra.mxu0 %v1021_v13 }
  0x9b   : > { %v1100_v16 = vpop.permute.xlu0 %1099  ;;  %7096 = vmatprep.mubr.msk.f32.mxu0 %vm7289_vm0, %v7288_v0  ;;  %7101 = vmatprep.mubr.msk.f32.mxu1 %vm7289_vm0, %v7288_v0  ;;  %v1179_v17 = vpop.permute.xlu1 %1178 }
  0x9c   : > { %7100 = vmatpush3.msra.mxu1 %v1100_v16  ;;  %7104 = vmatprep.subr.mxu0 %v7288_v0 }
  0x9d   : > { %7097 = vmatmul.mubr.msk.f32.vlgmr.msra.gmra.mxu0 %vm555_vm1, %v6855_v14  ;;  %7102 = vmatmul.mubr.msk.f32.vlgmr.msra.gmra.mxu1 %vm555_vm1, %v6857_v15  ;;  %v6873_v14 = vld [vmem:[%s8362_s2 + $0x30] sm:$0xff]  ;;  %v6875_v15 = vld [vmem:[%s8362_s2 + $0x38] sm:$0xff] }
  0x9e   : > { %7105 = vmatpush3.msra.mxu0 %v1179_v17  ;;  %7106 = vmatprep.mubr.msk.f32.mxu0 %vm7289_vm0, %v7288_v0 }
  0x9f   : > { %7114 = vmatprep.subr.mxu0 %v7288_v0  ;;  %7109 = vmatprep.subr.mxu1 %v7288_v0 }
  0xa0   : > { %7111 = vmatprep.mubr.msk.f32.mxu1 %vm7289_vm0, %v7288_v0 }
  0xa1   : > { %7107 = vmatmul.mubr.msk.f32.vlgmr.msra.gmra.mxu0 %vm555_vm1, %v6859_v18  ;;  %v6877_v18 = vld [vmem:[%s8362_s2 + $0x40] sm:$0xff]  ;;  %s8371_s2 = smov 126  }
  0xa2   : > { %7116 = vmatprep.mubr.msk.f32.mxu0 %vm7289_vm0, %v7288_v0 }
  0xdf   : > { %v698_v19 = vpop.f32.mrf.mxu1 }
  0xe1   : > { %v7073_v20 = vpop.f32.mrf.mxu1 }
 0x151   : > { %v625_v21 = vpop.f32.mrf.mxu0 }
 0x152   : > { %v855_v22 = vpop.f32.mrf.mxu1  ;;  %v699_v24 = vadd.f32 %v698_v19, %v625_v21 }
 0x153   : > { %v7068_v23 = vpop.f32.mrf.mxu0 }
 0x154   : > { %v7083_v25 = vpop.f32.mrf.mxu1 }
 0x155   : > { %v776_v26 = vpop.f32.mrf.mxu0 }
 0x156   : > { %v780_v27 = vadd.f32 %v776_v26, %v699_v24 }
 0x157   : > { %v7078_v28 = vpop.f32.mrf.mxu0 }
 0x158   : > { %v859_v29 = vadd.f32 %v855_v22, %v780_v27 }
 0x159   : > { %v934_v30 = vpop.f32.mrf.mxu0  ;;  %v1013_v31 = vpop.f32.mrf.mxu1 }
 0x15a   : > { %v938_v32 = vadd.f32 %v934_v30, %v859_v29 }
 0x15b   : > { %v7088_v33 = vpop.f32.mrf.mxu0  ;;  %v7093_v34 = vpop.f32.mrf.mxu1 }
 0x15c   : > { %v1017_v35 = vadd.f32 %v1013_v31, %v938_v32 }
 0x15d   : > { %v1092_v36 = vpop.f32.mrf.mxu0  ;;  %v1171_v37 = vpop.f32.mrf.mxu1 }
 0x15e   : > { %v1096_v38 = vadd.f32 %v1092_v36, %v1017_v35 }
 0x15f   : > { %v7098_v39 = vpop.f32.mrf.mxu0  ;;  %v7103_v40 = vpop.f32.mrf.mxu1 }
 0x160   : > { %v1175_v41 = vadd.f32 %v1171_v37, %v1096_v38 }
 0x161   : > { %v1250_v42 = vpop.f32.mrf.mxu0 }
 0x162   : > { %v1254_v44 = vadd.f32 %v1250_v42, %v1175_v41 }
 0x163   : > { %v7108_v45 = vpop.f32.mrf.mxu0 }
 0x164   : > { %v1261_v46 = vmul.f32 %v7537_v43, %v1254_v44 }
 0x166   : > { %v1263_v47 = vsel %vm1262_vm2, %v1261_v46, 0.0  ;;  %v1266_v48 = vmul.f32 %v1261_v46, %v1254_v44 }
 0x167   : > { %1264 = vadd.xlane.f32.xlu0 %v1263_v47 }
 0x168   : > { %v1267_v49 = vsel %vm1262_vm2, %v1266_v48, 0.0 }
 0x169   : > { %1268 = vadd.xlane.f32.xlu1 %v1267_v49 }
 0x1f0   : > { %v1265_v50 = vpop.xlane.xlu0 %1264 }
 0x1f1   : > { %v1270_v51 = vmul.f32 0.015625, %v1265_v50  ;;  %v2015_v50 = vld [vmem:[%s8365_s13] sm:$0xff]  ;;  %s8374_s13 = smov 55  }
 0x1f2   : > { %v1269_v52 = vpop.xlane.xlu1 %1268 }
 0x1f3   : > { %v1272_v53 = vmul.f32 %v1270_v51, %v1270_v51  ;;  %v1271_v54 = vmul.f32 0.015625, %v1269_v52  ;;  %v1274_v57 = vsub.f32 %v1254_v44, %v1270_v51 }
 0x1f5   : > { %v1273_v55 = vsub.f32 %v1271_v54, %v1272_v53 }
 0x1f7   : > { %v1275_v56 = vadd.f32 1e-05, %v1273_v55 }
 0x1f9   : > { %7270 = vrsqrt.f32 %v1275_v56 }
 0x206   : > { %v7271_v58 = vpop.eup %7270 }
 0x207   : > { %v1277_v59 = vmul.f32 %v7271_v58, %v1274_v57 }
 0x209   : > { %v1278_v60 = vmax.f32 %v1277_v59, 0.0 }
 0x20b   : > { %v1281_v61 = vmul.f32 %v7537_v43, %v1278_v60 }
 0x20d   : > { %1283 = vrot.lane.b32.xlu0 %v1281_v61, %s8298_s26  ;;  %s7303_s26 = smov 58  }
 0x27f   : > { %v1284_v62 = vpop.permute.xlu0 %1283 }
 0x280   : > { %1287 = vst.msk [vmem:[#allocation2] sm:$0xff] %vm1286_vm4, %v1284_v62  ;;  %vm2526_vm4 = vcmask 859848  }
 0x287   : > { %v1288_v63 = vld [vmem:[#allocation2] sm:$0xff] }
 0x288   : > { %1444 = vrot.lane.b32.xlu0 %v1288_v63, %s8325_s21  ;;  %1293 = vrot.lane.b32.xlu1 %v1288_v63, %s8327_s1 }
 0x289   : > { %7115 = vmatpush3.msra.mxu0 %v1288_v63 }
 0x28a   : > { %7117 = vmatmul.mubr.msk.f32.vlgmr.msra.gmra.mxu0 %vm555_vm1, %v1289_v1  ;;  %7124 = vmatprep.subr.mxu0 %v7288_v0 }
 0x28b   : > { %7126 = vmatprep.mubr.msk.f32.mxu0 %vm7289_vm0, %v7288_v0 }
 0x28c   : > { %1602 = vrot.lane.b32.xlu0 %v1288_v63, %s7293_s22  ;;  %1523 = vrot.lane.b32.xlu1 %v1288_v63, %s7291_s20  ;;  %s7301_s22 = smov 78  }
 0x290   : > { %1760 = vrot.lane.b32.xlu0 %v1288_v63, %s8301_s27  ;;  %1681 = vrot.lane.b32.xlu1 %v1288_v63, %s7294_s23  ;;  %s7302_s23 = smov 68  }
 0x294   : > { %1918 = vrot.lane.b32.xlu0 %v1288_v63, %s8363_s0  ;;  %1839 = vrot.lane.b32.xlu1 %v1288_v63, %s8364_s30 }
 0x2fa   : > { %v1445_v3 = vpop.permute.xlu0 %1444  ;;  %v1294_v4 = vpop.permute.xlu1 %1293 }
 0x2fb   : > { %7110 = vmatpush3.msra.mxu1 %v1294_v4 }
 0x2fc   : > { %7112 = vmatmul.mubr.msk.f32.vlgmr.msra.gmra.mxu1 %vm555_vm1, %v6862_v2  ;;  %7119 = vmatprep.subr.mxu1 %v7288_v0 }
 0x2fd   : > { %7120 = vmatpush3.msra.mxu1 %v1445_v3  ;;  %7121 = vmatprep.mubr.msk.f32.mxu1 %vm7289_vm0, %v7288_v0 }
 0x2fe   : > { %v1603_v7 = vpop.permute.xlu0 %1602  ;;  %v1524_v8 = vpop.permute.xlu1 %1523  ;;  %7129 = vmatprep.subr.mxu1 %v7288_v0 }
 0x2ff   : > { %7125 = vmatpush3.msra.mxu0 %v1524_v8 }
 0x300   : > { %7122 = vmatmul.mubr.msk.f32.vlgmr.msra.gmra.mxu1 %vm555_vm1, %v6865_v5  ;;  %7127 = vmatmul.mubr.msk.f32.vlgmr.msra.gmra.mxu0 %vm555_vm1, %v6867_v6 }
 0x301   : > { %7130 = vmatpush3.msra.mxu1 %v1603_v7  ;;  %7134 = vmatprep.subr.mxu0 %v7288_v0 }
 0x302   : > { %v1761_v12 = vpop.permute.xlu0 %1760  ;;  %v1682_v13 = vpop.permute.xlu1 %1681  ;;  %7131 = vmatprep.mubr.msk.f32.mxu1 %vm7289_vm0, %v7288_v0  ;;  %7136 = vmatprep.mubr.msk.f32.mxu0 %vm7289_vm0, %v7288_v0 }
 0x303   : > { %7135 = vmatpush3.msra.mxu0 %v1682_v13  ;;  %7139 = vmatprep.subr.mxu1 %v7288_v0 }
 0x304   : > { %7132 = vmatmul.mubr.msk.f32.vlgmr.msra.gmra.mxu1 %vm555_vm1, %v6869_v10  ;;  %7137 = vmatmul.mubr.msk.f32.vlgmr.msra.gmra.mxu0 %vm555_vm1, %v6871_v11 }
 0x305   : > { %7140 = vmatpush3.msra.mxu1 %v1761_v12  ;;  %7144 = vmatprep.subr.mxu0 %v7288_v0 }
 0x306   : > { %v1919_v16 = vpop.permute.xlu0 %1918  ;;  %v1840_v17 = vpop.permute.xlu1 %1839  ;;  %7141 = vmatprep.mubr.msk.f32.mxu1 %vm7289_vm0, %v7288_v0  ;;  %7146 = vmatprep.mubr.msk.f32.mxu0 %vm7289_vm0, %v7288_v0 }
 0x307   : > { %7145 = vmatpush3.msra.mxu0 %v1840_v17  ;;  %7149 = vmatprep.subr.mxu1 %v7288_v0 }
 0x308   : > { %7142 = vmatmul.mubr.msk.f32.vlgmr.msra.gmra.mxu1 %vm555_vm1, %v6873_v14  ;;  %7147 = vmatmul.mubr.msk.f32.vlgmr.msra.gmra.mxu0 %vm555_vm1, %v6875_v15 }
 0x309   : > { %7150 = vmatpush3.msra.mxu1 %v1919_v16  ;;  %7151 = vmatprep.mubr.msk.f32.mxu1 %vm7289_vm0, %v7288_v0 }
 0x30a   : > { %7154 = vmatprep.subr.mxu0 %v7288_v0  ;;  %7156 = vmatprep.mubr.msk.f32.mxu0 %vm7289_vm0, %v7288_v0 }
 0x30b   : > { %7159 = vmatprep.subr.mxu1 %v7288_v0  ;;  %7155 = vmatpush3.msra.mxu0 %v2015_v50 }
 0x30c   : > { %7152 = vmatmul.mubr.msk.f32.vlgmr.msra.gmra.mxu1 %vm555_vm1, %v6877_v18  ;;  %7164 = vmatprep.subr.mxu0 %v7288_v0 }
 0x30d   : > { %7161 = vmatprep.mubr.msk.f32.mxu1 %vm7289_vm0, %v7288_v0  ;;  %7160 = vmatpush3.msra.mxu1 %v2015_v50 }
 0x30e   : > { %7169 = vmatprep.subr.mxu1 %v7288_v0 }
 0x34a   : > { %v1438_v19 = vpop.f32.mrf.mxu0 }
 0x34c   : > { %v7118_v20 = vpop.f32.mrf.mxu0 }
 0x3bc   : > { %v1365_v21 = vpop.f32.mrf.mxu1 }
 0x3bd   : > { %v1439_v23 = vadd.f32 %v1438_v19, %v1365_v21 }
 0x3be   : > { %v7113_v22 = vpop.f32.mrf.mxu1 }
 0x3c0   : > { %v1516_v24 = vpop.f32.mrf.mxu1  ;;  %v1595_v25 = vpop.f32.mrf.mxu0 }
 0x3c1   : > { %v1520_v26 = vadd.f32 %v1516_v24, %v1439_v23 }
 0x3c2   : > { %v7123_v27 = vpop.f32.mrf.mxu1  ;;  %v7128_v28 = vpop.f32.mrf.mxu0 }
 0x3c3   : > { %v1599_v29 = vadd.f32 %v1595_v25, %v1520_v26 }
 0x3c4   : > { %v1674_v30 = vpop.f32.mrf.mxu1  ;;  %v1753_v31 = vpop.f32.mrf.mxu0 }
 0x3c5   : > { %v1678_v32 = vadd.f32 %v1674_v30, %v1599_v29 }
 0x3c6   : > { %v7133_v33 = vpop.f32.mrf.mxu1  ;;  %v7138_v34 = vpop.f32.mrf.mxu0 }
 0x3c7   : > { %v1757_v35 = vadd.f32 %v1753_v31, %v1678_v32 }
 0x3c8   : > { %v1832_v36 = vpop.f32.mrf.mxu1  ;;  %v1911_v37 = vpop.f32.mrf.mxu0 }
 0x3c9   : > { %v1836_v38 = vadd.f32 %v1832_v36, %v1757_v35 }
 0x3ca   : > { %v7143_v39 = vpop.f32.mrf.mxu1  ;;  %v7148_v40 = vpop.f32.mrf.mxu0 }
 0x3cb   : > { %v1915_v41 = vadd.f32 %v1911_v37, %v1836_v38  ;;  %v2704_v39 = vld [vmem:[%s8277_s3] sm:$0xf] }
 0x3cc   : > { %v1990_v42 = vpop.f32.mrf.mxu1 }
 0x3cd   : > { %v1994_v44 = vadd.f32 %v1990_v42, %v1915_v41 }
 0x3ce   : > { %v7153_v45 = vpop.f32.mrf.mxu1 }
 0x3cf   : > { %v1995_v46 = vmul.f32 %v7537_v43, %v1994_v44 }
 0x3d1   : > { %v1996_v47 = vsel %vm1262_vm2, %v1995_v46, 0.0  ;;  %v1999_v48 = vmul.f32 %v1995_v46, %v1994_v44 }
 0x3d2   : > { %1997 = vadd.xlane.f32.xlu1 %v1996_v47 }
 0x3d3   : > { %v2000_v49 = vsel %vm1262_vm2, %v1999_v48, 0.0  ;;  %vm2441_vm2 = vcmask 564648   ;;  %v7328_v48 = vmov 0  }
 0x3d4   : > { %2001 = vadd.xlane.f32.xlu0 %v2000_v49  ;;  %7266 = vset.pattern.permute.xlu1 %v7328_v48 }
 0x3d5   : > { %7265 = vset.pattern.permute.xlu0 %v7328_v48 }
 0x45b   : > { %v1998_v51 = vpop.xlane.xlu1 %1997 }
 0x45c   : > { %v2003_v52 = vmul.f32 0.015625, %v1998_v51 }
 0x45d   : > { %v2002_v43 = vpop.xlane.xlu0 %2001 }
 0x45e   : > { %v2005_v53 = vmul.f32 %v2003_v52, %v2003_v52  ;;  %v2004_v54 = vmul.f32 0.015625, %v2002_v43  ;;  %v2007_v57 = vsub.f32 %v1994_v44, %v2003_v52 }
 0x460   : > { %v2006_v55 = vsub.f32 %v2004_v54, %v2005_v53  ;;  %v4904_v53 = vld [vmem:[%s8278_s4] sm:$0xf] }
 0x462   : > { %v2008_v56 = vadd.f32 1e-05, %v2006_v55 }
 0x464   : > { %7272 = vrsqrt.f32 %v2008_v56 }
 0x471   : > { %v7273_v58 = vpop.eup %7272 }
 0x472   : > { %v2010_v59 = vmul.f32 %v7273_v58, %v2007_v57 }
 0x474   : > { %v2016_v60 = vadd.f32 %v2010_v59, %v7489_v9 }
 0x476   : > { %2186 = vrot.lane.b32.xlu1 %v2016_v60, %s8301_s27  ;;  %2101 = vrot.lane.b32.xlu0 %v2016_v60, %s7291_s20  ;;  %s7304_s20 = smov 19   ;;  %s8314_s27 = smov 53  }
 0x477   : > { %7157 = vmatmul.mubr.msk.f32.vlgmr.msra.gmra.mxu0 %vm555_vm1, %v2016_v60 }
 0x478   : > { %7165 = vmatpush3.msra.mxu0 %v2015_v50  ;;  %7166 = vmatprep.mubr.msk.f32.mxu0 %vm7289_vm0, %v7288_v0 }
 0x479   : > { %7174 = vmatprep.subr.mxu0 %v7288_v0 }
 0x47a   : > { %2271 = vrot.lane.b32.xlu1 %v2016_v60, %s7299_s18  ;;  %2358 = vrot.lane.b32.xlu0 %v2016_v60, %s8309_s28  ;;  %s8299_s18 = smov 55   ;;  %s8311_s28 = smov 15  }
 0x47e   : > { %2443 = vrot.lane.b32.xlu1 %v2016_v60, %s7301_s22  ;;  %2528 = vrot.lane.b32.xlu0 %v2016_v60, %s7302_s23  ;;  %s8303_s22 = smov 73   ;;  %s8305_s23 = smov 91  }
 0x482   : > { %2615 = vrot.lane.b32.xlu1 %v2016_v60, %s7303_s26  ;;  %s8307_s26 = smov 17  }
 0x4e8   : > { %v2187_v9 = vpop.permute.xlu1 %2186  ;;  %v2102_v61 = vpop.permute.xlu0 %2101 }
 0x4e9   : > { %7162 = vmatmul.mubr.msk.f32.vlgmr.msra.gmra.mxu1 %vm555_vm1, %v2102_v61  ;;  %7167 = vmatmul.mubr.msk.f32.vlgmr.msra.gmra.mxu0 %vm555_vm1, %v2187_v9  ;;  %v6887_v61 = vld [vmem:[%s8277_s3 + $0x4] sm:$0xf] }
 0x4ea   : > { %7170 = vmatpush3.msra.mxu1 %v2015_v50  ;;  %7171 = vmatprep.mubr.msk.f32.mxu1 %vm7289_vm0, %v7288_v0 }
 0x4eb   : > { %7175 = vmatpush3.msra.mxu0 %v2015_v50  ;;  %7176 = vmatprep.mubr.msk.f32.mxu0 %vm7289_vm0, %v7288_v0 }
 0x4ec   : > { %v2272_v62 = vpop.permute.xlu1 %2271  ;;  %v2359_v63 = vpop.permute.xlu0 %2358  ;;  %7179 = vmatprep.subr.mxu1 %v7288_v0  ;;  %7184 = vmatprep.subr.mxu0 %v7288_v0 }
 0x4ed   : > { %7172 = vmatmul.mubr.msk.f32.vlgmr.msra.gmra.mxu1 %vm555_vm1, %v2272_v62  ;;  %7177 = vmatmul.mubr.msk.f32.vlgmr.msra.gmra.mxu0 %vm555_vm1, %v2359_v63 }
 0x4ee   : > { %7180 = vmatpush3.msra.mxu1 %v2015_v50  ;;  %7181 = vmatprep.mubr.msk.f32.mxu1 %vm7289_vm0, %v7288_v0 }
 0x4ef   : > { %7185 = vmatpush3.msra.mxu0 %v2015_v50  ;;  %7186 = vmatprep.mubr.msk.f32.mxu0 %vm7289_vm0, %v7288_v0 }
 0x4f0   : > { %v2444_v1 = vpop.permute.xlu1 %2443  ;;  %v2529_v2 = vpop.permute.xlu0 %2528  ;;  %7189 = vmatprep.subr.mxu1 %v7288_v0 }
 0x4f1   : > { %7182 = vmatmul.mubr.msk.f32.vlgmr.msra.gmra.mxu1 %vm555_vm1, %v2444_v1  ;;  %7187 = vmatmul.mubr.msk.f32.vlgmr.msra.gmra.mxu0 %vm555_vm1, %v2529_v2  ;;  %v6890_v2 = vld [vmem:[%s8277_s3 + $0x8] sm:$0xf] }
 0x4f2   : > { %7190 = vmatpush3.msra.mxu1 %v2015_v50  ;;  %7191 = vmatprep.mubr.msk.f32.mxu1 %vm7289_vm0, %v7288_v0  ;;  %vm2613_vm0 = vcmask 105472  }
 0x4f3   : > { %2784 = vmatprep.mubr.f32.mxu0 %v7288_v0 }
 0x4f4   : > { %v2616_v3 = vpop.permute.xlu1 %2615 }
 0x4f5   : > { %7192 = vmatmul.mubr.msk.f32.vlgmr.msra.gmra.mxu1 %vm555_vm1, %v2616_v3 }
 0x4f6   : > { %2858 = vmatprep.mubr.f32.mxu1 %v7288_v0 }
 0x537   : > { %v2086_v4 = vpop.f32.mrf.mxu0 }
 0x538   : > { %2091 = vrot.lane.b32.xlu1 %v2086_v4, %s7304_s20  ;;  %s8316_s20 = smov 109  }
 0x539   : > { %v7158_v5 = vpop.f32.mrf.mxu0 }
 0x53c   : > { %2096 = vrot.lane.b32.xlu1 %v2086_v4, %s7305_s29  ;;  %s7311_s29 = smov 35  }
 0x5a9   : > { %v2171_v6 = vpop.f32.mrf.mxu1  ;;  %v2256_v7 = vpop.f32.mrf.mxu0 }
 0x5aa   : > { %v2092_v8 = vpop.permute.xlu1 %2091  ;;  %2176 = vrot.lane.b32.xlu1 %v2171_v6, %s8299_s18  ;;  %s8318_s18 = smov 125  }
 0x5ab   : > { %2095 = vst.msk [vmem:[#allocation3] sm:$0xff] %vm2094_vm5, %v2092_v8  ;;  %v7163_v10 = vpop.f32.mrf.mxu1  ;;  %v7168_v11 = vpop.f32.mrf.mxu0  ;;  %vm2606_vm5 = vcmask 1007448  }
 0x5ac   : > { %v6894_v11 = vld [vmem:[%s8277_s3 + $0x10] sm:$0xf] }
 0x5ad   : > { %v2341_v12 = vpop.f32.mrf.mxu1  ;;  %v2428_v13 = vpop.f32.mrf.mxu0 }
 0x5ae   : > { %v2097_v14 = vpop.permute.xlu1 %2096  ;;  %2181 = vrot.lane.b32.xlu1 %v2171_v6, %s8303_s22  ;;  %2346 = vrot.lane.b32.xlu0 %v2341_v12, %s8327_s1  ;;  %s8329_s22 = smov 71   ;;  %v6892_v6 = vld [vmem:[%s8277_s3 + $0xc] sm:$0xf] }
 0x5af   : > { %2100 = vst.msk [vmem:[#allocation3] sm:$0xff] %vm2099_vm6, %v2097_v14  ;;  %v7173_v15 = vpop.f32.mrf.mxu1  ;;  %v7178_v16 = vpop.f32.mrf.mxu0  ;;  %vm2611_vm6 = vcmask 1048552  }
 0x5b1   : > { %v2513_v17 = vpop.f32.mrf.mxu1  ;;  %v2598_v18 = vpop.f32.mrf.mxu0 }
 0x5b2   : > { %2261 = vrot.lane.b32.xlu1 %v2256_v7, %s8305_s23  ;;  %2353 = vrot.lane.b32.xlu0 %v2341_v12, %s8307_s26  ;;  %s7315_s23 = smov 33   ;;  %s8335_s26 = smov 89  }
 0x5b3   : > { %v7183_v19 = vpop.f32.mrf.mxu1  ;;  %v7188_v20 = vpop.f32.mrf.mxu0 }
 0x5b5   : > { %v2685_v21 = vpop.f32.mrf.mxu1 }
 0x5b6   : > { %2266 = vrot.lane.b32.xlu1 %v2256_v7, %s8316_s20  ;;  %2433 = vrot.lane.b32.xlu0 %v2428_v13, %s7311_s29  ;;  %s8320_s29 = smov 90   ;;  %v7816_v7 = vld [vmem:[#allocation4] sm:$0xff] }
 0x5b7   : > { %v7193_v22 = vpop.f32.mrf.mxu1 }
 0x5ba   : > { %2608 = vrot.lane.b32.xlu1 %v2598_v18, %s8318_s18  ;;  %2438 = vrot.lane.b32.xlu0 %v2428_v13, %s8314_s27  ;;  %s8323_s27 = smov 110  }
 0x5be   : > { %2518 = vrot.lane.b32.xlu0 %v2513_v17, %s8329_s22  ;;  %2695 = vrot.lane.b32.xlu1 %v2685_v21, %s7315_s23  ;;  %s8312_s23 = smov 92  }
 0x5c2   : > { %2523 = vrot.lane.b32.xlu0 %v2513_v17, %s8335_s26 }
 0x5c6   : > { %2603 = vrot.lane.b32.xlu0 %v2598_v18, %s8364_s30 }
 0x5ca   : > { %2690 = vrot.lane.b32.xlu0 %v2685_v21, %s8311_s28  ;;  %s8322_s28 = smov 124  }
 0x61c   : > { %v2177_v23 = vpop.permute.xlu1 %2176 }
 0x61d   : > { %2180 = vst.msk [vmem:[#allocation3] sm:$0xff] %vm2179_vm8, %v2177_v23  ;;  %vm2698_vm8 = vcmask 400648  }
 0x620   : > { %v2182_v24 = vpop.permute.xlu1 %2181  ;;  %v2347_v25 = vpop.permute.xlu0 %2346 }
 0x621   : > { %2185 = vst.msk [vmem:[#allocation3] sm:$0xff] %vm2184_vm9, %v2182_v24  ;;  %vm2713_vm9 = vcmask 1039360  }
 0x622   : > { %2352 = vst.msk [vmem:[#allocation3 + $0x8] sm:$0xff] %vm2351_vm10, %v2347_v25  ;;  %vm2871_vm10 = vcmask 1031168  }
 0x624   : > { %v2262_v26 = vpop.permute.xlu1 %2261  ;;  %v2354_v27 = vpop.permute.xlu0 %2353 }
 0x625   : > { %2265 = vst.msk [vmem:[#allocation3] sm:$0xff] %vm2264_vm11, %v2262_v26  ;;  %vm2957_vm11 = vcmask 1022976  }
 0x626   : > { %2357 = vst.msk [vmem:[#allocation3 + $0x8] sm:$0xff] %vm2356_vm12, %v2354_v27  ;;  %vm3043_vm12 = vcmask 1014784  }
 0x628   : > { %v2267_v28 = vpop.permute.xlu1 %2266  ;;  %v2434_v29 = vpop.permute.xlu0 %2433 }
 0x629   : > { %2270 = vst.msk [vmem:[#allocation3] sm:$0xff] %vm2269_vm13, %v2267_v28  ;;  %vm3132_vm13 = vcmask 900096  }
 0x62a   : > { %2437 = vst.msk [vmem:[#allocation3 + $0x8] sm:$0xff] %vm2436_vm14, %v2434_v29  ;;  %vm3310_vm14 = vcmask 883712  }
 0x62b   : > { %2350 = vst.msk [vmem:[#allocation3] sm:$0xff] %vm2349_vm15, %v2347_v25  ;;  %vm3221_vm15 = vcmask 891904  }
 0x62c   : > { %v2609_v30 = vpop.permute.xlu1 %2608  ;;  %v2439_v31 = vpop.permute.xlu0 %2438 }
 0x62d   : > { %2614 = vst.msk [vmem:[#allocation3 + $0x10] sm:$0xff] %vm2613_vm0, %v2609_v30  ;;  %vm3488_vm0 = vcmask 867328  }
 0x62e   : > { %2442 = vst.msk [vmem:[#allocation3 + $0x8] sm:$0xff] %vm2441_vm2, %v2439_v31  ;;  %vm3399_vm2 = vcmask 875520  }
 0x630   : > { %v2519_v32 = vpop.permute.xlu0 %2518  ;;  %v2696_v37 = vpop.permute.xlu1 %2695 }
 0x631   : > { %2522 = vst.msk [vmem:[#allocation3 + $0x8] sm:$0xff] %vm2521_vm3, %v2519_v32  ;;  %vm3666_vm3 = vcmask 744448  }
 0x632   : > { %v7667_v33 = vld [vmem:[#allocation3] sm:$0xff] }
 0x633   : > { %3215 = vrot.lane.b32.xlu1 %v7667_v33, %s8316_s20  ;;  %2709 = vrot.lane.b32.xlu0 %v7667_v33, %s8327_s1  ;;  %s8367_s20 = smov 73   ;;  %s8333_s1 = smov 54  }
 0x634   : > { %v2524_v34 = vpop.permute.xlu0 %2523 }
 0x635   : > { %2527 = vst.msk [vmem:[#allocation3 + $0x8] sm:$0xff] %vm2526_vm4, %v2524_v34  ;;  %vm3577_vm4 = vcmask 752640  }
 0x637   : > { %3393 = vrot.lane.b32.xlu1 %v7667_v33, %s8364_s30  ;;  %2867 = vrot.lane.b32.xlu0 %v7667_v33, %s8325_s21  ;;  %s8340_s21 = smov 72  }
 0x638   : > { %v2604_v35 = vpop.permute.xlu0 %2603 }
 0x639   : > { %2607 = vst.msk [vmem:[#allocation3 + $0x8] sm:$0xff] %vm2606_vm5, %v2604_v35  ;;  %vm3844_vm5 = vcmask 728064  }
 0x63a   : > { %2612 = vst.msk [vmem:[#allocation3 + $0x8] sm:$0xff] %vm2611_vm6, %v2609_v30  ;;  %vm3755_vm6 = vcmask 736256  }
 0x63b   : > { %3571 = vrot.lane.b32.xlu1 %v7667_v33, %s8312_s23  ;;  %2953 = vrot.lane.b32.xlu0 %v7667_v33, %s8318_s18  ;;  %s8366_s23 = smov 88   ;;  %s8368_s18 = smov 108  }
 0x63c   : > { %v2691_v36 = vpop.permute.xlu0 %2690 }
 0x63d   : > { %2694 = vst.msk [vmem:[#allocation3 + $0x10] sm:$0xff] %vm2693_vm7, %v2691_v36  ;;  %vm4022_vm7 = vcmask 605184  }
 0x63e   : > { %2699 = vst.msk [vmem:[#allocation3 + $0x10] sm:$0xff] %vm2698_vm8, %v2696_v37  ;;  %v6896_v37 = vld [vmem:[%s8277_s3 + $0x14] sm:$0xf]  ;;  %vm3933_vm8 = vcmask 719872  }
 0x63f   : > { %3749 = vrot.lane.b32.xlu1 %v7667_v33, %s8320_s29  ;;  %3039 = vrot.lane.b32.xlu0 %v7667_v33, %s8322_s28  ;;  %s8331_s29 = smov 56   ;;  %s8369_s28 = smov 91  }
 0x641   : > { %v2702_v38 = vld [vmem:[#allocation3 + $0x8] sm:$0xff] }
 0x642   : > { %2824 = vmatprep.subr.mxu1 %v2702_v38 }
 0x643   : > { %3927 = vrot.lane.b32.xlu1 %v7667_v33, %s8366_s23  ;;  %3126 = vrot.lane.b32.xlu0 %v7667_v33, %s8323_s27  ;;  %s8372_s27 = smov 125  }
 0x644   : > { %2825 = vmatpush1.msra.mxu1 %v7667_v33 }
 0x645   : > { %6889 = vmatmul.mubr.msk.f32.vlgmr.msra.gmra.mxu1 %vm555_vm1, %v2704_v39  ;;  %v2703_v40 = vld [vmem:[#allocation3 + $0x10] sm:$0xff] }
 0x646   : > { %3028 = vmatprep.mubr.f32.mxu1 %v7288_v0 }
 0x647   : > { %4105 = vrot.lane.b32.xlu1 %v7667_v33, %s8367_s20  ;;  %3304 = vrot.lane.b32.xlu0 %v7667_v33, %s8368_s18 }
 0x64b   : > { %4283 = vrot.lane.b32.xlu1 %v7667_v33, %s8329_s22  ;;  %3482 = vrot.lane.b32.xlu0 %v7667_v33, %s8363_s0  ;;  %s8370_s22 = smov 127  }
 0x64f   : > { %4461 = vrot.lane.b32.xlu1 %v7667_v33, %s8331_s29  ;;  %3660 = vrot.lane.b32.xlu0 %v7667_v33, %s8369_s28  ;;  %s8337_s29 = smov 74  }
 0x653   : > { %4639 = vrot.lane.b32.xlu1 %v7667_v33, %s8333_s1  ;;  %3838 = vrot.lane.b32.xlu0 %v7667_v33, %s8335_s26  ;;  %s8343_s1 = smov 70   ;;  %s8373_s26 = smov 124  }
 0x657   : > { %2711 = vrot.lane.b32.xlu1 %v2702_v38, %s8370_s22  ;;  %4016 = vrot.lane.b32.xlu0 %v7667_v33, %s8337_s29  ;;  %s8376_s29 = smov 53  }
 0x65b   : > { %2869 = vrot.lane.b32.xlu1 %v2702_v38, %s8371_s2  ;;  %4194 = vrot.lane.b32.xlu0 %v7667_v33, %s8340_s21  ;;  %s8378_s21 = smov 92  }
 0x65f   : > { %2955 = vrot.lane.b32.xlu1 %v2702_v38, %s8372_s27  ;;  %4372 = vrot.lane.b32.xlu0 %v7667_v33, %s8343_s1  ;;  %s8381_s1 = smov 71  }
 0x663   : > { %3041 = vrot.lane.b32.xlu1 %v2702_v38, %s8373_s26  ;;  %4550 = vrot.lane.b32.xlu0 %v7667_v33, %s8374_s13  ;;  %s8380_s26 = smov 89  }
 0x667   : > { %3217 = vrot.lane.b32.xlu1 %v2702_v38, %s8375_s14  ;;  %4728 = vrot.lane.b32.xlu0 %v7667_v33, %s8376_s29 }
 0x66b   : > { %3395 = vrot.lane.b32.xlu1 %v2702_v38, %s8364_s30  ;;  %3128 = vrot.lane.b32.xlu0 %v2702_v38, %s8377_s19 }
 0x66f   : > { %3573 = vrot.lane.b32.xlu1 %v2702_v38, %s8378_s21  ;;  %3306 = vrot.lane.b32.xlu0 %v2702_v38, %s8368_s18 }
 0x673   : > { %3751 = vrot.lane.b32.xlu1 %v2702_v38, %s8379_s24  ;;  %3484 = vrot.lane.b32.xlu0 %v2702_v38, %s8363_s0 }
 0x677   : > { %3929 = vrot.lane.b32.xlu1 %v2702_v38, %s8366_s23  ;;  %3662 = vrot.lane.b32.xlu0 %v2702_v38, %s8369_s28 }
 0x67b   : > { %4107 = vrot.lane.b32.xlu1 %v2702_v38, %s8367_s20  ;;  %3840 = vrot.lane.b32.xlu0 %v2702_v38, %s8380_s26 }
 0x67f   : > { %4285 = vrot.lane.b32.xlu1 %v2702_v38, %s8381_s1  ;;  %4018 = vrot.lane.b32.xlu0 %v2702_v38, %s8382_s17 }
 0x683   : > { %4463 = vrot.lane.b32.xlu1 %v2702_v38, %s8383_s11  ;;  %4196 = vrot.lane.b32.xlu0 %v2702_v38, %s8384_s25 }
 0x687   : > { %4641 = vrot.lane.b32.xlu1 %v2702_v38, %s8385_s12  ;;  %4374 = vrot.lane.b32.xlu0 %v2702_v38, %s8386_s10 }
 0x68b   : > { %4819 = vrot.lane.b32.xlu1 %v2702_v38, %s7327_s9  ;;  %4552 = vrot.lane.b32.xlu0 %v2702_v38, %s8374_s13 }
 0x68f   : > { %3130 = vrot.lane.b32.xlu1 %v2703_v40, %s8377_s19  ;;  %4730 = vrot.lane.b32.xlu0 %v2702_v38, %s8376_s29 }
 0x693   : > { %3308 = vrot.lane.b32.xlu1 %v2703_v40, %s8368_s18  ;;  %3219 = vrot.lane.b32.xlu0 %v2703_v40, %s8375_s14  ;;  %s8389_s18 = smov 11  }
 0x697   : > { %3486 = vrot.lane.b32.xlu1 %v2703_v40, %s8363_s0  ;;  %3397 = vrot.lane.b32.xlu0 %v2703_v40, %s8364_s30  ;;  %s8388_s0 = smov 17   ;;  %s7329_s30 = smov 13  }
 0x69b   : > { %3664 = vrot.lane.b32.xlu1 %v2703_v40, %s8369_s28  ;;  %3575 = vrot.lane.b32.xlu0 %v2703_v40, %s8378_s21  ;;  %s7330_s28 = smov 1   ;;  %s7334_s21 = smov 5  }
 0x69f   : > { %3842 = vrot.lane.b32.xlu1 %v2703_v40, %s8380_s26  ;;  %3753 = vrot.lane.b32.xlu0 %v2703_v40, %s8379_s24 }
 0x6a3   : > { %4020 = vrot.lane.b32.xlu1 %v2703_v40, %s8382_s17  ;;  %3931 = vrot.lane.b32.xlu0 %v2703_v40, %s8366_s23  ;;  %s7332_s23 = smov 7  }
 0x6a5   : > { %v7756_v41 = vpop.permute.xlu1 %3215  ;;  %v2710_v42 = vpop.permute.xlu0 %2709 }
 0x6a7   : > { %4198 = vrot.lane.b32.xlu1 %v2703_v40, %s8384_s25  ;;  %4109 = vrot.lane.b32.xlu0 %v2703_v40, %s8367_s20  ;;  %s7331_s20 = smov 9  }
 0x6a9   : > { %v7760_v44 = vpop.permute.xlu1 %3393  ;;  %v2868_v45 = vpop.permute.xlu0 %2867 }
 0x6ab   : > { %4376 = vrot.lane.b32.xlu1 %v2703_v40, %s8386_s10  ;;  %4287 = vrot.lane.b32.xlu0 %v2703_v40, %s8381_s1  ;;  %s8387_s1 = smov 15  }
 0x6ad   : > { %v7764_v46 = vpop.permute.xlu1 %3571  ;;  %v2954_v47 = vpop.permute.xlu0 %2953 }
 0x6af   : > { %4554 = vrot.lane.b32.xlu1 %v2703_v40, %s8374_s13  ;;  %4465 = vrot.lane.b32.xlu0 %v2703_v40, %s8383_s11 }
 0x6b1   : > { %v7768_v49 = vpop.permute.xlu1 %3749  ;;  %v3040_v50 = vpop.permute.xlu0 %3039 }
 0x6b3   : > { %4732 = vrot.lane.b32.xlu1 %v2703_v40, %s8376_s29  ;;  %4643 = vrot.lane.b32.xlu0 %v2703_v40, %s8385_s12  ;;  %s7333_s29 = smov 3  }
 0x6b5   : > { %v7772_v51 = vpop.permute.xlu1 %3927  ;;  %v7774_v52 = vpop.permute.xlu0 %3126 }
 0x6b7   : > { %4817 = vrot.lane.b32.xlu1 %v7667_v33, %s7327_s9  ;;  %4821 = vrot.lane.b32.xlu0 %v2703_v40, %s7327_s9 }
 0x6b9   : > { %v7779_v43 = vpop.permute.xlu1 %4105  ;;  %v7784_v54 = vpop.permute.xlu0 %3304 }
 0x6bb   : > { %4907 = vperm.xlu0 %7265, %v4904_v53  }
 0x6bd   : > { %v7786_v55 = vpop.permute.xlu1 %4283  ;;  %v7788_v56 = vpop.permute.xlu0 %3482 }
 0x6c1   : > { %v7790_v57 = vpop.permute.xlu1 %4461  ;;  %v7792_v58 = vpop.permute.xlu0 %3660 }
 0x6c5   : > { %v7794_v59 = vpop.permute.xlu1 %4639  ;;  %v7796_v60 = vpop.permute.xlu0 %3838 }
 0x6c9   : > { %v2712_v9 = vpop.permute.xlu1 %2711  ;;  %v7801_v62 = vpop.permute.xlu0 %4016 }
 0x6ca   : > { %2750 = vmatprep.subr.mxu0 %v2712_v9  ;;  %v2714_v63 = vsel %vm2713_vm9, %v2710_v42, %v2712_v9 }
 0x6cb   : > { %2751 = vmatpush1.msra.mxu0 %v2714_v63 }
 0x6cc   : > { %6888 = vmatmul.mubr.msk.f32.vlgmr.msra.gmra.mxu0 %vm555_vm1, %v6887_v61  ;;  %v6904_v61 = vld [vmem:[%s8277_s3 + $0x24] sm:$0xf] }
 0x6cd   : > { %v2870_v1 = vpop.permute.xlu1 %2869  ;;  %2942 = vmatprep.mubr.f32.mxu0 %v7288_v0  ;;  %v7809_v3 = vpop.permute.xlu0 %4194 }
 0x6ce   : > { %2908 = vmatprep.subr.mxu0 %v2870_v1  ;;  %v2872_v4 = vsel %vm2871_vm10, %v2868_v45, %v2870_v1  ;;  %v6900_v45 = vld [vmem:[%s8277_s3 + $0x1c] sm:$0xf]  ;;  %v6902_v1 = vld [vmem:[%s8277_s3 + $0x20] sm:$0xf] }
 0x6cf   : > { %2909 = vmatpush1.msra.mxu0 %v2872_v4 }
 0x6d0   : > { %6891 = vmatmul.mubr.msk.f32.vlgmr.msra.gmra.mxu0 %vm555_vm1, %v6890_v2 }
 0x6d1   : > { %v2956_v5 = vpop.permute.xlu1 %2955  ;;  %3114 = vmatprep.mubr.f32.mxu0 %v7816_v7  ;;  %v7819_v0 = vpop.permute.xlu0 %4372 }
 0x6d2   : > { %2994 = vmatprep.subr.mxu1 %v2956_v5  ;;  %v2958_v8 = vsel %vm2957_vm11, %v2954_v47, %v2956_v5  ;;  %vm4200_vm11 = vcmask 588800  }
 0x6d3   : > { %2995 = vmatpush1.msra.mxu1 %v2958_v8 }
 0x6d4   : > { %6893 = vmatmul.mubr.msk.f32.vlgmr.msra.gmra.mxu1 %vm555_vm1, %v6892_v6  ;;  %v6908_v6 = vld [vmem:[%s8277_s3 + $0x2c] sm:$0xf] }
 0x6d5   : > { %v3042_v10 = vpop.permute.xlu1 %3041  ;;  %3204 = vmatprep.mubr.f32.mxu1 %v7816_v7  ;;  %v7826_v12 = vpop.permute.xlu0 %4550 }
 0x6d6   : > { %3080 = vmatprep.subr.mxu0 %v3042_v10  ;;  %v3044_v13 = vsel %vm3043_vm12, %v3040_v50, %v3042_v10  ;;  %v6898_v50 = vld [vmem:[%s8277_s3 + $0x18] sm:$0xf]  ;;  %v6906_v10 = vld [vmem:[%s8277_s3 + $0x28] sm:$0xf]  ;;  %vm4111_vm12 = vcmask 596992  }
 0x6d7   : > { %3081 = vmatpush1.msra.mxu0 %v3044_v13 }
 0x6d8   : > { %6895 = vmatmul.mubr.msk.f32.vlgmr.msra.gmra.mxu0 %vm555_vm1, %v6894_v11 }
 0x6d9   : > { %v3218_v14 = vpop.permute.xlu1 %3217  ;;  %3293 = vmatprep.mubr.f32.mxu0 %v7816_v7  ;;  %v7830_v15 = vpop.permute.xlu0 %4728 }
 0x6dd   : > { %v3396_v16 = vpop.permute.xlu1 %3395  ;;  %v3129_v17 = vpop.permute.xlu0 %3128 }
 0x6de   : > { %v3133_v38 = vsel %vm3132_vm13, %v7774_v52, %v3129_v17  ;;  %v3222_v52 = vsel %vm3221_vm15, %v7756_v41, %v3218_v14  ;;  %v3400_v2 = vsel %vm3399_vm2, %v7760_v44, %v3396_v16 }
 0x6e1   : > { %v7832_v18 = vpop.permute.xlu1 %3573  ;;  %v3307_v19 = vpop.permute.xlu0 %3306 }
 0x6e2   : > { %v3311_v47 = vsel %vm3310_vm14, %v7784_v54, %v3307_v19  ;;  %v3578_v11 = vsel %vm3577_vm4, %v7764_v46, %v7832_v18 }
 0x6e5   : > { %v7834_v20 = vpop.permute.xlu1 %3751  ;;  %v3485_v21 = vpop.permute.xlu0 %3484 }
 0x6e6   : > { %v3489_v41 = vsel %vm3488_vm0, %v7788_v56, %v3485_v21 }
 0x6e9   : > { %v7836_v22 = vpop.permute.xlu1 %3929  ;;  %v7838_v23 = vpop.permute.xlu0 %3662 }
 0x6ea   : > { %v3667_v44 = vsel %vm3666_vm3, %v7792_v58, %v7838_v23 }
 0x6ed   : > { %v7840_v24 = vpop.permute.xlu1 %4107  ;;  %v7842_v25 = vpop.permute.xlu0 %3840 }
 0x6ee   : > { %v3845_v46 = vsel %vm3844_vm5, %v7796_v60, %v7842_v25 }
 0x6f1   : > { %v7844_v26 = vpop.permute.xlu1 %4285  ;;  %v7846_v27 = vpop.permute.xlu0 %4018 }
 0x6f5   : > { %v7848_v28 = vpop.permute.xlu1 %4463  ;;  %v7850_v29 = vpop.permute.xlu0 %4196 }
 0x6f9   : > { %v7852_v30 = vpop.permute.xlu1 %4641  ;;  %v7854_v31 = vpop.permute.xlu0 %4374 }
 0x6fd   : > { %v7856_v32 = vpop.permute.xlu1 %4819  ;;  %v7858_v33 = vpop.permute.xlu0 %4552 }
 0x701   : > { %v3131_v34 = vpop.permute.xlu1 %3130  ;;  %v7860_v35 = vpop.permute.xlu0 %4730 }
 0x702   : > { %v3134_v36 = vsel %vm3132_vm13, %v3129_v17, %v3131_v34  ;;  %v6914_v34 = vld [vmem:[%s8277_s3 + $0x38] sm:$0xf] }
 0x703   : > { %3170 = vmatprep.subr.mxu1 %v3134_v36  ;;  %v3934_v36 = vsel %vm3933_vm8, %v7772_v51, %v7836_v22  ;;  %v4201_v51 = vsel %vm4200_vm11, %v7809_v3, %v7850_v29 }
 0x704   : > { %3171 = vmatpush1.msra.mxu1 %v3133_v38  ;;  %v6920_v38 = vld [vmem:[%s8277_s3 + $0x44] sm:$0xf] }
 0x705   : > { %v3309_v39 = vpop.permute.xlu1 %3308  ;;  %6897 = vmatmul.mubr.msk.f32.vlgmr.msra.gmra.mxu1 %vm555_vm1, %v6896_v37  ;;  %v3220_v40 = vpop.permute.xlu0 %3219 }
 0x706   : > { %v3312_v42 = vsel %vm3310_vm14, %v3307_v19, %v3309_v39  ;;  %3382 = vmatprep.mubr.f32.mxu1 %v7816_v7  ;;  %v3223_v48 = vsel %vm3221_vm15, %v3218_v14, %v3220_v40  ;;  %v3756_v19 = vsel %vm3755_vm6, %v7768_v49, %v7834_v20  ;;  %v4023_v49 = vsel %vm4022_vm7, %v7801_v62, %v7846_v27  ;;  %v6918_v39 = vld [vmem:[%s8277_s3 + $0x40] sm:$0xf] }
 0x707   : > { %3348 = vmatprep.subr.mxu1 %v3312_v42  ;;  %3259 = vmatprep.subr.mxu0 %v3223_v48  ;;  %v4112_v40 = vsel %vm4111_vm12, %v7779_v43, %v7840_v24  ;;  %vm4378_vm14 = vcmask 572416   ;;  %vm4289_vm15 = vcmask 580608  }
 0x708   : > { %3349 = vmatpush1.msra.mxu1 %v3311_v47  ;;  %3260 = vmatpush1.msra.mxu0 %v3222_v52  ;;  %v4379_v43 = vsel %vm4378_vm14, %v7819_v0, %v7854_v31  ;;  %v6922_v47 = vld [vmem:[%s8277_s3 + $0x48] sm:$0xf]  ;;  %v4290_v48 = vsel %vm4289_vm15, %v7786_v55, %v7844_v26  ;;  %v6928_v52 = vld [vmem:[%s8277_s3 + $0x54] sm:$0xf] }
 0x709   : > { %v3487_v53 = vpop.permute.xlu1 %3486  ;;  %6901 = vmatmul.mubr.msk.f32.vlgmr.msra.gmra.mxu1 %vm555_vm1, %v6900_v45  ;;  %6899 = vmatmul.mubr.msk.f32.vlgmr.msra.gmra.mxu0 %vm555_vm1, %v6898_v50  ;;  %v3398_v9 = vpop.permute.xlu0 %3397  ;;  %v6924_v45 = vld [vmem:[%s8277_s3 + $0x4c] sm:$0xf] }
 0x70a   : > { %v3490_v54 = vsel %vm3488_vm0, %v3485_v21, %v3487_v53  ;;  %3560 = vmatprep.mubr.f32.mxu1 %v7816_v7  ;;  %v3401_v63 = vsel %vm3399_vm2, %v3396_v16, %v3398_v9  ;;  %3471 = vmatprep.mubr.f32.mxu0 %v7816_v7  ;;  %v6912_v16 = vld [vmem:[%s8277_s3 + $0x34] sm:$0xf]  ;;  %vm4556_vm0 = vcmask 449536   ;;  %vm4467_vm2 = vcmask 457728   ;;  %v6926_v53 = vld [vmem:[%s8277_s3 + $0x50] sm:$0xf] }
 0x70b   : > { %3526 = vmatprep.subr.mxu1 %v3490_v54  ;;  %3437 = vmatprep.subr.mxu0 %v3401_v63  ;;  %v4557_v55 = vsel %vm4556_vm0, %v7826_v12, %v7858_v33  ;;  %v4468_v9 = vsel %vm4467_vm2, %v7790_v57, %v7848_v28 }
 0x70c   : > { %3527 = vmatpush1.msra.mxu1 %v3489_v41  ;;  %3438 = vmatpush1.msra.mxu0 %v3400_v2  ;;  %v6930_v41 = vld [vmem:[%s8277_s3 + $0x58] sm:$0xf] }
 0x70d   : > { %v3665_v4 = vpop.permute.xlu1 %3664  ;;  %6905 = vmatmul.mubr.msk.f32.vlgmr.msra.gmra.mxu1 %vm555_vm1, %v6904_v61  ;;  %6903 = vmatmul.mubr.msk.f32.vlgmr.msra.gmra.mxu0 %vm555_vm1, %v6902_v1  ;;  %v3576_v56 = vpop.permute.xlu0 %3575  ;;  %v6932_v61 = vld [vmem:[%s8277_s3 + $0x5c] sm:$0xf] }
 0x70e   : > { %v3668_v5 = vsel %vm3666_vm3, %v7838_v23, %v3665_v4  ;;  %3738 = vmatprep.mubr.f32.mxu1 %v7816_v7  ;;  %v3579_v8 = vsel %vm3577_vm4, %v7832_v18, %v3576_v56  ;;  %3649 = vmatprep.mubr.f32.mxu0 %v7816_v7  ;;  %v6910_v18 = vld [vmem:[%s8277_s3 + $0x30] sm:$0xf]  ;;  %vm4734_vm3 = vcmask 433152   ;;  %vm4645_vm4 = vcmask 441344   ;;  %v2860_v56 = vpop.f32.mrf.mxu1 }
 0x70f   : > { %3704 = vmatprep.subr.mxu1 %v3668_v5  ;;  %3615 = vmatprep.subr.mxu0 %v3579_v8  ;;  %v4735_v57 = vsel %vm4734_vm3, %v7830_v15, %v7860_v35  ;;  %v4646_v63 = vsel %vm4645_vm4, %v7794_v59, %v7852_v30  ;;  %v6934_v59 = vld [vmem:[%s8277_s3 + $0x60] sm:$0xf] }
 0x710   : > { %3705 = vmatpush1.msra.mxu1 %v3667_v44  ;;  %3616 = vmatpush1.msra.mxu0 %v3578_v11 }
 0x711   : > { %v3843_v13 = vpop.permute.xlu1 %3842  ;;  %6909 = vmatmul.mubr.msk.f32.vlgmr.msra.gmra.mxu1 %vm555_vm1, %v6908_v6  ;;  %6907 = vmatmul.mubr.msk.f32.vlgmr.msra.gmra.mxu0 %vm555_vm1, %v6906_v10  ;;  %v3754_v58 = vpop.permute.xlu0 %3753 }
 0x712   : > { %v3846_v14 = vsel %vm3844_vm5, %v7842_v25, %v3843_v13  ;;  %3916 = vmatprep.mubr.f32.mxu1 %v7816_v7  ;;  %v3757_v17 = vsel %vm3755_vm6, %v7834_v20, %v3754_v58  ;;  %3827 = vmatprep.mubr.f32.mxu0 %v7816_v7  ;;  %v6916_v25 = vld [vmem:[%s8277_s3 + $0x3c] sm:$0xf]  ;;  %vm4823_vm5 = vcmask 424960   ;;  %v2862_v6 = vpop.f32.mrf.mxu1  ;;  %vm4927_vm6 = vcmask 977920  }
 0x713   : > { %3882 = vmatprep.subr.mxu1 %v3846_v14  ;;  %3793 = vmatprep.subr.mxu0 %v3757_v17 }
 0x714   : > { %3883 = vmatpush1.msra.mxu1 %v3845_v46  ;;  %3794 = vmatpush1.msra.mxu0 %v3756_v19 }
 0x715   : > { %v4021_v21 = vpop.permute.xlu1 %4020  ;;  %6913 = vmatmul.mubr.msk.f32.vlgmr.msra.gmra.mxu1 %vm555_vm1, %v6912_v16  ;;  %6911 = vmatmul.mubr.msk.f32.vlgmr.msra.gmra.mxu0 %vm555_vm1, %v6910_v18  ;;  %v3932_v60 = vpop.permute.xlu0 %3931 }
 0x716   : > { %v4024_v23 = vsel %vm4022_vm7, %v7846_v27, %v4021_v21  ;;  %4094 = vmatprep.mubr.f32.mxu1 %v7816_v7  ;;  %v3935_v20 = vsel %vm3933_vm8, %v7836_v22, %v3932_v60  ;;  %4005 = vmatprep.mubr.f32.mxu0 %v7816_v7 }
 0x717   : > { %4060 = vmatprep.subr.mxu1 %v4024_v23  ;;  %3971 = vmatprep.subr.mxu0 %v3935_v20 }
 0x718   : > { %4061 = vmatpush1.msra.mxu1 %v4023_v49  ;;  %3972 = vmatpush1.msra.mxu0 %v3934_v36 }
 0x719   : > { %v4199_v37 = vpop.permute.xlu1 %4198  ;;  %6917 = vmatmul.mubr.msk.f32.vlgmr.msra.gmra.mxu1 %vm555_vm1, %v6916_v25  ;;  %6915 = vmatmul.mubr.msk.f32.vlgmr.msra.gmra.mxu0 %vm555_vm1, %v6914_v34  ;;  %v4110_v62 = vpop.permute.xlu0 %4109 }
 0x71a   : > { %v4202_v27 = vsel %vm4200_vm11, %v7850_v29, %v4199_v37  ;;  %4272 = vmatprep.mubr.f32.mxu1 %v7816_v7  ;;  %v4113_v22 = vsel %vm4111_vm12, %v7840_v24, %v4110_v62  ;;  %4183 = vmatprep.mubr.f32.mxu0 %v7816_v7  ;;  %vm5004_vm11 = vcmask 248968   ;;  %vm5009_vm12 = vcmask 380168  }
 0x71b   : > { %4238 = vmatprep.subr.mxu1 %v4202_v27  ;;  %4149 = vmatprep.subr.mxu0 %v4113_v22 }
 0x71c   : > { %4239 = vmatpush1.msra.mxu1 %v4201_v51  ;;  %4150 = vmatpush1.msra.mxu0 %v4112_v40 }
 0x71d   : > { %v4377_v42 = vpop.permute.xlu1 %4376  ;;  %6921 = vmatmul.mubr.msk.f32.vlgmr.msra.gmra.mxu1 %vm555_vm1, %v6920_v38  ;;  %6919 = vmatmul.mubr.msk.f32.vlgmr.msra.gmra.mxu0 %vm555_vm1, %v6918_v39  ;;  %v4288_v3 = vpop.permute.xlu0 %4287 }
 0x71e   : > { %v4380_v29 = vsel %vm4378_vm14, %v7854_v31, %v4377_v42  ;;  %4450 = vmatprep.mubr.f32.mxu1 %v7816_v7  ;;  %v4291_v24 = vsel %vm4289_vm15, %v7844_v26, %v4288_v3  ;;  %4361 = vmatprep.mubr.f32.mxu0 %v7816_v7  ;;  %vm5014_vm14 = vcmask 511368   ;;  %vm5019_vm15 = vcmask 642568  }
 0x71f   : > { %4416 = vmatprep.subr.mxu1 %v4380_v29  ;;  %4327 = vmatprep.subr.mxu0 %v4291_v24 }
 0x720   : > { %4417 = vmatpush1.msra.mxu1 %v4379_v43  ;;  %4328 = vmatpush1.msra.mxu0 %v4290_v48 }
 0x721   : > { %v4555_v50 = vpop.permute.xlu1 %4554  ;;  %6925 = vmatmul.mubr.msk.f32.vlgmr.msra.gmra.mxu1 %vm555_vm1, %v6924_v45  ;;  %6923 = vmatmul.mubr.msk.f32.vlgmr.msra.gmra.mxu0 %vm555_vm1, %v6922_v47  ;;  %v4466_v0 = vpop.permute.xlu0 %4465 }
 0x722   : > { %v4558_v31 = vsel %vm4556_vm0, %v7858_v33, %v4555_v50  ;;  %4628 = vmatprep.mubr.f32.mxu1 %v7816_v7  ;;  %v4469_v26 = vsel %vm4467_vm2, %v7848_v28, %v4466_v0  ;;  %4539 = vmatprep.mubr.f32.mxu0 %v7816_v7  ;;  %vm5024_vm0 = vcmask 773768   ;;  %vm5029_vm2 = vcmask 904968  }
 0x723   : > { %4594 = vmatprep.subr.mxu1 %v4558_v31  ;;  %4505 = vmatprep.subr.mxu0 %v4469_v26 }
 0x724   : > { %4595 = vmatpush1.msra.mxu1 %v4557_v55  ;;  %4506 = vmatpush1.msra.mxu0 %v4468_v9 }
 0x725   : > { %v4733_v54 = vpop.permute.xlu1 %4732  ;;  %6929 = vmatmul.mubr.msk.f32.vlgmr.msra.gmra.mxu1 %vm555_vm1, %v6928_v52  ;;  %6927 = vmatmul.mubr.msk.f32.vlgmr.msra.gmra.mxu0 %vm555_vm1, %v6926_v53  ;;  %v4644_v12 = vpop.permute.xlu0 %4643 }
 0x726   : > { %v4736_v33 = vsel %vm4734_vm3, %v7860_v35, %v4733_v54  ;;  %4806 = vmatprep.mubr.f32.mxu1 %v7816_v7  ;;  %v4647_v28 = vsel %vm4645_vm4, %v7852_v30, %v4644_v12  ;;  %4717 = vmatprep.mubr.f32.mxu0 %v7816_v7  ;;  %vm5041_vm3 = vcmask 23552   ;;  %vm5044_vm4 = vcmask 117768  }
 0x727   : > { %4772 = vmatprep.subr.mxu1 %v4736_v33  ;;  %4683 = vmatprep.subr.mxu0 %v4647_v28 }
 0x728   : > { %4773 = vmatpush1.msra.mxu1 %v4735_v57  ;;  %4684 = vmatpush1.msra.mxu0 %v4646_v63 }
 0x729   : > { %v4818_v1 = vpop.permute.xlu1 %4817  ;;  %6933 = vmatmul.mubr.msk.f32.vlgmr.msra.gmra.mxu1 %vm555_vm1, %v6932_v61  ;;  %6931 = vmatmul.mubr.msk.f32.vlgmr.msra.gmra.mxu0 %vm555_vm1, %v6930_v41  ;;  %v4822_v35 = vpop.permute.xlu0 %4821 }
 0x72a   : > { %v4824_v15 = vsel %vm4823_vm5, %v4818_v1, %v7856_v32  ;;  %5154 = vmatprep.mubr.f32.mxu1 %v7816_v7  ;;  %v4825_v2 = vsel %vm4823_vm5, %v7856_v32, %v4822_v35  ;;  %4895 = vmatprep.mubr.f32.mxu0 %v7816_v7  ;;  %vm5034_vm5 = vcmask 1036168  }
 0x72b   : > { %4861 = vmatprep.subr.mxu0 %v4825_v2 }
 0x72c   : > { %4862 = vmatpush1.msra.mxu0 %v4824_v15 }
 0x72d   : > { %6935 = vmatmul.mubr.msk.f32.vlgmr.msra.gmra.mxu0 %vm555_vm1, %v6934_v59  ;;  %vm4925_vm1 = vcmask 1043456  }
 0x72e   : > { %5232 = vmatprep.mubr.f32.mxu0 %v7816_v7 }
 0x78c   : > { %v2786_v30 = vpop.f32.mrf.mxu0 }
 0x78d   : > { %v2861_v5 = vadd.f32 %v2860_v56, %v2786_v30 }
 0x78e   : > { %v2788_v4 = vpop.f32.mrf.mxu0 }
 0x78f   : > { %v2863_v8 = vadd.f32 %v2862_v6, %v2788_v4 }
 0x790   : > { %v2944_v44 = vpop.f32.mrf.mxu0 }
 0x791   : > { %v2949_v32 = vadd.f32 %v2944_v44, %v2861_v5 }
 0x792   : > { %v2946_v10 = vpop.f32.mrf.mxu0 }
 0x793   : > { %v2950_v13 = vadd.f32 %v2946_v10, %v2863_v8 }
 0x794   : > { %v3030_v11 = vpop.f32.mrf.mxu1 }
 0x795   : > { %v3035_v58 = vadd.f32 %v3030_v11, %v2949_v32 }
 0x796   : > { %v3032_v14 = vpop.f32.mrf.mxu1 }
 0x797   : > { %v3036_v46 = vadd.f32 %v3032_v14, %v2950_v13 }
 0x798   : > { %v3116_v16 = vpop.f32.mrf.mxu0 }
 0x799   : > { %v3121_v17 = vadd.f32 %v3116_v16, %v3035_v58  ;;  %v4913_v58 = vlaneseq }
 0x79a   : > { %v3118_v19 = vpop.f32.mrf.mxu0 }
 0x79b   : > { %v3122_v60 = vadd.f32 %v3118_v19, %v3036_v46 }
 0x7c5   : > { %v3206_v18 = vpop.f32.mrf.mxu1 }
 0x7c6   : > { %v3211_v23 = vadd.f32 %v3206_v18, %v3121_v17 }
 0x7c7   : > { %v3208_v21 = vpop.f32.mrf.mxu1 }
 0x7c8   : > { %v3212_v20 = vadd.f32 %v3208_v21, %v3122_v60 }
 0x7c9   : > { %v3384_v25 = vpop.f32.mrf.mxu1  ;;  %v3295_v49 = vpop.f32.mrf.mxu0 }
 0x7ca   : > { %v3300_v34 = vadd.f32 %v3295_v49, %v3211_v23  ;;  %v8013_v23 = vshrl.u32 %v4913_v58, 7 }
 0x7cb   : > { %v3386_v36 = vpop.f32.mrf.mxu1  ;;  %v3297_v37 = vpop.f32.mrf.mxu0 }
 0x7cc   : > { %v3389_v62 = vadd.f32 %v3384_v25, %v3300_v34  ;;  %v3301_v27 = vadd.f32 %v3297_v37, %v3212_v20 }
 0x7cd   : > { %v3562_v38 = vpop.f32.mrf.mxu1  ;;  %v3473_v51 = vpop.f32.mrf.mxu0 }
 0x7ce   : > { %v3390_v22 = vadd.f32 %v3386_v36, %v3301_v27  ;;  %v3478_v39 = vadd.f32 %v3473_v51, %v3389_v62  ;;  %v4915_v27 = vsub.s32 0, %v8013_v23  ;;  %v2700_v51 = vld [vmem:[%s8289_s15] sm:$0x3] }
 0x7cf   : > { %v3564_v40 = vpop.f32.mrf.mxu1  ;;  %v3475_v42 = vpop.f32.mrf.mxu0 }
 0x7d0   : > { %v3567_v3 = vadd.f32 %v3562_v38, %v3478_v39  ;;  %v3479_v29 = vadd.f32 %v3475_v42, %v3390_v22  ;;  %v4908_v42 = vpop.permute.xlu0 %4907 }
 0x7d1   : > { %v3740_v45 = vpop.f32.mrf.mxu1  ;;  %v3651_v43 = vpop.f32.mrf.mxu0 }
 0x7d2   : > { %v3568_v24 = vadd.f32 %v3564_v40, %v3479_v29  ;;  %v3656_v47 = vadd.f32 %v3651_v43, %v3567_v3  ;;  %v4919_v40 = vsub.s32 1, %v8013_v23 }
 0x7d3   : > { %v3742_v48 = vpop.f32.mrf.mxu1  ;;  %v3653_v50 = vpop.f32.mrf.mxu0 }
 0x7d4   : > { %v3745_v0 = vadd.f32 %v3740_v45, %v3656_v47  ;;  %v3657_v31 = vadd.f32 %v3653_v50, %v3568_v24  ;;  %v4916_v24 = vrot.slane %v2700_v51, %v4915_v27  ;;  %v4920_v50 = vrot.slane %v2700_v51, %v4919_v40 }
 0x7d5   : > { %v3918_v52 = vpop.f32.mrf.mxu1  ;;  %v3829_v55 = vpop.f32.mrf.mxu0 }
 0x7d6   : > { %v3746_v26 = vadd.f32 %v3742_v48, %v3657_v31  ;;  %v3834_v53 = vadd.f32 %v3829_v55, %v3745_v0 }
 0x7d7   : > { %v3920_v9 = vpop.f32.mrf.mxu1  ;;  %v3831_v54 = vpop.f32.mrf.mxu0 }
 0x7d8   : > { %v3923_v12 = vadd.f32 %v3918_v52, %v3834_v53  ;;  %v3835_v33 = vadd.f32 %v3831_v54, %v3746_v26 }
 0x7d9   : > { %v4096_v61 = vpop.f32.mrf.mxu1  ;;  %v4007_v57 = vpop.f32.mrf.mxu0 }
 0x7da   : > { %v3924_v28 = vadd.f32 %v3920_v9, %v3835_v33  ;;  %v4012_v41 = vadd.f32 %v4007_v57, %v3923_v12 }
 0x7db   : > { %v4098_v63 = vpop.f32.mrf.mxu1  ;;  %v4009_v1 = vpop.f32.mrf.mxu0 }
 0x7dc   : > { %v4101_v15 = vadd.f32 %v4096_v61, %v4012_v41  ;;  %v4013_v35 = vadd.f32 %v4009_v1, %v3924_v28  ;;  %v4989_v28 = vld [vmem:[%s8280_s6] sm:$0xf] }
 0x7dd   : > { %v4274_v2 = vpop.f32.mrf.mxu1  ;;  %v4185_v59 = vpop.f32.mrf.mxu0  ;;  %v4981_v41 = vld [vmem:[%s8279_s5] sm:$0xf] }
 0x7de   : > { %v4102_v30 = vadd.f32 %v4098_v63, %v4013_v35  ;;  %v4190_v4 = vadd.f32 %v4185_v59, %v4101_v15 }
 0x7df   : > { %v4276_v56 = vpop.f32.mrf.mxu1  ;;  %v4187_v5 = vpop.f32.mrf.mxu0 }
 0x7e0   : > { %v4279_v6 = vadd.f32 %v4274_v2, %v4190_v4  ;;  %v4191_v44 = vadd.f32 %v4187_v5, %v4102_v30 }
 0x7e1   : > { %v4452_v8 = vpop.f32.mrf.mxu1  ;;  %v4363_v32 = vpop.f32.mrf.mxu0 }
 0x7e2   : > { %v4280_v10 = vadd.f32 %v4276_v56, %v4191_v44  ;;  %v4368_v11 = vadd.f32 %v4363_v32, %v4279_v6 }
 0x7e3   : > { %v4454_v13 = vpop.f32.mrf.mxu1  ;;  %v4365_v14 = vpop.f32.mrf.mxu0 }
 0x7e4   : > { %v4457_v16 = vadd.f32 %v4452_v8, %v4368_v11  ;;  %v4369_v46 = vadd.f32 %v4365_v14, %v4280_v10 }
 0x7e5   : > { %v4630_v17 = vpop.f32.mrf.mxu1  ;;  %v4541_v18 = vpop.f32.mrf.mxu0 }
 0x7e6   : > { %v4458_v19 = vadd.f32 %v4454_v13, %v4369_v46  ;;  %v4546_v21 = vadd.f32 %v4541_v18, %v4457_v16 }
 0x7e7   : > { %v4632_v60 = vpop.f32.mrf.mxu1  ;;  %v4543_v25 = vpop.f32.mrf.mxu0 }
 0x7e8   : > { %v4635_v49 = vadd.f32 %v4630_v17, %v4546_v21  ;;  %v4547_v20 = vadd.f32 %v4543_v25, %v4458_v19 }
 0x7e9   : > { %v4719_v34 = vpop.f32.mrf.mxu0  ;;  %v4808_v36 = vpop.f32.mrf.mxu1 }
 0x7ea   : > { %v4636_v37 = vadd.f32 %v4632_v60, %v4547_v20  ;;  %v4724_v62 = vadd.f32 %v4719_v34, %v4635_v49 }
 0x7eb   : > { %v4721_v38 = vpop.f32.mrf.mxu0  ;;  %v4810_v3 = vpop.f32.mrf.mxu1 }
 0x7ec   : > { %v4813_v22 = vadd.f32 %v4808_v36, %v4724_v62  ;;  %v4725_v39 = vadd.f32 %v4721_v38, %v4636_v37 }
 0x7ed   : > { %v4897_v29 = vpop.f32.mrf.mxu0 }
 0x7ee   : > { %v4814_v45 = vadd.f32 %v4810_v3, %v4725_v39  ;;  %v4902_v43 = vadd.f32 %v4897_v29, %v4813_v22 }
 0x7ef   : > { %v4899_v47 = vpop.f32.mrf.mxu0 }
 0x7f0   : > { %v4903_v48 = vadd.f32 %v4899_v47, %v4814_v45  ;;  %v4910_v0 = vadd.f32 %v4908_v42, %v4902_v43 }
 0x7f2   : > { %v4911_v31 = vadd.f32 %v4908_v42, %v4903_v48  ;;  %v4923_v52 = vmul.f32 %v4916_v24, %v4910_v0 }
 0x7f4   : > { %v4924_v55 = vmul.f32 %v4920_v50, %v4911_v31  ;;  %v4939_v26 = vmul.f32 %v4923_v52, %v4910_v0  ;;  %v4926_v9 = vsel %vm4925_vm1, %v4923_v52, 0.0 }
 0x7f6   : > { %v4940_v53 = vmul.f32 %v4924_v55, %v4911_v31  ;;  %v4928_v54 = vsel %vm4927_vm6, %v4924_v55, 0.0  ;;  %v4941_v33 = vsel %vm4925_vm1, %v4939_v26, 0.0 }
 0x7f7   : > { %v4929_v12 = vadd.f32 %v4928_v54, %v4926_v9 }
 0x7f8   : > { %v4942_v61 = vsel %vm4927_vm6, %v4940_v53, 0.0  ;;  %vm5082_vm6 = vcmask 31744  }
 0x7f9   : > { %4930 = vadd.xlane.f32.xlu1 %v4929_v12  ;;  %v4943_v57 = vadd.f32 %v4942_v61, %v4941_v33  ;;  %v5072_v33 = vld [vmem:[%s8281_s7] sm:$0xf] }
 0x7fa   : > { %v5853_v61 = vld [vmem:[%s8282_s8] sm:$0xf] }
 0x7fb   : > { %4944 = vadd.xlane.f32.xlu0 %v4943_v57 }
 0x80a   : > { %4984 = vperm.xlu1 %7266, %v4981_v41   ;;  %v6936_v41 = vld [vmem:[%s8281_s7 + $0x4] sm:$0xf] }
 0x811   : > { %4992 = vperm.xlu0 %7265, %v4989_v28  }
 0x882   : > { %v4931_v63 = vpop.xlane.xlu1 %4930 }
 0x883   : > { %v4932_v1 = vrot.slane %v4931_v63, 4 }
 0x884   : > { %v4945_v15 = vpop.xlane.xlu0 %4944 }
 0x885   : > { %v4933_v35 = vadd.f32 %v4932_v1, %v4931_v63  ;;  %v4946_v2 = vrot.slane %v4945_v15, 4 }
 0x886   : > { %v4985_v25 = vpop.permute.xlu1 %4984 }
 0x887   : > { %v4934_v59 = vrot.slane %v4933_v35, 2  ;;  %v4947_v30 = vadd.f32 %v4946_v2, %v4945_v15 }
 0x889   : > { %v4948_v4 = vrot.slane %v4947_v30, 2  ;;  %v4935_v56 = vadd.f32 %v4934_v59, %v4933_v35  ;;  %v6943_v35 = vld [vmem:[%s8281_s7 + $0x8] sm:$0xf] }
 0x88b   : > { %v4936_v5 = vrot.slane %v4935_v56, 1  ;;  %v4949_v6 = vadd.f32 %v4948_v4, %v4947_v30  ;;  %v6947_v4 = vld [vmem:[%s8281_s7 + $0xc] sm:$0xf] }
 0x88c   : > { %v4993_v37 = vpop.permute.xlu0 %4992 }
 0x88d   : > { %v4937_v44 = vadd.f32 %v4936_v5, %v4935_v56  ;;  %v4950_v8 = vrot.slane %v4949_v6, 1 }
 0x88f   : > { %7194 = vpush %v4937_v44  ;;  %v4951_v32 = vadd.f32 %v4950_v8, %v4949_v6  ;;  %v6951_v44 = vld [vmem:[%s8281_s7 + $0x10] sm:$0xf]  ;;  %v8101_v8 = vld [vmem:[#allocation5] sm:$0xff] }
 0x891   : > { %7196 = vpush %v4951_v32 }
 0x8c0   : > { %s7195_s26 = spop %7194 }
 0x8c1   : > { %s4955_s10 = smul.f32 0.0012755102, %s7195_s26  ;;  %s7335_s26 = smov 123  }
 0x8c2   : > { %s7197_s12 = spop %7196 }
 0x8c3   : > { %s4956_s11 = smul.f32 784.0, %s4955_s10  ;;  %v4975_v18 = vstv %s4955_s10 }
 0x8c4   : > { %v4976_v19 = vsub.f32 %v4910_v0, %v4975_v18  ;;  %v4977_v21 = vsub.f32 %v4911_v31, %v4975_v18 }
 0x8c5   : > { %s4957_s9 = smul.f32 %s4956_s11, %s4955_s10  ;;  %s7336_s10 = smov 121  }
 0x8c6   : > { %s7337_s11 = smov 119  }
 0x8c7   : > { %s4958_s13 = ssub.f32 %s7197_s12, %s4957_s9  ;;  %s7338_s12 = smov 112  }
 0x8c9   : > { %s4961_s14 = smul.f32 0.0012771392, %s4958_s13  ;;  %s7339_s13 = smov 111  }
 0x8cb   : > { %v4962_v10 = vstv %s4961_s14  ;;  %s7340_s14 = smov 96  }
 0x8cc   : > { %7274 = vrsqrt.f32 %v4962_v10  ;;  %vm4965_vm7 = vcmp.eq.f32.partialorder %v4962_v10, inf  ;;  %v4968_v58 = vand.u32 2147483648, %v4962_v10  ;;  %vm4967_vm8 = vcmp.eq.f32.partialorder %v4962_v10, 0.0 }
 0x8d9   : > { %v7275_v11 = vpop.eup %7274 }
 0x8da   : > { %v4964_v13 = vmul.f32 %v7275_v11, %v4962_v10  ;;  %v6955_v11 = vld [vmem:[%s8281_s7 + $0x14] sm:$0xf] }
 0x8dc   : > { %v4966_v14 = vsel %vm4965_vm7, %v4962_v10, %v4964_v13  ;;  %vm5332_vm7 = vcmask 916480  }
 0x8dd   : > { %v4969_v16 = vsel %vm4967_vm8, %v4968_v58, %v4966_v14  ;;  %vm5420_vm8 = vcmask 908288  }
 0x8de   : > { %7198 = vpush %v4969_v16  ;;  %v6959_v16 = vld [vmem:[%s8281_s7 + $0x18] sm:$0xf] }
 0x90f   : > { %s7199_s17 = spop %7198 }
 0x910   : > { %s4971_s24 = sadd.f32 1e-05, %s7199_s17  ;;  %s7341_s17 = smov 95  }
 0x912   : > { %v4972_v46 = vstv %s4971_s24  ;;  %s7342_s24 = smov 94  }
 0x913   : > { %7276 = vrcp.f32 %v4972_v46 }
 0x920   : > { %v7277_v17 = vpop.eup %7276 }
 0x921   : > { %7200 = vpush %v7277_v17 }
 0x952   : > { %s7201_s25 = spop %7200 }
 0x953   : > { %v4978_v60 = vstv %s7201_s25 }
 0x954   : > { %v4979_v49 = vmul.f32 %v4978_v60, %v4976_v19  ;;  %v4980_v20 = vmul.f32 %v4978_v60, %v4977_v21  ;;  %v6963_v19 = vld [vmem:[%s8281_s7 + $0x1c] sm:$0xf] }
 0x956   : > { %v4987_v34 = vmul.f32 %v4985_v25, %v4979_v49  ;;  %v4988_v36 = vmul.f32 %v4985_v25, %v4980_v20  ;;  %v6967_v49 = vld [vmem:[%s8281_s7 + $0x20] sm:$0xf] }
 0x958   : > { %v4995_v62 = vadd.f32 %v4993_v37, %v4987_v34  ;;  %v4996_v38 = vadd.f32 %v4993_v37, %v4988_v36 }
 0x95a   : > { %v4997_v51 = vmax.f32 %v4995_v62, 0.0  ;;  %v4998_v22 = vmax.f32 %v4996_v38, 0.0 }
 0x95c   : > { %5006 = vrot.lane.b32.xlu0 %v4997_v51, %s8387_s1  ;;  %5001 = vrot.lane.b32.xlu1 %v4997_v51, %s8388_s0  ;;  %v5037_v39 = vcombine.low %v4997_v51, %v4998_v22 }
 0x960   : > { %5011 = vrot.lane.b32.xlu0 %v4997_v51, %s7329_s30  ;;  %5046 = vrot.lane.b32.xlu1 %v4998_v22, %s7330_s28 }
 0x964   : > { %5016 = vrot.lane.b32.xlu0 %v4997_v51, %s8389_s18  ;;  %5050 = vrot.lane.b32.xlu1 %v4998_v22, %s8370_s22 }
 0x968   : > { %5021 = vrot.lane.b32.xlu0 %v4997_v51, %s7331_s20  ;;  %5054 = vrot.lane.b32.xlu1 %v4998_v22, %s8372_s27 }
 0x96c   : > { %5026 = vrot.lane.b32.xlu0 %v4997_v51, %s7332_s23  ;;  %5038 = vrot.lane.b32.xlu1 %v5037_v39, %s7333_s29 }
 0x970   : > { %5031 = vrot.lane.b32.xlu0 %v4997_v51, %s7334_s21  ;;  %5058 = vrot.lane.b32.xlu1 %v4998_v22, %s7335_s26  ;;  %s8392_s21 = sld [smem:[#allocation12_spill]] }
 0x971   : > { %s8396_s26 = sld [smem:[#allocation14_spill]] }
 0x974   : > { %5062 = vrot.lane.b32.xlu1 %v4998_v22, %s7336_s10  ;;  %s8398_s10 = sld [smem:[#allocation18_spill]] }
 0x978   : > { %5066 = vrot.lane.b32.xlu1 %v4998_v22, %s7337_s11 }
 0x9ce   : > { %v5007_v42 = vpop.permute.xlu0 %5006  ;;  %v5002_v3 = vpop.permute.xlu1 %5001 }
 0x9cf   : > { %5005 = vst.msk [vmem:[#allocation4] sm:$0xf] %vm5004_vm11, %v5002_v3 }
 0x9d0   : > { %5010 = vst.msk [vmem:[#allocation4] sm:$0xf] %vm5009_vm12, %v5007_v42 }
 0x9d2   : > { %v5012_v29 = vpop.permute.xlu0 %5011  ;;  %v5047_v45 = vpop.permute.xlu1 %5046 }
 0x9d3   : > { %5015 = vst.msk [vmem:[#allocation4] sm:$0xf] %vm5014_vm14, %v5012_v29 }
 0x9d6   : > { %v5017_v43 = vpop.permute.xlu0 %5016  ;;  %v5051_v24 = vpop.permute.xlu1 %5050 }
 0x9d7   : > { %5020 = vst.msk [vmem:[#allocation4] sm:$0xf] %vm5019_vm15, %v5017_v43 }
 0x9da   : > { %v5022_v47 = vpop.permute.xlu0 %5021  ;;  %v5055_v48 = vpop.permute.xlu1 %5054 }
 0x9db   : > { %5025 = vst.msk [vmem:[#allocation4] sm:$0xf] %vm5024_vm0, %v5022_v47 }
 0x9de   : > { %v5027_v50 = vpop.permute.xlu0 %5026  ;;  %v5039_v0 = vpop.permute.xlu1 %5038 }
 0x9df   : > { %5030 = vst.msk [vmem:[#allocation4] sm:$0xf] %vm5029_vm2, %v5027_v50  ;;  %v5040_v31 = vrot.slane %v5039_v0, 4 }
 0x9e1   : > { %v5042_v52 = vsel %vm5041_vm3, %v5039_v0, %v5040_v31 }
 0x9e2   : > { %5045 = vst.msk [vmem:[#allocation4 + $0x4] sm:$0xf] %vm5044_vm4, %v5042_v52  ;;  %v5032_v55 = vpop.permute.xlu0 %5031  ;;  %v5059_v26 = vpop.permute.xlu1 %5058 }
 0x9e3   : > { %5049 = vst.msk [vmem:[#allocation4 + $0x4] sm:$0xf] %vm5004_vm11, %v5047_v45  ;;  %vm5595_vm11 = vcmask 785408  }
 0x9e4   : > { %5035 = vst.msk [vmem:[#allocation4] sm:$0xf] %vm5034_vm5, %v5032_v55 }
 0x9e5   : > { %5053 = vst.msk [vmem:[#allocation4 + $0x4] sm:$0xf] %vm5009_vm12, %v5051_v24  ;;  %vm5683_vm12 = vcmask 777216  }
 0x9e6   : > { %5057 = vst.msk [vmem:[#allocation4 + $0x4] sm:$0xf] %vm5014_vm14, %v5055_v48  ;;  %v5063_v53 = vpop.permute.xlu1 %5062  ;;  %vm5771_vm14 = vcmask 769024  }
 0x9e7   : > { %5061 = vst.msk [vmem:[#allocation4 + $0x4] sm:$0xf] %vm5019_vm15, %v5059_v26  ;;  %vm5886_vm15 = vcmask 1043592  }
 0x9e8   : > { %5065 = vst.msk [vmem:[#allocation4 + $0x4] sm:$0xf] %vm5024_vm0, %v5063_v53  ;;  %vm5887_vm0 = vcmask 908292  }
 0x9e9   : > { %vm8155_vm3 = vmor %vm5887_vm0, %vm5886_vm15 }
 0x9ea   : > { %v5067_v9 = vpop.permute.xlu1 %5066 }
 0x9eb   : > { %5069 = vst.msk [vmem:[#allocation4 + $0x4] sm:$0xf] %vm5029_vm2, %v5067_v9  ;;  %vm5883_vm2 = vcmask 138240  }
 0x9f2   : > { %v5071_v54 = vld [vmem:[#allocation4] sm:$0xff] }
 0x9f3   : > { %5077 = vrot.lane.b32.xlu0 %v5071_v54, %s8370_s22  ;;  %v5076_v12 = vcombine.high %v5071_v54, %v5071_v54 }
 0x9f5   : > { %5079 = vrot.lane.b32.xlu1 %v5076_v12, %s8370_s22  ;;  %6940 = vmatprep.subr.msk.mxu0 %vm4925_vm1, %v5076_v12 }
 0x9f6   : > { %6941 = vmatpush1.msk.msra.mxu0 %vm4925_vm1, %v5071_v54 }
 0x9f7   : > { %5241 = vrot.lane.b32.xlu0 %v5071_v54, %s8371_s2  ;;  %6942 = vmatmul.mubr.msk.f32.vlgmr.msra.gmra.mxu0 %vm5082_vm6, %v5072_v33 }
 0x9f8   : > { %5405 = vmatprep.mubr.f32.mxu0 %v7816_v7 }
 0x9f9   : > { %5243 = vrot.lane.b32.xlu1 %v5076_v12, %s8371_s2 }
 0x9fb   : > { %5328 = vrot.lane.b32.xlu0 %v5071_v54, %s7338_s12 }
 0x9fd   : > { %5330 = vrot.lane.b32.xlu1 %v5076_v12, %s7338_s12 }
 0x9ff   : > { %5416 = vrot.lane.b32.xlu0 %v5071_v54, %s7339_s13 }
 0xa01   : > { %5418 = vrot.lane.b32.xlu1 %v5076_v12, %s7339_s13 }
 0xa03   : > { %5504 = vrot.lane.b32.xlu0 %v5071_v54, %s8377_s19 }
 0xa05   : > { %5506 = vrot.lane.b32.xlu1 %v5076_v12, %s8377_s19 }
 0xa07   : > { %5591 = vrot.lane.b32.xlu0 %v5071_v54, %s7340_s14 }
 0xa09   : > { %5593 = vrot.lane.b32.xlu1 %v5076_v12, %s7340_s14 }
 0xa0b   : > { %5679 = vrot.lane.b32.xlu0 %v5071_v54, %s7341_s17 }
 0xa0d   : > { %5681 = vrot.lane.b32.xlu1 %v5076_v12, %s7341_s17 }
 0xa0f   : > { %5767 = vrot.lane.b32.xlu0 %v5071_v54, %s7342_s24 }
 0xa11   : > { %5769 = vrot.lane.b32.xlu1 %v5076_v12, %s7342_s24 }
 0xa13   : > { %5856 = vperm.xlu0 %7265, %v5853_v61  }
 0xa65   : > { %v5078_v57 = vpop.permute.xlu0 %5077 }
 0xa67   : > { %v5080_v28 = vpop.permute.xlu1 %5079 }
 0xa68   : > { %v5081_v63 = vsel %vm2713_vm9, %v5078_v57, %v5080_v28  ;;  %6937 = vmatprep.subr.msk.mxu1 %vm4925_vm1, %v5080_v28 }
 0xa69   : > { %v5242_v1 = vpop.permute.xlu0 %5241  ;;  %6938 = vmatpush1.msk.msra.mxu1 %vm4925_vm1, %v5081_v63 }
 0xa6a   : > { %6939 = vmatmul.mubr.msk.f32.vlgmr.msra.gmra.mxu1 %vm5082_vm6, %v6936_v41 }
 0xa6b   : > { %v5244_v15 = vpop.permute.xlu1 %5243  ;;  %5317 = vmatprep.mubr.f32.mxu1 %v7816_v7 }
 0xa6c   : > { %v5245_v2 = vsel %vm2871_vm10, %v5242_v1, %v5244_v15  ;;  %6944 = vmatprep.subr.msk.mxu1 %vm4925_vm1, %v5244_v15  ;;  %v5070_v15 = vld [vmem:[%s8290_s16] sm:$0x3] }
 0xa6d   : > { %v5329_v59 = vpop.permute.xlu0 %5328  ;;  %6945 = vmatpush1.msk.msra.mxu1 %vm4925_vm1, %v5245_v2 }
 0xa6e   : > { %6946 = vmatmul.mubr.msk.f32.vlgmr.msra.gmra.mxu1 %vm5082_vm6, %v6943_v35 }
 0xa6f   : > { %v5331_v30 = vpop.permute.xlu1 %5330  ;;  %5493 = vmatprep.mubr.f32.mxu1 %v7816_v7 }
 0xa70   : > { %v5333_v56 = vsel %vm5332_vm7, %v5329_v59, %v5331_v30  ;;  %6948 = vmatprep.subr.msk.mxu0 %vm4925_vm1, %v5331_v30 }
 0xa71   : > { %v5417_v5 = vpop.permute.xlu0 %5416  ;;  %6949 = vmatpush1.msk.msra.mxu0 %vm4925_vm1, %v5333_v56 }
 0xa72   : > { %6950 = vmatmul.mubr.msk.f32.vlgmr.msra.gmra.mxu0 %vm5082_vm6, %v6947_v4  ;;  %v8146_v4 = vrot.slane %v5070_v15, %v4915_v27 }
 0xa73   : > { %v5419_v6 = vpop.permute.xlu1 %5418  ;;  %5580 = vmatprep.mubr.f32.mxu0 %v8101_v8 }
 0xa74   : > { %v5421_v7 = vsel %vm5420_vm8, %v5417_v5, %v5419_v6  ;;  %6952 = vmatprep.subr.msk.mxu1 %vm4925_vm1, %v5419_v6  ;;  %v8150_v5 = vrot.slane %v5070_v15, %v4919_v40 }
 0xa75   : > { %v5505_v32 = vpop.permute.xlu0 %5504  ;;  %6953 = vmatpush1.msk.msra.mxu1 %vm4925_vm1, %v5421_v7 }
 0xa76   : > { %6954 = vmatmul.mubr.msk.f32.vlgmr.msra.gmra.mxu1 %vm5082_vm6, %v6951_v44 }
 0xa77   : > { %v5507_v10 = vpop.permute.xlu1 %5506  ;;  %5668 = vmatprep.mubr.f32.mxu1 %v8101_v8 }
 0xa78   : > { %v5508_v13 = vsel %vm3132_vm13, %v5505_v32, %v5507_v10  ;;  %6956 = vmatprep.subr.msk.mxu0 %vm4925_vm1, %v5507_v10 }
 0xa79   : > { %v5592_v58 = vpop.permute.xlu0 %5591  ;;  %6957 = vmatpush1.msk.msra.mxu0 %vm4925_vm1, %v5508_v13 }
 0xa7a   : > { %6958 = vmatmul.mubr.msk.f32.vlgmr.msra.gmra.mxu0 %vm5082_vm6, %v6955_v11 }
 0xa7b   : > { %v5594_v14 = vpop.permute.xlu1 %5593  ;;  %5756 = vmatprep.mubr.f32.mxu0 %v8101_v8 }
 0xa7c   : > { %v5596_v46 = vsel %vm5595_vm11, %v5592_v58, %v5594_v14  ;;  %6960 = vmatprep.subr.msk.mxu1 %vm4925_vm1, %v5594_v14  ;;  %v5891_v58 = vld [vmem:[%s8392_s21] sm:$0xf] }
 0xa7d   : > { %v5680_v17 = vpop.permute.xlu0 %5679  ;;  %6961 = vmatpush1.msk.msra.mxu1 %vm4925_vm1, %v5596_v46 }
 0xa7e   : > { %6962 = vmatmul.mubr.msk.f32.vlgmr.msra.gmra.mxu1 %vm5082_vm6, %v6959_v16 }
 0xa7f   : > { %v5682_v18 = vpop.permute.xlu1 %5681  ;;  %5844 = vmatprep.mubr.f32.mxu1 %v8101_v8 }
 0xa80   : > { %v5684_v21 = vsel %vm5683_vm12, %v5680_v17, %v5682_v18  ;;  %6964 = vmatprep.subr.msk.mxu0 %vm4925_vm1, %v5682_v18  ;;  %v6971_v18 = vld [vmem:[%s8392_s21 + $0x4] sm:$0xf] }
 0xa81   : > { %6965 = vmatpush1.msk.msra.mxu0 %vm4925_vm1, %v5684_v21  ;;  %v5768_v60 = vpop.permute.xlu0 %5767 }
 0xa82   : > { %6966 = vmatmul.mubr.msk.f32.vlgmr.msra.gmra.mxu0 %vm5082_vm6, %v6963_v19 }
 0xa83   : > { %v5770_v25 = vpop.permute.xlu1 %5769  ;;  %5972 = vmatprep.mubr.f32.mxu0 %v8101_v8 }
 0xa84   : > { %v5772_v20 = vsel %vm5771_vm14, %v5768_v60, %v5770_v25  ;;  %6968 = vmatprep.subr.msk.mxu1 %vm4925_vm1, %v5770_v25  ;;  %v6978_v25 = vld [vmem:[%s8392_s21 + $0x8] sm:$0xf] }
 0xa85   : > { %6969 = vmatpush1.msk.msra.mxu1 %vm4925_vm1, %v5772_v20 }
 0xa86   : > { %6970 = vmatmul.mubr.msk.f32.vlgmr.msra.gmra.mxu1 %vm5082_vm6, %v6967_v49 }
 0xa87   : > { %6050 = vmatprep.mubr.f32.mxu1 %v8101_v8 }
 0xa8e   : > { %v5857_v1 = vpop.permute.xlu0 %5856 }
 0xab7   : > { %v5234_v36 = vpop.f32.mrf.mxu0 }
 0xab9   : > { %v5236_v38 = vpop.f32.mrf.mxu0 }
 0xb2a   : > { %v5156_v34 = vpop.f32.mrf.mxu1 }
 0xb2b   : > { %v5235_v62 = vadd.f32 %v5234_v36, %v5156_v34  ;;  %v6982_v36 = vld [vmem:[%s8392_s21 + $0xc] sm:$0xf] }
 0xb2c   : > { %v5158_v37 = vpop.f32.mrf.mxu1 }
 0xb2d   : > { %v5237_v22 = vadd.f32 %v5236_v38, %v5158_v37 }
 0xb2e   : > { %v5319_v51 = vpop.f32.mrf.mxu1 }
 0xb2f   : > { %v5324_v39 = vadd.f32 %v5319_v51, %v5235_v62  ;;  %v6986_v51 = vld [vmem:[%s8392_s21 + $0x10] sm:$0xf] }
 0xb30   : > { %v5321_v42 = vpop.f32.mrf.mxu1 }
 0xb31   : > { %v5325_v29 = vadd.f32 %v5321_v42, %v5237_v22 }
 0xb32   : > { %v5407_v3 = vpop.f32.mrf.mxu0 }
 0xb33   : > { %v5412_v45 = vadd.f32 %v5407_v3, %v5324_v39  ;;  %v6990_v3 = vld [vmem:[%s8392_s21 + $0x14] sm:$0xf] }
 0xb34   : > { %v5409_v43 = vpop.f32.mrf.mxu0 }
 0xb35   : > { %v5413_v47 = vadd.f32 %v5409_v43, %v5325_v29 }
 0xb36   : > { %v5495_v24 = vpop.f32.mrf.mxu1 }
 0xb37   : > { %v5500_v48 = vadd.f32 %v5495_v24, %v5412_v45  ;;  %v6994_v24 = vld [vmem:[%s8392_s21 + $0x18] sm:$0xf] }
 0xb38   : > { %v5497_v50 = vpop.f32.mrf.mxu1 }
 0xb39   : > { %v5501_v31 = vadd.f32 %v5497_v50, %v5413_v47 }
 0xb3a   : > { %v5582_v0 = vpop.f32.mrf.mxu0 }
 0xb3b   : > { %v5587_v52 = vadd.f32 %v5582_v0, %v5500_v48  ;;  %v6998_v0 = vld [vmem:[%s8392_s21 + $0x1c] sm:$0xf] }
 0xb3c   : > { %v5584_v55 = vpop.f32.mrf.mxu0 }
 0xb3d   : > { %v5588_v53 = vadd.f32 %v5584_v55, %v5501_v31 }
 0xb3e   : > { %v5670_v26 = vpop.f32.mrf.mxu1 }
 0xb3f   : > { %v5675_v9 = vadd.f32 %v5670_v26, %v5587_v52  ;;  %v7002_v26 = vld [vmem:[%s8392_s21 + $0x20] sm:$0xf] }
 0xb40   : > { %v5672_v54 = vpop.f32.mrf.mxu1 }
 0xb41   : > { %v5676_v61 = vadd.f32 %v5672_v54, %v5588_v53 }
 0xb42   : > { %v5758_v12 = vpop.f32.mrf.mxu0 }
 0xb43   : > { %v5763_v57 = vadd.f32 %v5758_v12, %v5675_v9 }
 0xb44   : > { %v5760_v33 = vpop.f32.mrf.mxu0 }
 0xb45   : > { %v5764_v41 = vadd.f32 %v5760_v33, %v5676_v61 }
 0xb46   : > { %v5846_v28 = vpop.f32.mrf.mxu1 }
 0xb47   : > { %v5851_v63 = vadd.f32 %v5846_v28, %v5763_v57 }
 0xb48   : > { %v5848_v35 = vpop.f32.mrf.mxu1 }
 0xb49   : > { %v5859_v2 = vadd.f32 %v5857_v1, %v5851_v63  ;;  %v5852_v59 = vadd.f32 %v5848_v35, %v5764_v41 }
 0xb4b   : > { %v5861_v30 = vmax.f32 %v5859_v2, 0.0  ;;  %v5860_v56 = vadd.f32 %v5857_v1, %v5852_v59 }
 0xb4d   : > { %v5862_v6 = vmax.f32 %v5860_v56, 0.0  ;;  %v5875_v44 = vmul.f32 %v8146_v4, %v5861_v30 }
 0xb4f   : > { %v5876_v7 = vmul.f32 %v8150_v5, %v5862_v6 }
 0xb51   : > { %v5879_v32 = vcombine.low %v5875_v44, %v5876_v7 }
 0xb53   : > { %5880 = vrot.lane.b32.xlu1 %v5879_v32, %s8388_s0 }
 0xbc5   : > { %v5881_v10 = vpop.permute.xlu1 %5880 }
 0xbc6   : > { %v5882_v11 = vrot.slane %v5881_v10, 4 }
 0xbc8   : > { %v5884_v23 = vsel %vm5883_vm2, %v5882_v11, %v5881_v10 }
 0xbc9   : > { %5889 = vst.msk [vmem:[#allocation5] sm:$0xff] %vm8155_vm3, %v5884_v23 }
 0xbd0   : > { %v5890_v40 = vld [vmem:[#allocation5] sm:$0xff] }
 0xbd1   : > { %5896 = vrot.lane.b32.xlu0 %v5890_v40, %s8370_s22  ;;  %v5895_v13 = vcombine.high %v5890_v40, %v5890_v40 }
 0xbd3   : > { %5898 = vrot.lane.b32.xlu1 %v5895_v13, %s8370_s22  ;;  %6975 = vmatprep.subr.msk.mxu1 %vm4925_vm1, %v5895_v13  ;;  %s8395_s22 = sld [smem:[#allocation8_spill]] }
 0xbd4   : > { %6976 = vmatpush1.msk.msra.mxu1 %vm4925_vm1, %v5890_v40 }
 0xbd5   : > { %6059 = vrot.lane.b32.xlu0 %v5890_v40, %s8371_s2  ;;  %6977 = vmatmul.mubr.msk.f32.vlgmr.msra.gmra.mxu1 %vm5082_vm6, %v5891_v58 }
 0xbd6   : > { %6222 = vmatprep.mubr.f32.mxu1 %v8101_v8 }
 0xbd7   : > { %6061 = vrot.lane.b32.xlu1 %v5895_v13, %s8371_s2 }
 0xbd9   : > { %6146 = vrot.lane.b32.xlu0 %v5890_v40, %s7338_s12 }
 0xbdb   : > { %6148 = vrot.lane.b32.xlu1 %v5895_v13, %s7338_s12  ;;  %s8393_s12 = sld [smem:[#allocation13_spill]] }
 0xbdd   : > { %6233 = vrot.lane.b32.xlu0 %v5890_v40, %s7339_s13 }
 0xbdf   : > { %6235 = vrot.lane.b32.xlu1 %v5895_v13, %s7339_s13 }
 0xbe1   : > { %6320 = vrot.lane.b32.xlu0 %v5890_v40, %s8377_s19  ;;  %v6666_v14 = vld [vmem:[%s8393_s12] sm:$0xf] }
 0xbe3   : > { %6322 = vrot.lane.b32.xlu1 %v5895_v13, %s8377_s19  ;;  %s8394_s19 = sld [smem:[#allocation15_spill]] }
 0xbe5   : > { %6407 = vrot.lane.b32.xlu0 %v5890_v40, %s7340_s14 }
 0xbe7   : > { %6409 = vrot.lane.b32.xlu1 %v5895_v13, %s7340_s14 }
 0xbe9   : > { %6494 = vrot.lane.b32.xlu0 %v5890_v40, %s7341_s17  ;;  %v6690_v16 = vld [vmem:[%s8394_s19] sm:$0x7] }
 0xbeb   : > { %6496 = vrot.lane.b32.xlu1 %v5895_v13, %s7341_s17 }
 0xbed   : > { %6581 = vrot.lane.b32.xlu0 %v5890_v40, %s7342_s24 }
 0xbef   : > { %6583 = vrot.lane.b32.xlu1 %v5895_v13, %s7342_s24 }
 0xbf1   : > { %6669 = vperm.xlu0 %7265, %v6666_v14  }
 0xbf5   : > { %6693 = vperm.xlu0 %7265, %v6690_v16  }
 0xc43   : > { %v5897_v46 = vpop.permute.xlu0 %5896 }
 0xc45   : > { %v5899_v17 = vpop.permute.xlu1 %5898 }
 0xc46   : > { %v5900_v19 = vsel %vm2713_vm9, %v5897_v46, %v5899_v17  ;;  %6972 = vmatprep.subr.msk.mxu0 %vm4925_vm1, %v5899_v17 }
 0xc47   : > { %v6060_v21 = vpop.permute.xlu0 %6059  ;;  %6973 = vmatpush1.msk.msra.mxu0 %vm4925_vm1, %v5900_v19 }
 0xc48   : > { %6974 = vmatmul.mubr.msk.f32.vlgmr.msra.gmra.mxu0 %vm5082_vm6, %v6971_v18 }
 0xc49   : > { %v6062_v60 = vpop.permute.xlu1 %6061  ;;  %6135 = vmatprep.mubr.f32.mxu0 %v8101_v8 }
 0xc4a   : > { %v6063_v49 = vsel %vm2871_vm10, %v6060_v21, %v6062_v60  ;;  %6979 = vmatprep.subr.msk.mxu0 %vm4925_vm1, %v6062_v60 }
 0xc4b   : > { %v6147_v20 = vpop.permute.xlu0 %6146  ;;  %6980 = vmatpush1.msk.msra.mxu0 %vm4925_vm1, %v6063_v49 }
 0xc4c   : > { %6981 = vmatmul.mubr.msk.f32.vlgmr.msra.gmra.mxu0 %vm5082_vm6, %v6978_v25 }
 0xc4d   : > { %v6149_v34 = vpop.permute.xlu1 %6148  ;;  %6309 = vmatprep.mubr.f32.mxu0 %v8101_v8 }
 0xc4e   : > { %v6150_v37 = vsel %vm5332_vm7, %v6147_v20, %v6149_v34  ;;  %6983 = vmatprep.subr.msk.mxu1 %vm4925_vm1, %v6149_v34 }
 0xc4f   : > { %v6234_v62 = vpop.permute.xlu0 %6233  ;;  %6984 = vmatpush1.msk.msra.mxu1 %vm4925_vm1, %v6150_v37 }
 0xc50   : > { %6985 = vmatmul.mubr.msk.f32.vlgmr.msra.gmra.mxu1 %vm5082_vm6, %v6982_v36 }
 0xc51   : > { %v6236_v38 = vpop.permute.xlu1 %6235  ;;  %6396 = vmatprep.mubr.f32.mxu1 %v8101_v8 }
 0xc52   : > { %v6237_v22 = vsel %vm5420_vm8, %v6234_v62, %v6236_v38  ;;  %6987 = vmatprep.subr.msk.mxu0 %vm4925_vm1, %v6236_v38 }
 0xc53   : > { %v6321_v39 = vpop.permute.xlu0 %6320  ;;  %6988 = vmatpush1.msk.msra.mxu0 %vm4925_vm1, %v6237_v22 }
 0xc54   : > { %6989 = vmatmul.mubr.msk.f32.vlgmr.msra.gmra.mxu0 %vm5082_vm6, %v6986_v51 }
 0xc55   : > { %v6323_v42 = vpop.permute.xlu1 %6322  ;;  %6483 = vmatprep.mubr.f32.mxu0 %v8101_v8 }
 0xc56   : > { %v6324_v29 = vsel %vm3132_vm13, %v6321_v39, %v6323_v42  ;;  %6991 = vmatprep.subr.msk.mxu1 %vm4925_vm1, %v6323_v42 }
 0xc57   : > { %v6408_v45 = vpop.permute.xlu0 %6407  ;;  %6992 = vmatpush1.msk.msra.mxu1 %vm4925_vm1, %v6324_v29 }
 0xc58   : > { %6993 = vmatmul.mubr.msk.f32.vlgmr.msra.gmra.mxu1 %vm5082_vm6, %v6990_v3  ;;  %v6688_v3 = vld [vmem:[%s8396_s26] sm:$0x7] }
 0xc59   : > { %v6410_v43 = vpop.permute.xlu1 %6409  ;;  %6570 = vmatprep.mubr.f32.mxu1 %v8101_v8 }
 0xc5a   : > { %v6411_v47 = vsel %vm5595_vm11, %v6408_v45, %v6410_v43  ;;  %6995 = vmatprep.subr.msk.mxu0 %vm4925_vm1, %v6410_v43 }
 0xc5b   : > { %v6495_v48 = vpop.permute.xlu0 %6494  ;;  %6996 = vmatpush1.msk.msra.mxu0 %vm4925_vm1, %v6411_v47 }
 0xc5c   : > { %6997 = vmatmul.mubr.msk.f32.vlgmr.msra.gmra.mxu0 %vm5082_vm6, %v6994_v24 }
 0xc5d   : > { %v6497_v50 = vpop.permute.xlu1 %6496  ;;  %6657 = vmatprep.mubr.f32.mxu0 %v8101_v8 }
 0xc5e   : > { %v6498_v31 = vsel %vm5683_vm12, %v6495_v48, %v6497_v50  ;;  %6999 = vmatprep.subr.msk.mxu1 %vm4925_vm1, %v6497_v50 }
 0xc5f   : > { %7000 = vmatpush1.msk.msra.mxu1 %vm4925_vm1, %v6498_v31  ;;  %v6582_v52 = vpop.permute.xlu0 %6581 }
 0xc60   : > { %7001 = vmatmul.mubr.msk.f32.vlgmr.msra.gmra.mxu1 %vm5082_vm6, %v6998_v0 }
 0xc61   : > { %v6584_v55 = vpop.permute.xlu1 %6583  ;;  %6769 = vmatprep.mubr.f32.mxu1 %v8101_v8 }
 0xc62   : > { %v6585_v53 = vsel %vm5771_vm14, %v6582_v52, %v6584_v55  ;;  %7003 = vmatprep.subr.msk.mxu0 %vm4925_vm1, %v6584_v55 }
 0xc63   : > { %7004 = vmatpush1.msk.msra.mxu0 %vm4925_vm1, %v6585_v53 }
 0xc64   : > { %7005 = vmatmul.mubr.msk.f32.vlgmr.msra.gmra.mxu0 %vm5082_vm6, %v7002_v26 }
 0xc6c   : > { %v6670_v19 = vpop.permute.xlu0 %6669 }
 0xc95   : > { %v6052_v54 = vpop.f32.mrf.mxu1 }
 0xc97   : > { %v6054_v61 = vpop.f32.mrf.mxu1 }
 0xd08   : > { %v5974_v9 = vpop.f32.mrf.mxu0 }
 0xd09   : > { %v6053_v33 = vadd.f32 %v6052_v54, %v5974_v9 }
 0xd0a   : > { %v5976_v12 = vpop.f32.mrf.mxu0 }
 0xd0b   : > { %v6055_v28 = vadd.f32 %v6054_v61, %v5976_v12 }
 0xd0c   : > { %v6137_v57 = vpop.f32.mrf.mxu0 }
 0xd0d   : > { %v6142_v41 = vadd.f32 %v6137_v57, %v6053_v33 }
 0xd0e   : > { %v6139_v63 = vpop.f32.mrf.mxu0 }
 0xd0f   : > { %v6143_v15 = vadd.f32 %v6139_v63, %v6055_v28 }
 0xd10   : > { %v6224_v1 = vpop.f32.mrf.mxu1 }
 0xd11   : > { %v6229_v8 = vadd.f32 %v6224_v1, %v6142_v41 }
 0xd12   : > { %v6226_v35 = vpop.f32.mrf.mxu1 }
 0xd13   : > { %v6230_v59 = vadd.f32 %v6226_v35, %v6143_v15 }
 0xd14   : > { %v6311_v2 = vpop.f32.mrf.mxu0 }
 0xd15   : > { %v6316_v30 = vadd.f32 %v6311_v2, %v6229_v8 }
 0xd16   : > { %v6313_v56 = vpop.f32.mrf.mxu0 }
 0xd17   : > { %v6317_v44 = vadd.f32 %v6313_v56, %v6230_v59 }
 0xd18   : > { %v6398_v6 = vpop.f32.mrf.mxu1 }
 0xd19   : > { %v6403_v7 = vadd.f32 %v6398_v6, %v6316_v30 }
 0xd1a   : > { %v6400_v32 = vpop.f32.mrf.mxu1 }
 0xd1b   : > { %v6404_v11 = vadd.f32 %v6400_v32, %v6317_v44 }
 0xd1c   : > { %v6485_v10 = vpop.f32.mrf.mxu0 }
 0xd1d   : > { %v6490_v23 = vadd.f32 %v6485_v10, %v6403_v7 }
 0xd1e   : > { %v6487_v40 = vpop.f32.mrf.mxu0 }
 0xd1f   : > { %v6491_v14 = vadd.f32 %v6487_v40, %v6404_v11 }
 0xd20   : > { %v6572_v13 = vpop.f32.mrf.mxu1 }
 0xd21   : > { %v6577_v16 = vadd.f32 %v6572_v13, %v6490_v23 }
 0xd22   : > { %v6574_v58 = vpop.f32.mrf.mxu1 }
 0xd23   : > { %v6578_v17 = vadd.f32 %v6574_v58, %v6491_v14 }
 0xd24   : > { %v6659_v46 = vpop.f32.mrf.mxu0 }
 0xd25   : > { %v6664_v18 = vadd.f32 %v6659_v46, %v6577_v16 }
 0xd26   : > { %v6661_v21 = vpop.f32.mrf.mxu0 }
 0xd27   : > { %v6672_v60 = vadd.f32 %v6670_v19, %v6664_v18  ;;  %v6665_v25 = vadd.f32 %v6661_v21, %v6578_v17 }
 0xd29   : > { %v6674_v49 = vmax.f32 %v6672_v60, 0.0  ;;  %v6673_v20 = vadd.f32 %v6670_v19, %v6665_v25 }
 0xd2b   : > { %v6675_v34 = vmax.f32 %v6673_v20, 0.0  ;;  %v6677_v36 = vmul.f32 %v6674_v49, %v8146_v4 }
 0xd2d   : > { %v6678_v37 = vmul.f32 %v6675_v34, %v8150_v5  ;;  %v6694_v5 = vpop.permute.xlu0 %6693 }
 0xd2f   : > { %v6681_v62 = vcombine.low %v6677_v36, %v6678_v37 }
 0xd31   : > { %6682 = vrot.lane.b32.xlu1 %v6681_v62, %s8388_s0  ;;  %s8397_s0 = sshll.u32 %s8395_s22, 3 }
 0xd32   : > { %s545_s17 = scalar_lea.vmem %s8398_s10, %s8397_s0 }
 0xda3   : > { %v6683_v38 = vpop.permute.xlu1 %6682 }
 0xda4   : > { %v6684_v51 = vrot.slane %v6683_v38, 4 }
 0xda6   : > { %v6685_v22 = vsel %vm5883_vm2, %v6684_v51, %v6683_v38 }
 0xda7   : > { %6687 = vst.msk [vmem:[#allocation6] sm:$0xff] %vm8155_vm3, %v6685_v22 }
 0xdae   : > { %v6689_v39 = vld [vmem:[#allocation6] sm:$0xff] }
 0xdaf   : > { %v6697_v42 = vcombine.high %v6689_v39, %v6689_v39 }
 0xdb1   : > { %7006 = vmatprep.subr.msk.mxu1 %vm4925_vm1, %v6697_v42 }
 0xdb2   : > { %7007 = vmatpush1.msk.msra.mxu1 %vm4925_vm1, %v6689_v39 }
 0xdb3   : > { %7008 = vmatmul.mubr.msk.f32.vlgmr.msra.gmra.mxu1 %vm5082_vm6, %v6688_v3 }
 0xe73   : > { %v6771_v4 = vpop.f32.mrf.mxu1 }
 0xe74   : > { %v6772_v45 = vadd.f32 %v6771_v4, %v6694_v5 }
 0xe75   : > { %v6773_v29 = vpop.f32.mrf.mxu1 }
 0xe76   : > { %v6774_v43 = vadd.f32 %v6773_v29, %v6694_v5 }
 0xe78   : > { %v6778_v27 = vcombine.low %v6772_v45, %v6774_v43 }
 0xe7a   : > { %6780 = vst [vmem:[%s545_s17] sm:$0x77] %v6778_v27 }
 0xe7b PF: > { %s8399_s24 = sld [smem:[#allocation7_spill]] }
 0xe81   : > { %s27_s24 = sadd.s32 1, %s8399_s24  }
 0xe82   : > { %p24_p4 = scmp.ge.s32.totalorder %s27_s24, 4  }
 0xe84   :  { %26 = sbr.rel (!%p24_p4) target bundleno = 11 (0xb), region = 174 }

</bundles_post_ra>
